<compile_context>
chip_gen: v7x
topology: tpu7x:2x2x1
jax: 0.10.0
libtpu: 0.0.40
codegen_flags: <defaults>
</compile_context>

<pallas_src>
import jax
import jax.numpy as jnp
from jax import lax
from jax.experimental import pallas as pl
from jax.experimental.pallas import tpu as pltpu

# ----- model hyper-parameters, exactly as hard-coded in EEGShallowConvNet.__init__ -----
K1 = 13          # temporal conv kernel width
K2 = 35          # avg-pool window
S1 = 7           # avg-pool stride
F1 = 40          # conv filters
C_EEG = 118      # "Channel" (EEG electrodes, conv H dim)
N_CLASS = 2
T_IN = 348                          # time samples  ->  makes Map == 1760 as hard-coded
T_CONV = T_IN - K1 + 1              # 336
T_POOL = (T_CONV - K2) // S1 + 1    # 44
MAP = F1 * T_POOL                   # 1760
BN2D_EPS = 0.0   # nn.BatchNorm2d(F1, False): 2nd positional arg is eps -> False == 0.0
BN1D_EPS = 1e-5

# lane/sublane aligned padded extents used inside the kernels (zero padding, exact math)
C_PAD = 128      # 118 -> 128 (K dim of the conv matmul; bf16 VMEM tiling pads to 128 anyway)
T_PAD = 384      # 348 -> 384 (lane dim; multiple of 128 so slices/rolls are lane-aligned)
P_OUT = 128      # 44 -> 128 pooled-time extent (lane-dense unmasked output stores)

VMEM_LIMIT = 32 * 1024 * 1024   # scoped-VMEM budget; safe on v5e/v6e (128 MiB) and v7x (64 MiB)
MAX_BB = 8       # batch-block cap: (K1*F1, bb*T_PAD) f32 matmul result + roll temps in VMEM

# --- static invariants the roll-based tap accumulation / batch-in-N layout relies on ---
assert T_PAD % 128 == 0 and T_PAD >= T_IN
assert (T_POOL - 1) * S1 + K2 == T_CONV           # last pool window ends exactly at T_CONV
assert T_PAD >= T_CONV + K1 - 1                   # roll wrap lands only in pool-zeroed columns
assert F1 % 8 == 0 and (K1 * F1) % 8 == 0         # sublane-aligned tap slices


# =============================================================================
# Kernel 1: Block1  (folded conv1+conv2+BN2d  ->  square  ->  avgpool  ->  log-clamp)
# =============================================================================
def _block1_kernel(x_ref, w_ref, b_ref, pool_ref, out_ref):
    """x_ref:(C_PAD, bb*T_PAD) bf16   w_ref:(K1*F1, C_PAD) bf16   b_ref:(F1,1) f32
    pool_ref:(T_PAD, P_OUT) bf16      out_ref:(bb, F1, P_OUT) f32"""
    bb = out_ref.shape[0]
    nbt = x_ref.shape[1]                 # bb * T_PAD

    # One MXU matmul covers all K1 taps (stacked in M) and the whole batch block (in N).
    z = jnp.dot(w_ref[...], x_ref[...], preferred_element_type=jnp.float32)  # (K1*F1, nbt)

    # y[f, t] = bias[f] + sum_k z[k*F1 + f, t + k]; the +k shift is an XLU roll.
    # roll(zk, nbt-k)[:, t] == zk[:, t+k] for t+k < nbt; wrap-around / cross-sample pulls
    # only land in columns with t % T_PAD >= T_CONV, which the pool matrix zeroes out.
    # Two interleaved accumulators keep the dependent VPU add chain short.
    accs = [z[0:F1, :], pltpu.roll(z[F1:2 * F1, :], nbt - 1, axis=1)]
    for k in range(2, K1):
        accs[k % 2] = accs[k % 2] + pltpu.roll(z[k * F1:(k + 1) * F1, :], nbt - k, axis=1)

    y = accs[0] + accs[1] + b_ref[...]            # conv+BN2d bias (folded on host)
    y = (y * y).astype(jnp.bfloat16)              # ActSquare; bf16 operand for the pool matmul

    pool = pool_ref[...]                          # resident constant, 1/K2 baked in
    for bi in range(bb):                          # bb <= MAX_BB, static unroll
        y_b = y[:, bi * T_PAD:(bi + 1) * T_PAD]   # lane-aligned static slice (F1, T_PAD)
        pooled = jnp.dot(y_b, pool, preferred_element_type=jnp.float32)     # (F1, P_OUT)
        # ActLog: log(clamp(x, min=1e-6));  Dropout(p=0.25) is identity at inference.
        # TODO(synk): training-mode dropout RNG mask not implemented (inference only).
        out_ref[bi] = jnp.log(jnp.maximum(pooled, jnp.float32(1e-6)))


def _pick_batch_block(batch, max_bb=MAX_BB):
    """Largest bb <= max_bb dividing batch while keeping >= 2 grid steps (prefer an even
    step count so both v7x TensorCores get balanced work)."""
    cands = [bb for bb in range(min(batch, max_bb), 0, -1)
             if batch % bb == 0 and batch // bb >= 2]
    if not cands:
        return batch if batch <= max_bb else 1
    even = [bb for bb in cands if (batch // bb) % 2 == 0]
    return even[0] if even else cands[0]


def block1(x_flat, w_flat, bias_eff, pool_mat, batch):
    bb = _pick_batch_block(batch)
    const = lambda arr: pl.BlockSpec(arr.shape, lambda i: (0,) * arr.ndim)
    return pl.pallas_call(
        _block1_kernel,
        out_shape=jax.ShapeDtypeStruct((batch, F1, P_OUT), jnp.float32),
        grid_spec=pltpu.PrefetchScalarGridSpec(
            num_scalar_prefetch=0,
            grid=(batch // bb,),
            in_specs=[
                pl.BlockSpec((C_PAD, bb * T_PAD), lambda i: (0, i)),   # batch block (in N)
                const(w_flat),                                         # (K1*F1, C_PAD) bf16
                const(bias_eff),                                       # (F1, 1) f32
                const(pool_mat),                                       # (T_PAD, P_OUT) bf16
            ],
            out_specs=pl.BlockSpec((bb, F1, P_OUT), lambda i: (i, 0, 0)),
        ),
        compiler_params=pltpu.CompilerParams(
            dimension_semantics=("parallel",),
            vmem_limit_bytes=VMEM_LIMIT),
    )(x_flat, w_flat, bias_eff, pool_mat)


# =============================================================================
# Kernel 2: Linear head.  BatchNorm1d layers are folded into fc1/fc2 on the host,
# so the kernel is just 3 matmuls + bias (fc1 contraction in bf16), batch-blocked.
# =============================================================================
def _mlp_kernel(h_ref, w1_ref, b1_ref, w2_ref, b2_ref, w3_ref, b3_ref, out_ref):
    z = jnp.dot(h_ref[...], w1_ref[...], preferred_element_type=jnp.float32) + b1_ref[...]
    z = jnp.dot(z, w2_ref[...], preferred_element_type=jnp.float32) + b2_ref[...]
    out_ref[...] = jnp.dot(z, w3_ref[...], preferred_element_type=jnp.float32) + b3_ref[...]


def mlp_head(h, w1f, b1f, w2f, b2f, w3, b3):
    B = h.shape[0]
    bm = min(B, 256)   # fill the 256-row MXU on v6e/v7x at large batch
    const = lambda arr: pl.BlockSpec(arr.shape, lambda i: (0,) * arr.ndim)
    return pl.pallas_call(
        _mlp_kernel,
        out_shape=jax.ShapeDtypeStruct((B, N_CLASS), jnp.float32),
        grid_spec=pltpu.PrefetchScalarGridSpec(
            num_scalar_prefetch=0,
            grid=(pl.cdiv(B, bm),),
            in_specs=[
                pl.BlockSpec((bm, MAP), lambda i: (i, 0)),
                const(w1f), const(b1f), const(w2f), const(b2f), const(w3), const(b3),
            ],
            out_specs=pl.BlockSpec((bm, N_CLASS), lambda i: (i, 0)),
        ),
        compiler_params=pltpu.CompilerParams(
            dimension_semantics=("parallel",),
            vmem_limit_bytes=VMEM_LIMIT),
    )(h, w1f, b1f, w2f, b2f, w3, b3)


# =============================================================================
# Host-side folding + full forward
# =============================================================================
def _pool_matrix():
    """(T_PAD, P_OUT) averaging matrix; rows >= T_CONV and columns >= T_POOL are zero."""
    t = jnp.arange(T_PAD)[:, None]
    j = jnp.arange(P_OUT)[None, :]
    valid = (j < T_POOL) & (t >= j * S1) & (t < j * S1 + K2)
    return jnp.where(valid, jnp.float32(1.0 / K2), jnp.float32(0.0))


@jax.jit
def eeg_shallow_convnet_forward(x_nchw, p):
    B = x_nchw.shape[0]

    # ---- fold conv1 + conv2 + BatchNorm2d (running stats) into one weight/bias ----
    var = jnp.maximum(p["bn_c_v"], 1e-12)          # guard rsqrt(0): BN2d eps is exactly 0.0
    scale = p["bn_c_g"] * lax.rsqrt(var + BN2D_EPS)                          # (F1,)
    # W_eff[k, f, c] = scale[f] * sum_g conv2_w[f,g,c] * conv1_w[g,k]
    w_eff = jnp.einsum("fgc,gk->kfc", p["conv2_w"], p["conv1_w"]) * scale[None, :, None]
    w_flat = jnp.pad(w_eff, ((0, 0), (0, 0), (0, C_PAD - C_EEG))
                     ).reshape(K1 * F1, C_PAD).astype(jnp.bfloat16)          # (520, 128)
    bias_eff = (scale * (p["conv2_b"] + p["conv2_w"].sum(axis=2) @ p["conv1_b"]
                         - p["bn_c_m"]) + p["bn_c_b"]).reshape(F1, 1)

    pool_mat = _pool_matrix().astype(jnp.bfloat16)                           # (T_PAD, P_OUT)

    # ---- pad input, fold batch into the matmul N dimension: (C_PAD, B*T_PAD) bf16 ----
    xb = x_nchw[:, 0, :, :].astype(jnp.float32)                              # (B, 118, 348)
    x_pad = jnp.pad(xb, ((0, 0), (0, C_PAD - C_EEG), (0, T_PAD - T_IN)))     # (B, 128, 384)
    x_flat = jnp.transpose(x_pad, (1, 0, 2)).reshape(C_PAD, B * T_PAD).astype(jnp.bfloat16)

    feats = block1(x_flat, w_flat, bias_eff, pool_mat, batch=B)              # (B, F1, P_OUT)
    h = feats[:, :, :T_POOL].reshape(B, MAP)     # == torch .view(B, -1) on (B, F1, 1, T_POOL)

    # ---- fold BatchNorm1d into the linear layers ----
    s1 = p["fb1_g"] * lax.rsqrt(p["fb1_v"] + BN1D_EPS)
    w1f = (p["fc1_w"] * s1[None, :]).astype(jnp.bfloat16)
    b1f = ((p["fc1_b"] - p["fb1_m"]) * s1 + p["fb1_b"]).reshape(1, -1)
    s2 = p["fb2_g"] * lax.rsqrt(p["fb2_v"] + BN1D_EPS)
    w2f = p["fc2_w"] * s2[None, :]
    b2f = ((p["fc2_b"] - p["fb2_m"]) * s2 + p["fb2_b"]).reshape(1, -1)

    logits = mlp_head(h.astype(jnp.bfloat16), w1f, b1f, w2f, b2f,
                      p["fc3_w"], p["fc3_b"].reshape(1, -1))

    zero = jnp.array(0, jnp.int32)       # the three constant "losses" returned by forward()
    return logits, zero, zero, zero


# =============================================================================
# Deterministic synthetic parameters (shapes dictated by the module's __init__)
# =============================================================================
def init_params(key):
    ks = iter(jax.random.split(key, 32))
    nrm = lambda shape, s=0.05: s * jax.random.normal(next(ks), shape, jnp.float32)
    uni = lambda shape: jax.random.uniform(next(ks), shape, jnp.float32, 0.5, 1.5)
    return {
        # Conv2d(1, F1, (1, K1)): weight (F1, 1, 1, K1) stored as (F1, K1)
        "conv1_w": nrm((F1, K1)), "conv1_b": nrm((F1,)),
        # Conv2d(F1, F1, (C_EEG, 1)): weight (F1, F1, C_EEG, 1) stored as (F1, F1, C_EEG)
        "conv2_w": nrm((F1, F1, C_EEG)), "conv2_b": nrm((F1,)),
        # BatchNorm2d(F1, eps=0.0)  (variance kept strictly positive)
        "bn_c_g": 1.0 + nrm((F1,), 0.1), "bn_c_b": nrm((F1,), 0.1),
        "bn_c_m": nrm((F1,), 0.1),       "bn_c_v": uni((F1,)),
        # Linear(MAP, 128) / BatchNorm1d(128)   (linear weights stored transposed: (in, out))
        "fc1_w": nrm((MAP, 128)), "fc1_b": nrm((128,)),
        "fb1_g": 1.0 + nrm((128,), 0.1), "fb1_b": nrm((128,), 0.1),
        "fb1_m": nrm((128,), 0.1),       "fb1_v": uni((128,)),
        # Linear(128, 64) / BatchNorm1d(64)
        "fc2_w": nrm((128, 64)), "fc2_b": nrm((64,)),
        "fb2_g": 1.0 + nrm((64,), 0.1), "fb2_b": nrm((64,), 0.1),
        "fb2_m": nrm((64,), 0.1),       "fb2_v": uni((64,)),
        # Linear(64, 2)
        "fc3_w": nrm((64, N_CLASS)), "fc3_b": nrm((N_CLASS,)),
    }


# Pure-JAX f32 reference of the same forward pass (for a correctness check).
def reference_forward(x_nchw, p):
    B = x_nchw.shape[0]
    xb = x_nchw[:, 0, :, :]                                                  # (B, C, T)
    xs = jnp.stack([xb[:, :, k:k + T_CONV] for k in range(K1)], axis=-1)     # (B, C, Tc, K1)
    y1 = jnp.einsum("bctk,gk->bgct", xs, p["conv1_w"]) + p["conv1_b"][None, :, None, None]
    y2 = jnp.einsum("bgct,fgc->bft", y1, p["conv2_w"]) + p["conv2_b"][None, :, None]
    y2 = ((y2 - p["bn_c_m"][None, :, None]) / jnp.sqrt(p["bn_c_v"][None, :, None] + BN2D_EPS)
          * p["bn_c_g"][None, :, None] + p["bn_c_b"][None, :, None])
    y2 = jnp.square(y2)
    pooled = jnp.stack([y2[:, :, j * S1:j * S1 + K2].mean(axis=-1) for j in range(T_POOL)],
                       axis=-1)                                              # (B, F1, T_POOL)
    h = jnp.log(jnp.maximum(pooled, 1e-6)).reshape(B, MAP)
    z = h @ p["fc1_w"] + p["fc1_b"]
    z = (z - p["fb1_m"]) / jnp.sqrt(p["fb1_v"] + BN1D_EPS) * p["fb1_g"] + p["fb1_b"]
    z = z @ p["fc2_w"] + p["fc2_b"]
    z = (z - p["fb2_m"]) / jnp.sqrt(p["fb2_v"] + BN1D_EPS) * p["fb2_g"] + p["fb2_b"]
    return z @ p["fc3_w"] + p["fc3_b"]


if __name__ == "__main__":
    key = jax.random.PRNGKey(0)
    kp, kx = jax.random.split(key)
    params = init_params(kp)
    # NCHW input, batch=2: (B, 1, Channel=118, T=348)  (T=348 gives Map=1760 exactly)
    x = jax.random.normal(kx, (2, 1, C_EEG, T_IN), jnp.float32)

    logits, l1, l2, l3 = eeg_shallow_convnet_forward(x, params)
    jax.block_until_ready(logits)

    ref = reference_forward(x, params)
    max_err = float(jnp.max(jnp.abs(logits - ref)))
    assert logits.shape == (2, N_CLASS) and logits.dtype == jnp.float32
    # bf16 MXU operands through square->log->MLP give ~1% relative error on O(0.5) logits;
    # 1e-1 absolute still cleanly separates numerics from structural/indexing bugs.
    assert max_err < 1e-1, f"mismatch vs reference: {max_err}"
    print("KERNEL_OK")
</pallas_src>

<mosaic_0001>
module attributes {stable_mosaic.version = 11 : i64} {
  func.func @_block1_kernel(%arg0: i32, %arg1: memref<128x384xbf16, #tpu.memory_space<vmem>>, %arg2: memref<520x128xbf16, #tpu.memory_space<vmem>>, %arg3: memref<40x1xf32, #tpu.memory_space<vmem>>, %arg4: memref<384x128xbf16, #tpu.memory_space<vmem>>, %arg5: memref<1x40x128xf32, #tpu.memory_space<vmem>>) attributes {dimension_semantics = [#tpu.dimension_semantics<parallel>], iteration_bounds = array<i64: 2>, scalar_prefetch = 0 : i64, scratch_operands = 0 : i64, tpu.core_type = #tpu.core_type<tc>, window_params = [{transform_indices = @transform_0, window_bounds = array<i64: 128, 384>}, {pipeline_mode = #tpu.pipeline_mode<synchronous>, transform_indices = @transform_1, window_bounds = array<i64: 520, 128>}, {pipeline_mode = #tpu.pipeline_mode<synchronous>, transform_indices = @transform_2, window_bounds = array<i64: 40, 1>}, {pipeline_mode = #tpu.pipeline_mode<synchronous>, transform_indices = @transform_3, window_bounds = array<i64: 384, 128>}, {transform_indices = @transform_4, window_bounds = array<i64: 1, 40, 128>}]} {
    %c0 = arith.constant 0 : index
    %c0_0 = arith.constant 0 : index
    %0 = vector.load %arg2[%c0, %c0_0] : memref<520x128xbf16, #tpu.memory_space<vmem>>, vector<520x128xbf16>
    %c0_1 = arith.constant 0 : index
    %c0_2 = arith.constant 0 : index
    %1 = vector.load %arg1[%c0_1, %c0_2] : memref<128x384xbf16, #tpu.memory_space<vmem>>, vector<128x384xbf16>
    %cst = arith.constant dense<0.000000e+00> : vector<520x384xf32>
    %2 = tpu.matmul %0, %1, %cst {dimension_numbers = #tpu.dot_dimension_numbers<[1], [0], [0], [1], [0, 0, 1, 1], [], []>} : vector<520x128xbf16>, vector<128x384xbf16>, vector<520x384xf32> -> vector<520x384xf32>
    %3 = vector.extract_strided_slice %2 {offsets = [0, 0], sizes = [40, 384], strides = [1, 1]} : vector<520x384xf32> to vector<40x384xf32>
    %4 = vector.extract_strided_slice %2 {offsets = [40, 0], sizes = [40, 384], strides = [1, 1]} : vector<520x384xf32> to vector<40x384xf32>
    %c383_i32 = arith.constant 383 : i32
    %5 = tpu.dynamic_rotate %4 by %c383_i32 dim 1 : vector<40x384xf32>, i32 -> vector<40x384xf32>
    %6 = vector.extract_strided_slice %2 {offsets = [80, 0], sizes = [40, 384], strides = [1, 1]} : vector<520x384xf32> to vector<40x384xf32>
    %c382_i32 = arith.constant 382 : i32
    %7 = tpu.dynamic_rotate %6 by %c382_i32 dim 1 : vector<40x384xf32>, i32 -> vector<40x384xf32>
    %8 = arith.addf %3, %7 : vector<40x384xf32>
    %9 = vector.extract_strided_slice %2 {offsets = [120, 0], sizes = [40, 384], strides = [1, 1]} : vector<520x384xf32> to vector<40x384xf32>
    %c381_i32 = arith.constant 381 : i32
    %10 = tpu.dynamic_rotate %9 by %c381_i32 dim 1 : vector<40x384xf32>, i32 -> vector<40x384xf32>
    %11 = arith.addf %5, %10 : vector<40x384xf32>
    %12 = vector.extract_strided_slice %2 {offsets = [160, 0], sizes = [40, 384], strides = [1, 1]} : vector<520x384xf32> to vector<40x384xf32>
    %c380_i32 = arith.constant 380 : i32
    %13 = tpu.dynamic_rotate %12 by %c380_i32 dim 1 : vector<40x384xf32>, i32 -> vector<40x384xf32>
    %14 = arith.addf %8, %13 : vector<40x384xf32>
    %15 = vector.extract_strided_slice %2 {offsets = [200, 0], sizes = [40, 384], strides = [1, 1]} : vector<520x384xf32> to vector<40x384xf32>
    %c379_i32 = arith.constant 379 : i32
    %16 = tpu.dynamic_rotate %15 by %c379_i32 dim 1 : vector<40x384xf32>, i32 -> vector<40x384xf32>
    %17 = arith.addf %11, %16 : vector<40x384xf32>
    %18 = vector.extract_strided_slice %2 {offsets = [240, 0], sizes = [40, 384], strides = [1, 1]} : vector<520x384xf32> to vector<40x384xf32>
    %c378_i32 = arith.constant 378 : i32
    %19 = tpu.dynamic_rotate %18 by %c378_i32 dim 1 : vector<40x384xf32>, i32 -> vector<40x384xf32>
    %20 = arith.addf %14, %19 : vector<40x384xf32>
    %21 = vector.extract_strided_slice %2 {offsets = [280, 0], sizes = [40, 384], strides = [1, 1]} : vector<520x384xf32> to vector<40x384xf32>
    %c377_i32 = arith.constant 377 : i32
    %22 = tpu.dynamic_rotate %21 by %c377_i32 dim 1 : vector<40x384xf32>, i32 -> vector<40x384xf32>
    %23 = arith.addf %17, %22 : vector<40x384xf32>
    %24 = vector.extract_strided_slice %2 {offsets = [320, 0], sizes = [40, 384], strides = [1, 1]} : vector<520x384xf32> to vector<40x384xf32>
    %c376_i32 = arith.constant 376 : i32
    %25 = tpu.dynamic_rotate %24 by %c376_i32 dim 1 : vector<40x384xf32>, i32 -> vector<40x384xf32>
    %26 = arith.addf %20, %25 : vector<40x384xf32>
    %27 = vector.extract_strided_slice %2 {offsets = [360, 0], sizes = [40, 384], strides = [1, 1]} : vector<520x384xf32> to vector<40x384xf32>
    %c375_i32 = arith.constant 375 : i32
    %28 = tpu.dynamic_rotate %27 by %c375_i32 dim 1 : vector<40x384xf32>, i32 -> vector<40x384xf32>
    %29 = arith.addf %23, %28 : vector<40x384xf32>
    %30 = vector.extract_strided_slice %2 {offsets = [400, 0], sizes = [40, 384], strides = [1, 1]} : vector<520x384xf32> to vector<40x384xf32>
    %c374_i32 = arith.constant 374 : i32
    %31 = tpu.dynamic_rotate %30 by %c374_i32 dim 1 : vector<40x384xf32>, i32 -> vector<40x384xf32>
    %32 = arith.addf %26, %31 : vector<40x384xf32>
    %33 = vector.extract_strided_slice %2 {offsets = [440, 0], sizes = [40, 384], strides = [1, 1]} : vector<520x384xf32> to vector<40x384xf32>
    %c373_i32 = arith.constant 373 : i32
    %34 = tpu.dynamic_rotate %33 by %c373_i32 dim 1 : vector<40x384xf32>, i32 -> vector<40x384xf32>
    %35 = arith.addf %29, %34 : vector<40x384xf32>
    %36 = vector.extract_strided_slice %2 {offsets = [480, 0], sizes = [40, 384], strides = [1, 1]} : vector<520x384xf32> to vector<40x384xf32>
    %c372_i32 = arith.constant 372 : i32
    %37 = tpu.dynamic_rotate %36 by %c372_i32 dim 1 : vector<40x384xf32>, i32 -> vector<40x384xf32>
    %38 = arith.addf %32, %37 : vector<40x384xf32>
    %39 = arith.addf %38, %35 : vector<40x384xf32>
    %c0_3 = arith.constant 0 : index
    %c0_4 = arith.constant 0 : index
    %40 = vector.load %arg3[%c0_3, %c0_4] : memref<40x1xf32, #tpu.memory_space<vmem>>, vector<40x1xf32>
    %41 = vector.broadcast %40 : vector<40x1xf32> to vector<40x384xf32>
    %42 = arith.addf %39, %41 : vector<40x384xf32>
    %43 = arith.mulf %42, %42 : vector<40x384xf32>
    %44 = arith.truncf %43 : vector<40x384xf32> to vector<40x384xbf16>
    %c0_5 = arith.constant 0 : index
    %c0_6 = arith.constant 0 : index
    %45 = vector.load %arg4[%c0_5, %c0_6] : memref<384x128xbf16, #tpu.memory_space<vmem>>, vector<384x128xbf16>
    %cst_7 = arith.constant dense<0.000000e+00> : vector<40x128xf32>
    %46 = tpu.matmul %44, %45, %cst_7 {dimension_numbers = #tpu.dot_dimension_numbers<[1], [0], [0], [1], [0, 0, 1, 1], [], []>} : vector<40x384xbf16>, vector<384x128xbf16>, vector<40x128xf32> -> vector<40x128xf32>
    %cst_8 = arith.constant 9.99999997E-7 : f32
    %47 = vector.broadcast %cst_8 : f32 to vector<40x128xf32>
    %48 = arith.maximumf %46, %47 : vector<40x128xf32>
    %49 = math.log %48 : vector<40x128xf32>
    %c0_9 = arith.constant 0 : index
    %c0_10 = arith.constant 0 : index
    %c0_11 = arith.constant 0 : index
    %50 = vector.load %arg5[%c0_9, %c0_10, %c0_11] : memref<1x40x128xf32, #tpu.memory_space<vmem>>, vector<1x40x128xf32>
    %51 = vector.shape_cast %50 : vector<1x40x128xf32> to vector<40x128xf32>
    %52 = vector.shape_cast %49 : vector<40x128xf32> to vector<1x40x128xf32>
    tpu.vector_store %arg5[%c0_9, %c0_10, %c0_11], %52 {strides = array<i32>} : memref<1x40x128xf32, #tpu.memory_space<vmem>>, vector<1x40x128xf32>,
    return
  }
  func.func @transform_0(%arg0: i32) -> (i32, i32) {
    %c0_i32 = arith.constant 0 : i32
    %c0_i32_0 = arith.constant 0 : i32
    return %c0_i32, %arg0 : i32, i32
  }
  func.func @transform_1(%arg0: i32) -> (i32, i32) {
    %c0_i32 = arith.constant 0 : i32
    %c0_i32_0 = arith.constant 0 : i32
    %c0_i32_1 = arith.constant 0 : i32
    return %c0_i32, %c0_i32_0 : i32, i32
  }
  func.func @transform_2(%arg0: i32) -> (i32, i32) {
    %c0_i32 = arith.constant 0 : i32
    %c0_i32_0 = arith.constant 0 : i32
    %c0_i32_1 = arith.constant 0 : i32
    return %c0_i32, %c0_i32_0 : i32, i32
  }
  func.func @transform_3(%arg0: i32) -> (i32, i32) {
    %c0_i32 = arith.constant 0 : i32
    %c0_i32_0 = arith.constant 0 : i32
    %c0_i32_1 = arith.constant 0 : i32
    return %c0_i32, %c0_i32_0 : i32, i32
  }
  func.func @transform_4(%arg0: i32) -> (i32, i32, i32) {
    %c0_i32 = arith.constant 0 : i32
    %c0_i32_0 = arith.constant 0 : i32
    %c0_i32_1 = arith.constant 0 : i32
    return %arg0, %c0_i32, %c0_i32_0 : i32, i32, i32
  }
}

module attributes {stable_mosaic.version = 11 : i64} {
  func.func @_mlp_kernel(%arg0: i32, %arg1: memref<2x1760xbf16, #tpu.memory_space<vmem>>, %arg2: memref<1760x128xbf16, #tpu.memory_space<vmem>>, %arg3: memref<1x128xf32, #tpu.memory_space<vmem>>, %arg4: memref<128x64xf32, #tpu.memory_space<vmem>>, %arg5: memref<1x64xf32, #tpu.memory_space<vmem>>, %arg6: memref<64x2xf32, #tpu.memory_space<vmem>>, %arg7: memref<1x2xf32, #tpu.memory_space<vmem>>, %arg8: memref<2x2xf32, #tpu.memory_space<vmem>>) attributes {dimension_semantics = [#tpu.dimension_semantics<parallel>], iteration_bounds = array<i64: 1>, scalar_prefetch = 0 : i64, scratch_operands = 0 : i64, tpu.core_type = #tpu.core_type<tc>, window_params = [{transform_indices = @transform_0, window_bounds = array<i64: 2, 1760>}, {pipeline_mode = #tpu.pipeline_mode<synchronous>, transform_indices = @transform_1, window_bounds = array<i64: 1760, 128>}, {pipeline_mode = #tpu.pipeline_mode<synchronous>, transform_indices = @transform_2, window_bounds = array<i64: 1, 128>}, {pipeline_mode = #tpu.pipeline_mode<synchronous>, transform_indices = @transform_3, window_bounds = array<i64: 128, 64>}, {pipeline_mode = #tpu.pipeline_mode<synchronous>, transform_indices = @transform_4, window_bounds = array<i64: 1, 64>}, {pipeline_mode = #tpu.pipeline_mode<synchronous>, transform_indices = @transform_5, window_bounds = array<i64: 64, 2>}, {pipeline_mode = #tpu.pipeline_mode<synchronous>, transform_indices = @transform_6, window_bounds = array<i64: 1, 2>}, {transform_indices = @transform_7, window_bounds = array<i64: 2, 2>}]} {
    %c0 = arith.constant 0 : index
    %c0_0 = arith.constant 0 : index
    %0 = vector.load %arg1[%c0, %c0_0] : memref<2x1760xbf16, #tpu.memory_space<vmem>>, vector<2x1760xbf16>
    %c0_1 = arith.constant 0 : index
    %c0_2 = arith.constant 0 : index
    %1 = vector.load %arg2[%c0_1, %c0_2] : memref<1760x128xbf16, #tpu.memory_space<vmem>>, vector<1760x128xbf16>
    %cst = arith.constant dense<0.000000e+00> : vector<2x128xf32>
    %2 = tpu.matmul %0, %1, %cst {dimension_numbers = #tpu.dot_dimension_numbers<[1], [0], [0], [1], [0, 0, 1, 1], [], []>} : vector<2x1760xbf16>, vector<1760x128xbf16>, vector<2x128xf32> -> vector<2x128xf32>
    %c0_3 = arith.constant 0 : index
    %c0_4 = arith.constant 0 : index
    %3 = vector.load %arg3[%c0_3, %c0_4] : memref<1x128xf32, #tpu.memory_space<vmem>>, vector<1x128xf32>
    %4 = vector.broadcast %3 : vector<1x128xf32> to vector<2x128xf32>
    %5 = arith.addf %2, %4 : vector<2x128xf32>
    %c0_5 = arith.constant 0 : index
    %c0_6 = arith.constant 0 : index
    %6 = vector.load %arg4[%c0_5, %c0_6] : memref<128x64xf32, #tpu.memory_space<vmem>>, vector<128x64xf32>
    %cst_7 = arith.constant dense<0.000000e+00> : vector<2x64xf32>
    %7 = tpu.matmul %5, %6, %cst_7 {dimension_numbers = #tpu.dot_dimension_numbers<[1], [0], [0], [1], [0, 0, 1, 1], [], []>} : vector<2x128xf32>, vector<128x64xf32>, vector<2x64xf32> -> vector<2x64xf32>
    %c0_8 = arith.constant 0 : index
    %c0_9 = arith.constant 0 : index
    %8 = vector.load %arg5[%c0_8, %c0_9] : memref<1x64xf32, #tpu.memory_space<vmem>>, vector<1x64xf32>
    %9 = vector.broadcast %8 : vector<1x64xf32> to vector<2x64xf32>
    %10 = arith.addf %7, %9 : vector<2x64xf32>
    %c0_10 = arith.constant 0 : index
    %c0_11 = arith.constant 0 : index
    %11 = vector.load %arg6[%c0_10, %c0_11] : memref<64x2xf32, #tpu.memory_space<vmem>>, vector<64x2xf32>
    %cst_12 = arith.constant dense<0.000000e+00> : vector<2x2xf32>
    %12 = tpu.matmul %10, %11, %cst_12 {dimension_numbers = #tpu.dot_dimension_numbers<[1], [0], [0], [1], [0, 0, 1, 1], [], []>} : vector<2x64xf32>, vector<64x2xf32>, vector<2x2xf32> -> vector<2x2xf32>
    %c0_13 = arith.constant 0 : index
    %c0_14 = arith.constant 0 : index
    %13 = vector.load %arg7[%c0_13, %c0_14] : memref<1x2xf32, #tpu.memory_space<vmem>>, vector<1x2xf32>
    %14 = vector.broadcast %13 : vector<1x2xf32> to vector<2x2xf32>
    %15 = arith.addf %12, %14 : vector<2x2xf32>
    %c0_15 = arith.constant 0 : index
    %c0_16 = arith.constant 0 : index
    %16 = vector.load %arg8[%c0_15, %c0_16] : memref<2x2xf32, #tpu.memory_space<vmem>>, vector<2x2xf32>
    tpu.vector_store %arg8[%c0_15, %c0_16], %15 {strides = array<i32>} : memref<2x2xf32, #tpu.memory_space<vmem>>, vector<2x2xf32>,
    return
  }
  func.func @transform_0(%arg0: i32) -> (i32, i32) {
    %c0_i32 = arith.constant 0 : i32
    %c0_i32_0 = arith.constant 0 : i32
    return %arg0, %c0_i32 : i32, i32
  }
  func.func @transform_1(%arg0: i32) -> (i32, i32) {
    %c0_i32 = arith.constant 0 : i32
    %c0_i32_0 = arith.constant 0 : i32
    %c0_i32_1 = arith.constant 0 : i32
    return %c0_i32, %c0_i32_0 : i32, i32
  }
  func.func @transform_2(%arg0: i32) -> (i32, i32) {
    %c0_i32 = arith.constant 0 : i32
    %c0_i32_0 = arith.constant 0 : i32
    %c0_i32_1 = arith.constant 0 : i32
    return %c0_i32, %c0_i32_0 : i32, i32
  }
  func.func @transform_3(%arg0: i32) -> (i32, i32) {
    %c0_i32 = arith.constant 0 : i32
    %c0_i32_0 = arith.constant 0 : i32
    %c0_i32_1 = arith.constant 0 : i32
    return %c0_i32, %c0_i32_0 : i32, i32
  }
  func.func @transform_4(%arg0: i32) -> (i32, i32) {
    %c0_i32 = arith.constant 0 : i32
    %c0_i32_0 = arith.constant 0 : i32
    %c0_i32_1 = arith.constant 0 : i32
    return %c0_i32, %c0_i32_0 : i32, i32
  }
  func.func @transform_5(%arg0: i32) -> (i32, i32) {
    %c0_i32 = arith.constant 0 : i32
    %c0_i32_0 = arith.constant 0 : i32
    %c0_i32_1 = arith.constant 0 : i32
    return %c0_i32, %c0_i32_0 : i32, i32
  }
  func.func @transform_6(%arg0: i32) -> (i32, i32) {
    %c0_i32 = arith.constant 0 : i32
    %c0_i32_0 = arith.constant 0 : i32
    %c0_i32_1 = arith.constant 0 : i32
    return %c0_i32, %c0_i32_0 : i32, i32
  }
  func.func @transform_7(%arg0: i32) -> (i32, i32) {
    %c0_i32 = arith.constant 0 : i32
    %c0_i32_0 = arith.constant 0 : i32
    return %arg0, %c0_i32 : i32, i32
  }
}

</mosaic_0001>

<bundles_post_ra>
// kernel: eeg_shallow_convnet_forward.2
= control target key start
LH: loop header
LB: loop body
LE: loop exit
PB: predicated region body
PF: predicated region fallthrough
CT: control target
= control target key end

     0   :  { %s3153_s15 = smov 0   ;;  %s3155_s16 = smov 0   ;;  %s5160_s0 = inlined_call_operand.vmem [shape: bf16[128,768], index: 0, kind: input, shape index: {}]   ;;  %s5161_s1 = inlined_call_operand.vmem [shape: bf16[520,128], index: 1, kind: input, shape index: {}]   ;;  %s5162_s2 = inlined_call_operand.vmem [shape: f32[40,1], index: 2, kind: input, shape index: {}]   ;;  %s5163_s3 = inlined_call_operand.vmem [shape: bf16[384,128], index: 3, kind: input, shape index: {}]   ;;  %s5164_s4 = inlined_call_operand.vmem [shape: f32[2,40,128], index: 4, kind: output, shape index: {}]  }
   0x1   :  { %s3157_s17 = smov 0  }
   0x2 LB: > { %s2561_s18 = sadd.s32 4294967295, %s3111_s17   ;;  %s3170_s19 = sadd.s32 1, %s3111_s17   ;;  %s3111_s17 = sphi %s3157_s17, %s5427_s17   ;;  %s3107_s16 = sphi %s3155_s16, %s5426_s16   ;;  %s3103_s15 = sphi %s3153_s15, %s5425_s15  }
   0x3   : > { %s18_s20 = ssub.s32 %s3111_s17, %s3170_s19  ;;  %s21_s21 = sadd.s32 1, %s3107_s16 }
   0x4   : > { %p19_p0 = scmp.eq.s32.totalorder %s18_s20, 0  ;;  %p28_p1 = scmp.ne.s32.totalorder %s3107_s16, %s3103_s15 }
   0x5   : > { %p29_p2 = scmp.eq.s32.totalorder %s3111_s17, 0  ;;  %p2564_p4 = scmp.ge.s32.totalorder %s3111_s17, 2 }
   0x6   : > { %s3179_s22 = scalar_select %p19_p0, %s3107_s16, %s21_s21  }
   0x7   : > { %p30_p3 = por %p29_p2, %p28_p1  ;;  %152 = sbr.rel (%p2564_p4) target bundleno = 37 (0x25), region = 28 }
   0xe   : > { %155 = sbr.rel (!%p30_p3) target bundleno = 37 (0x25), region = 32  ;;  %s157_s23 = sand.u32 (%p30_p3), 1, %s3107_s16  }
   0xf   : > { %s2683_s24 = smul.u32 (%p30_p3), 12, %s3111_s17 }
  0x10   : > { %s2946_s25 = smul.u32 (%p30_p3), 192, %s157_s23 }
  0x11   : > { %s3187_s28 = scalar_lea.vmem (%p30_p3), %s5160_s0, %s2683_s24 }
  0x12   : > { %v177_v0 = vld [vmem:[%s3187_s28] sm:$0xff] (%p30_p3)  ;;  %v179_v1 = vld [vmem:[%s3187_s28 + $0x18] sm:$0xff] (%p30_p3)  ;;  %v181_v2 = vld [vmem:[%s3187_s28 + $0x30] sm:$0xff] (%p30_p3)  ;;  %s3192_s29 = scalar_lea.vmem (%p30_p3), [#allocation2], %s2946_s25 }
  0x13   : > { %178 = vst [vmem:[%s3192_s29] sm:$0xff] (%p30_p3), %v177_v0  ;;  %180 = vst [vmem:[%s3192_s29 + $0xc] sm:$0xff] (%p30_p3), %v179_v1  ;;  %v183_v3 = vld [vmem:[%s3187_s28 + $0x48] sm:$0xff] (%p30_p3)  ;;  %v185_v4 = vld [vmem:[%s3187_s28 + $0x60] sm:$0xff] (%p30_p3) }
  0x14   : > { %182 = vst [vmem:[%s3192_s29 + $0x18] sm:$0xff] (%p30_p3), %v181_v2  ;;  %v187_v5 = vld [vmem:[%s3187_s28 + $0x78] sm:$0xff] (%p30_p3)  ;;  %184 = vst [vmem:[%s3192_s29 + $0x24] sm:$0xff] (%p30_p3), %v183_v3  ;;  %v189_v6 = vld [vmem:[%s3187_s28 + $0x90] sm:$0xff] (%p30_p3) }
  0x15   : > { %186 = vst [vmem:[%s3192_s29 + $0x30] sm:$0xff] %v185_v4  ;;  %188 = vst [vmem:[%s3192_s29 + $0x3c] sm:$0xff] %v187_v5  ;;  %v191_v7 = vld [vmem:[%s3187_s28 + $0xa8] sm:$0xff]  ;;  %v193_v8 = vld [vmem:[%s3187_s28 + $0xc0] sm:$0xff] }
  0x16   : > { %190 = vst [vmem:[%s3192_s29 + $0x48] sm:$0xff] %v189_v6  ;;  %192 = vst [vmem:[%s3192_s29 + $0x54] sm:$0xff] %v191_v7  ;;  %v195_v9 = vld [vmem:[%s3187_s28 + $0xd8] sm:$0xff]  ;;  %v197_v10 = vld [vmem:[%s3187_s28 + $0xf0] sm:$0xff] }
  0x17   : > { %194 = vst [vmem:[%s3192_s29 + $0x60] sm:$0xff] %v193_v8  ;;  %v199_v11 = vld [vmem:[%s3187_s28 + $0x108] sm:$0xff]  ;;  %196 = vst [vmem:[%s3192_s29 + $0x6c] sm:$0xff] %v195_v9  ;;  %v201_v12 = vld [vmem:[%s3187_s28 + $0x120] sm:$0xff] }
  0x18   : > { %198 = vst [vmem:[%s3192_s29 + $0x78] sm:$0xff] %v197_v10  ;;  %200 = vst [vmem:[%s3192_s29 + $0x84] sm:$0xff] %v199_v11  ;;  %v203_v13 = vld [vmem:[%s3187_s28 + $0x138] sm:$0xff]  ;;  %v205_v14 = vld [vmem:[%s3187_s28 + $0x150] sm:$0xff] }
  0x19   : > { %202 = vst [vmem:[%s3192_s29 + $0x90] sm:$0xff] %v201_v12  ;;  %204 = vst [vmem:[%s3192_s29 + $0x9c] sm:$0xff] %v203_v13  ;;  %v207_v15 = vld [vmem:[%s3187_s28 + $0x168] sm:$0xff]  ;;  %v2568_v17 = vld [vmem:[%s3187_s28 + $0x20] sm:$0xf] }
  0x1a   : > { %206 = vst [vmem:[%s3192_s29 + $0xa8] sm:$0xff] %v205_v14  ;;  %v2566_v16 = vld [vmem:[%s3187_s28 + $0x8] sm:$0xf]  ;;  %208 = vst [vmem:[%s3192_s29 + $0xb4] sm:$0xff] %v207_v15  ;;  %v2570_v18 = vld [vmem:[%s3187_s28 + $0x38] sm:$0xf] }
  0x1b   : > { %2567 = vst [vmem:[%s3192_s29 + $0x8] sm:$0xf] %v2566_v16  ;;  %2569 = vst [vmem:[%s3192_s29 + $0x14] sm:$0xf] %v2568_v17  ;;  %v2572_v19 = vld [vmem:[%s3187_s28 + $0x50] sm:$0xf] }
  0x1c   : > { %v2574_v20 = vld [vmem:[%s3187_s28 + $0x68] sm:$0xf]  ;;  %2571 = vst [vmem:[%s3192_s29 + $0x20] sm:$0xf] %v2570_v18  ;;  %2573 = vst [vmem:[%s3192_s29 + $0x2c] sm:$0xf] %v2572_v19 }
  0x1d   : > { %2575 = vst [vmem:[%s3192_s29 + $0x38] sm:$0xf] %v2574_v20  ;;  %v2576_v21 = vld [vmem:[%s3187_s28 + $0x80] sm:$0xf]  ;;  %v2578_v22 = vld [vmem:[%s3187_s28 + $0x98] sm:$0xf] }
  0x1e   : > { %v2580_v23 = vld [vmem:[%s3187_s28 + $0xb0] sm:$0xf]  ;;  %2577 = vst [vmem:[%s3192_s29 + $0x44] sm:$0xf] %v2576_v21  ;;  %2579 = vst [vmem:[%s3192_s29 + $0x50] sm:$0xf] %v2578_v22 }
  0x1f   : > { %2581 = vst [vmem:[%s3192_s29 + $0x5c] sm:$0xf] %v2580_v23  ;;  %v2582_v24 = vld [vmem:[%s3187_s28 + $0xc8] sm:$0xf]  ;;  %v2584_v25 = vld [vmem:[%s3187_s28 + $0xe0] sm:$0xf] }
  0x20   : > { %v2586_v26 = vld [vmem:[%s3187_s28 + $0xf8] sm:$0xf]  ;;  %2583 = vst [vmem:[%s3192_s29 + $0x68] sm:$0xf] %v2582_v24  ;;  %2585 = vst [vmem:[%s3192_s29 + $0x74] sm:$0xf] %v2584_v25 }
  0x21   : > { %2587 = vst [vmem:[%s3192_s29 + $0x80] sm:$0xf] %v2586_v26  ;;  %v2588_v27 = vld [vmem:[%s3187_s28 + $0x110] sm:$0xf]  ;;  %v2590_v28 = vld [vmem:[%s3187_s28 + $0x128] sm:$0xf] }
  0x22   : > { %v2592_v29 = vld [vmem:[%s3187_s28 + $0x140] sm:$0xf]  ;;  %2589 = vst [vmem:[%s3192_s29 + $0x8c] sm:$0xf] %v2588_v27  ;;  %2591 = vst [vmem:[%s3192_s29 + $0x98] sm:$0xf] %v2590_v28 }
  0x23   : > { %2593 = vst [vmem:[%s3192_s29 + $0xa4] sm:$0xf] %v2592_v29  ;;  %v2594_v30 = vld [vmem:[%s3187_s28 + $0x158] sm:$0xf]  ;;  %v2596_v31 = vld [vmem:[%s3187_s28 + $0x170] sm:$0xf] }
  0x24   : > { %2595 = vst [vmem:[%s3192_s29 + $0xb0] sm:$0xf] %v2594_v30  ;;  %2597 = vst [vmem:[%s3192_s29 + $0xbc] sm:$0xf] %v2596_v31 }
  0x25 PF: > { %p2598_p5 = scmp.ge.s32.totalorder %s3111_s17, 1  ;;  %p252_p6 = scmp.lt.s32.totalorder %s3111_s17, 3 }
  0x27   : > { %p253_p7 = pnand %p2598_p5, %p252_p6 }
  0x29   : > { %256 = sbr.rel (%p253_p7) target bundleno = 1031 (0x407), region = 58 }
  0x30   : > { %s259_s30 = sand.u32 1, %s3103_s15   ;;  %v5165_v32 = vmov 0.0   ;;  %vm3114_vm0 = vmmov 0   ;;  %v3115_v33 = vmov 0   ;;  %v3022_v58 = vld [vmem:[%s5161_s1] sm:$0xff]   ;;  %v3023_v59 = vld [vmem:[%s5161_s1 + $0x8] sm:$0xff]  }
  0x31   : > { %2770 = vmatprep.subr.bf16.mxu1 %v5165_v32  ;;  %s2947_s5 = smul.u32 192, %s259_s30  ;;  %2786 = vmatprep.mubr.msk.bf16.mxu1 %vm3114_vm0, %v5165_v32  ;;  %v3024_v60 = vld [vmem:[%s5161_s1 + $0x10] sm:$0xff]   ;;  %v2103_v61 = vld [vmem:[%s5162_s2] sm:$0xff]  ;;  %v3025_v63 = vld [vmem:[%s5161_s1 + $0x18] sm:$0xff]   ;;  %s3116_s14 = smov 127  }
  0x32   : > { %744 = vmatprep.mubr.bf16.mxu0 %v3115_v33  ;;  %2988 = vset.pattern.permute.xlu1 %v3115_v33  ;;  %v2105_v62 = vld [vmem:[%s5162_s2 + $0x10] sm:$0xff]  ;;  %v2104_v0 = vld [vmem:[%s5162_s2 + $0x8] sm:$0xff]  ;;  %v2107_v1 = vld [vmem:[%s5162_s2 + $0x20] sm:$0xff]  ;;  %s3117_s26 = smov 126   ;;  %s3118_s27 = smov 125  }
  0x33   : > { %2989 = vset.pattern.permute.xlu0 %v3115_v33  ;;  %s3264_s6 = scalar_lea.vmem [#allocation2], %s2947_s5  ;;  %2110 = vperm.xlu1 %2988, %v2103_v61   ;;  %v2106_v2 = vld [vmem:[%s5162_s2 + $0x18] sm:$0xff]  ;;  %v3026_v3 = vld [vmem:[%s5161_s1 + $0x20] sm:$0xff]   ;;  %v3027_v4 = vld [vmem:[%s5161_s1 + $0x28] sm:$0xff]   ;;  %s3119_s8 = smov 124  }
  0x34   : > { %v2990_v34 = vld [vmem:[%s3264_s6 + $0x4] ss:$12 sps:$4 sm:$0xff]   ;;  %v2992_v35 = vld [vmem:[%s3264_s6 + $0x8] ss:$12 sps:$4 sm:$0xff]   ;;  %v2993_v36 = vld [vmem:[%s3264_s6] ss:$12 sps:$4 sm:$0xff]   ;;  %2115 = vperm.xlu0 %2989, %v2104_v0  }
  0x35   : > { %712 = vmatprep.subr.bf16.mxu0 %v2990_v34  ;;  %2771 = vmatpush3.bf16.msra.mxu1 %v2992_v35  ;;  %v2994_v37 = vld [vmem:[%s3264_s6 + $0x1c] ss:$12 sps:$4 sm:$0xff]   ;;  %v2996_v38 = vld [vmem:[%s3264_s6 + $0x20] ss:$12 sps:$4 sm:$0xff]   ;;  %v2997_v39 = vld [vmem:[%s3264_s6 + $0x18] ss:$12 sps:$4 sm:$0xff]  }
  0x36   : > { %713 = vmatpush1.bf16.msra.mxu0 %v2993_v36  ;;  %2772 = vmatprep.subr.bf16.mxu1 %v5165_v32  ;;  %v2998_v40 = vld [vmem:[%s3264_s6 + $0x34] ss:$12 sps:$4 sm:$0xff]   ;;  %v3000_v41 = vld [vmem:[%s3264_s6 + $0x38] ss:$12 sps:$4 sm:$0xff]   ;;  %v3001_v42 = vld [vmem:[%s3264_s6 + $0x30] ss:$12 sps:$4 sm:$0xff]  }
  0x37   : > { %714 = vmatprep.subr.bf16.mxu0 %v2994_v37  ;;  %v3002_v43 = vld [vmem:[%s3264_s6 + $0x4c] ss:$12 sps:$4 sm:$0xff]   ;;  %v3004_v44 = vld [vmem:[%s3264_s6 + $0x50] ss:$12 sps:$4 sm:$0xff]   ;;  %v3005_v45 = vld [vmem:[%s3264_s6 + $0x48] ss:$12 sps:$4 sm:$0xff]   ;;  %2120 = vperm.xlu1 %2988, %v2105_v62  }
  0x38   : > { %v3006_v46 = vld [vmem:[%s3264_s6 + $0x64] ss:$12 sps:$4 sm:$0xff]   ;;  %v3008_v47 = vld [vmem:[%s3264_s6 + $0x68] ss:$12 sps:$4 sm:$0xff]   ;;  %v3009_v48 = vld [vmem:[%s3264_s6 + $0x60] ss:$12 sps:$4 sm:$0xff]   ;;  %2125 = vperm.xlu0 %2989, %v2106_v2  }
  0x39   : > { %2773 = vmatpush3.bf16.msra.mxu1 %v2996_v38  ;;  %v3010_v49 = vld [vmem:[%s3264_s6 + $0x7c] ss:$12 sps:$4 sm:$0xff]   ;;  %v3012_v50 = vld [vmem:[%s3264_s6 + $0x80] ss:$12 sps:$4 sm:$0xff]   ;;  %v3013_v51 = vld [vmem:[%s3264_s6 + $0x78] ss:$12 sps:$4 sm:$0xff]  }
  0x3a   : > { %715 = vmatpush1.bf16.msra.mxu0 %v2997_v39  ;;  %2774 = vmatprep.subr.bf16.mxu1 %v5165_v32  ;;  %v3014_v52 = vld [vmem:[%s3264_s6 + $0x94] ss:$12 sps:$4 sm:$0xff]   ;;  %v3016_v53 = vld [vmem:[%s3264_s6 + $0x98] ss:$12 sps:$4 sm:$0xff]   ;;  %v3017_v54 = vld [vmem:[%s3264_s6 + $0x90] ss:$12 sps:$4 sm:$0xff]  }
  0x3b   : > { %716 = vmatprep.subr.bf16.mxu0 %v2998_v40  ;;  %v3018_v55 = vld [vmem:[%s3264_s6 + $0xac] ss:$12 sps:$4 sm:$0xff]   ;;  %v3020_v56 = vld [vmem:[%s3264_s6 + $0xb0] ss:$12 sps:$4 sm:$0xff]   ;;  %v3021_v57 = vld [vmem:[%s3264_s6 + $0xa8] ss:$12 sps:$4 sm:$0xff]   ;;  %2130 = vperm.xlu1 %2988, %v2107_v1  }
  0x3c   : > { %v3028_v5 = vld [vmem:[%s5161_s1 + $0x30] sm:$0xff]   ;;  %v3029_v6 = vld [vmem:[%s5161_s1 + $0x38] sm:$0xff]   ;;  %v3030_v7 = vld [vmem:[%s5161_s1 + $0x40] sm:$0xff]   ;;  %s3120_s15 = smov 123   ;;  %s3122_s28 = smov 121  }
  0x3d   : > { %2775 = vmatpush3.bf16.msra.mxu1 %v3000_v41  ;;  %v3031_v8 = vld [vmem:[%s5161_s1 + $0x48] sm:$0xff]   ;;  %v3032_v9 = vld [vmem:[%s5161_s1 + $0x50] sm:$0xff]   ;;  %v3033_v10 = vld [vmem:[%s5161_s1 + $0x58] sm:$0xff]   ;;  %s3123_s13 = smov 120   ;;  %s3124_s20 = smov 119  }
  0x3e   : > { %717 = vmatpush1.bf16.msra.mxu0 %v3001_v42  ;;  %2776 = vmatprep.subr.bf16.mxu1 %v5165_v32  ;;  %v3034_v11 = vld [vmem:[%s5161_s1 + $0x60] sm:$0xff]   ;;  %v3035_v12 = vld [vmem:[%s5161_s1 + $0x68] sm:$0xff]   ;;  %v3036_v13 = vld [vmem:[%s5161_s1 + $0x70] sm:$0xff]   ;;  %s3126_s9 = smov 117   ;;  %p285_p8 = scmp.lt.s32.totalorder %s2561_s18, 1 }
  0x3f   : > { %718 = vmatprep.subr.bf16.mxu0 %v3002_v43  ;;  %v3037_v14 = vld [vmem:[%s5161_s1 + $0x78] sm:$0xff]   ;;  %v3038_v15 = vld [vmem:[%s5161_s1 + $0x80] sm:$0xff]   ;;  %v3039_v16 = vld [vmem:[%s5161_s1 + $0x88] sm:$0xff]  }
  0x40   : > { %v3040_v17 = vld [vmem:[%s5161_s1 + $0x90] sm:$0xff]   ;;  %v3041_v18 = vld [vmem:[%s5161_s1 + $0x98] sm:$0xff]   ;;  %v3042_v19 = vld [vmem:[%s5161_s1 + $0xa0] sm:$0xff]   ;;  %s5429_s18 = smov (!%p285_p8, %s2561_s18), 1 }
  0x41   : > { %2777 = vmatpush3.bf16.msra.mxu1 %v3004_v44  ;;  %v3043_v20 = vld [vmem:[%s5161_s1 + $0xa8] sm:$0xff]   ;;  %v3044_v21 = vld [vmem:[%s5161_s1 + $0xb0] sm:$0xff]   ;;  %v3045_v22 = vld [vmem:[%s5161_s1 + $0xb8] sm:$0xff]   ;;  %s2948_s21 = smul.u32 40, %s5429_s18 }
  0x42   : > { %719 = vmatpush1.bf16.msra.mxu0 %v3005_v45  ;;  %2778 = vmatprep.subr.bf16.mxu1 %v5165_v32  ;;  %v3046_v23 = vld [vmem:[%s5161_s1 + $0xc0] sm:$0xff]   ;;  %v3047_v24 = vld [vmem:[%s5161_s1 + $0xc8] sm:$0xff]   ;;  %v3048_v25 = vld [vmem:[%s5161_s1 + $0xd0] sm:$0xff]  }
  0x43   : > { %720 = vmatprep.subr.bf16.mxu0 %v3006_v46  ;;  %v3049_v29 = vld [vmem:[%s5161_s1 + $0xd8] sm:$0xff]   ;;  %v3050_v40 = vld [vmem:[%s5161_s1 + $0xe0] sm:$0xff]   ;;  %s289_s25 = scalar_lea.vmem %s5164_s4, %s2948_s21 }
  0x45   : > { %2779 = vmatpush3.bf16.msra.mxu1 %v3008_v47 }
  0x46   : > { %721 = vmatpush1.bf16.msra.mxu0 %v3009_v48  ;;  %2780 = vmatprep.subr.bf16.mxu1 %v5165_v32 }
  0x47   : > { %722 = vmatprep.subr.bf16.mxu0 %v3010_v49  ;;  %v3051_v49 = vld [vmem:[%s5161_s1 + $0xe8] sm:$0xff]  }
  0x49   : > { %2781 = vmatpush3.bf16.msra.mxu1 %v3012_v50 }
  0x4a   : > { %723 = vmatpush1.bf16.msra.mxu0 %v3013_v51  ;;  %2782 = vmatprep.subr.bf16.mxu1 %v5165_v32 }
  0x4b   : > { %724 = vmatprep.subr.bf16.mxu0 %v3014_v52 }
  0x4d   : > { %2783 = vmatpush3.bf16.msra.mxu1 %v3016_v53 }
  0x4e   : > { %725 = vmatpush1.bf16.msra.mxu0 %v3017_v54  ;;  %2784 = vmatprep.subr.bf16.mxu1 %v5165_v32 }
  0x4f   : > { %726 = vmatprep.subr.bf16.mxu0 %v3018_v55 }
  0x51   : > { %2785 = vmatpush3.bf16.msra.mxu1 %v3020_v56 }
  0x52   : > { %727 = vmatpush1.bf16.msra.mxu0 %v3021_v57  ;;  %2918 = vmatprep.subr.bf16.mxu1 %v5165_v32 }
  0x54   : > { %2787 = vmatmul.mubr.bf16.vlgmr.msra.gmra.mrb[0].mxu1 %v3022_v58 }
  0x55   : > { %745 = vmatmul.mubr.bf16.vlgmr.msra.gmra.mrb[0].mxu0 %v3022_v58  ;;  %2790 = vmatprep.mubr.msk.bf16.mxu1 %vm3114_vm0, %v5165_v32  ;;  %v3052_v58 = vld [vmem:[%s5161_s1 + $0xf0] sm:$0xff]  }
  0x56   : > { %754 = vmatprep.mubr.bf16.mxu0 %v3115_v33 }
  0x5c   : > { %2791 = vmatmul.mubr.bf16.gmra.mrb[4].mxu1 %v3023_v59 }
  0x5d   : > { %755 = vmatmul.mubr.bf16.gmra.mrb[4].mxu0 %v3023_v59  ;;  %2794 = vmatprep.mubr.msk.bf16.mxu1 %vm3114_vm0, %v5165_v32 }
  0x5e   : > { %764 = vmatprep.mubr.bf16.mxu0 %v3115_v33 }
  0x64   : > { %2795 = vmatmul.mubr.bf16.gmra.mrb[8].mxu1 %v3024_v60 }
  0x65   : > { %765 = vmatmul.mubr.bf16.gmra.mrb[8].mxu0 %v3024_v60  ;;  %2798 = vmatprep.mubr.msk.bf16.mxu1 %vm3114_vm0, %v5165_v32 }
  0x66   : > { %774 = vmatprep.mubr.bf16.mxu0 %v3115_v33 }
  0x6c   : > { %2799 = vmatmul.mubr.bf16.gmra.mrb[12].mxu1 %v3025_v63 }
  0x6d   : > { %775 = vmatmul.mubr.bf16.gmra.mrb[12].mxu0 %v3025_v63  ;;  %2802 = vmatprep.mubr.msk.bf16.mxu1 %vm3114_vm0, %v5165_v32 }
  0x6e   : > { %784 = vmatprep.mubr.bf16.mxu0 %v3115_v33 }
  0x74   : > { %2803 = vmatmul.mubr.bf16.gmra.mrb[16].mxu1 %v3026_v3 }
  0x75   : > { %785 = vmatmul.mubr.bf16.gmra.mrb[16].mxu0 %v3026_v3  ;;  %2806 = vmatprep.mubr.msk.bf16.mxu1 %vm3114_vm0, %v5165_v32  ;;  %v3053_v3 = vld [vmem:[%s5161_s1 + $0xf8] sm:$0xff]  }
  0x76   : > { %794 = vmatprep.mubr.bf16.mxu0 %v3115_v33 }
  0x7c   : > { %2807 = vmatmul.mubr.bf16.gmra.mrb[20].mxu1 %v3027_v4 }
  0x7d   : > { %795 = vmatmul.mubr.bf16.gmra.mrb[20].mxu0 %v3027_v4  ;;  %2810 = vmatprep.mubr.msk.bf16.mxu1 %vm3114_vm0, %v5165_v32 }
  0x7e   : > { %804 = vmatprep.mubr.bf16.mxu0 %v3115_v33 }
  0x84   : > { %2811 = vmatmul.mubr.bf16.gmra.mrb[24].mxu1 %v3028_v5 }
  0x85   : > { %805 = vmatmul.mubr.bf16.gmra.mrb[24].mxu0 %v3028_v5  ;;  %2814 = vmatprep.mubr.msk.bf16.mxu1 %vm3114_vm0, %v5165_v32 }
  0x86   : > { %814 = vmatprep.mubr.bf16.mxu0 %v3115_v33 }
  0x8c   : > { %2815 = vmatmul.mubr.bf16.gmra.mrb[28].mxu1 %v3029_v6 }
  0x8d   : > { %815 = vmatmul.mubr.bf16.gmra.mrb[28].mxu0 %v3029_v6  ;;  %2818 = vmatprep.mubr.msk.bf16.mxu1 %vm3114_vm0, %v5165_v32 }
  0x8e   : > { %824 = vmatprep.mubr.bf16.mxu0 %v3115_v33 }
  0x94   : > { %2819 = vmatmul.mubr.bf16.gmra.mrb[32].mxu1 %v3030_v7 }
  0x95   : > { %825 = vmatmul.mubr.bf16.gmra.mrb[32].mxu0 %v3030_v7  ;;  %2822 = vmatprep.mubr.msk.bf16.mxu1 %vm3114_vm0, %v5165_v32 }
  0x96   : > { %834 = vmatprep.mubr.bf16.mxu0 %v3115_v33 }
  0x9c   : > { %2823 = vmatmul.mubr.bf16.gmra.mrb[36].mxu1 %v3031_v8 }
  0x9d   : > { %835 = vmatmul.mubr.bf16.gmra.mrb[36].mxu0 %v3031_v8  ;;  %2826 = vmatprep.mubr.msk.bf16.mxu1 %vm3114_vm0, %v5165_v32 }
  0x9e   : > { %844 = vmatprep.mubr.bf16.mxu0 %v3115_v33 }
  0xa4   : > { %2827 = vmatmul.mubr.bf16.gmra.mrb[40].mxu1 %v3032_v9 }
  0xa5   : > { %845 = vmatmul.mubr.bf16.gmra.mrb[40].mxu0 %v3032_v9  ;;  %2830 = vmatprep.mubr.msk.bf16.mxu1 %vm3114_vm0, %v5165_v32 }
  0xa6   : > { %854 = vmatprep.mubr.bf16.mxu0 %v3115_v33 }
  0xac   : > { %2831 = vmatmul.mubr.bf16.gmra.mrb[44].mxu1 %v3033_v10 }
  0xad   : > { %855 = vmatmul.mubr.bf16.gmra.mrb[44].mxu0 %v3033_v10  ;;  %2834 = vmatprep.mubr.msk.bf16.mxu1 %vm3114_vm0, %v5165_v32 }
  0xae   : > { %864 = vmatprep.mubr.bf16.mxu0 %v3115_v33 }
  0xb4   : > { %2835 = vmatmul.mubr.bf16.gmra.mrb[48].mxu1 %v3034_v11 }
  0xb5   : > { %865 = vmatmul.mubr.bf16.gmra.mrb[48].mxu0 %v3034_v11  ;;  %2838 = vmatprep.mubr.msk.bf16.mxu1 %vm3114_vm0, %v5165_v32 }
  0xb6   : > { %874 = vmatprep.mubr.bf16.mxu0 %v3115_v33 }
  0xbc   : > { %2839 = vmatmul.mubr.bf16.gmra.mrb[52].mxu1 %v3035_v12 }
  0xbd   : > { %875 = vmatmul.mubr.bf16.gmra.mrb[52].mxu0 %v3035_v12  ;;  %2842 = vmatprep.mubr.msk.bf16.mxu1 %vm3114_vm0, %v5165_v32  ;;  %v3054_v12 = vld [vmem:[%s5161_s1 + $0x100] ss:$0 sps:$4 sm:$0xff]  }
  0xbe   : > { %884 = vmatprep.mubr.bf16.mxu0 %v3115_v33 }
  0xc4   : > { %2843 = vmatmul.mubr.bf16.gmra.mrb[56].mxu1 %v3036_v13 }
  0xc5   : > { %885 = vmatmul.mubr.bf16.gmra.mrb[56].mxu0 %v3036_v13  ;;  %2846 = vmatprep.mubr.msk.bf16.mxu1 %vm3114_vm0, %v5165_v32 }
  0xc6   : > { %894 = vmatprep.mubr.bf16.mxu0 %v3115_v33 }
  0xcc   : > { %2847 = vmatmul.mubr.bf16.gmra.mrb[60].mxu1 %v3037_v14 }
  0xcd   : > { %895 = vmatmul.mubr.bf16.gmra.mrb[60].mxu0 %v3037_v14  ;;  %2850 = vmatprep.mubr.msk.bf16.mxu1 %vm3114_vm0, %v5165_v32 }
  0xce   : > { %904 = vmatprep.mubr.bf16.mxu0 %v3115_v33 }
  0xd4   : > { %2851 = vmatmul.mubr.bf16.gmra.mrb[64].mxu1 %v3038_v15 }
  0xd5   : > { %905 = vmatmul.mubr.bf16.gmra.mrb[64].mxu0 %v3038_v15  ;;  %2854 = vmatprep.mubr.msk.bf16.mxu1 %vm3114_vm0, %v5165_v32 }
  0xd6   : > { %914 = vmatprep.mubr.bf16.mxu0 %v3115_v33 }
  0xdc   : > { %2855 = vmatmul.mubr.bf16.gmra.mrb[68].mxu1 %v3039_v16 }
  0xdd   : > { %915 = vmatmul.mubr.bf16.gmra.mrb[68].mxu0 %v3039_v16  ;;  %2858 = vmatprep.mubr.msk.bf16.mxu1 %vm3114_vm0, %v5165_v32 }
  0xde   : > { %924 = vmatprep.mubr.bf16.mxu0 %v3115_v33 }
  0xe4   : > { %2859 = vmatmul.mubr.bf16.gmra.mrb[72].mxu1 %v3040_v17 }
  0xe5   : > { %925 = vmatmul.mubr.bf16.gmra.mrb[72].mxu0 %v3040_v17  ;;  %2862 = vmatprep.mubr.msk.bf16.mxu1 %vm3114_vm0, %v5165_v32 }
  0xe6   : > { %934 = vmatprep.mubr.bf16.mxu0 %v3115_v33 }
  0xec   : > { %2863 = vmatmul.mubr.bf16.gmra.mrb[76].mxu1 %v3041_v18 }
  0xed   : > { %935 = vmatmul.mubr.bf16.gmra.mrb[76].mxu0 %v3041_v18  ;;  %2866 = vmatprep.mubr.msk.bf16.mxu1 %vm3114_vm0, %v5165_v32 }
  0xee   : > { %944 = vmatprep.mubr.bf16.mxu0 %v3115_v33 }
  0xf4   : > { %2867 = vmatmul.mubr.bf16.gmra.mrb[80].mxu1 %v3042_v19 }
  0xf5   : > { %945 = vmatmul.mubr.bf16.gmra.mrb[80].mxu0 %v3042_v19  ;;  %2870 = vmatprep.mubr.msk.bf16.mxu1 %vm3114_vm0, %v5165_v32 }
  0xf6   : > { %954 = vmatprep.mubr.bf16.mxu0 %v3115_v33 }
  0xfc   : > { %2871 = vmatmul.mubr.bf16.gmra.mrb[84].mxu1 %v3043_v20 }
  0xfd   : > { %955 = vmatmul.mubr.bf16.gmra.mrb[84].mxu0 %v3043_v20  ;;  %2874 = vmatprep.mubr.msk.bf16.mxu1 %vm3114_vm0, %v5165_v32 }
  0xfe   : > { %964 = vmatprep.mubr.bf16.mxu0 %v3115_v33 }
 0x104   : > { %2875 = vmatmul.mubr.bf16.gmra.mrb[88].mxu1 %v3044_v21 }
 0x105   : > { %965 = vmatmul.mubr.bf16.gmra.mrb[88].mxu0 %v3044_v21  ;;  %2878 = vmatprep.mubr.msk.bf16.mxu1 %vm3114_vm0, %v5165_v32 }
 0x106   : > { %974 = vmatprep.mubr.bf16.mxu0 %v3115_v33 }
 0x10c   : > { %2879 = vmatmul.mubr.bf16.gmra.mrb[92].mxu1 %v3045_v22 }
 0x10d   : > { %975 = vmatmul.mubr.bf16.gmra.mrb[92].mxu0 %v3045_v22  ;;  %2882 = vmatprep.mubr.msk.bf16.mxu1 %vm3114_vm0, %v5165_v32 }
 0x10e   : > { %984 = vmatprep.mubr.bf16.mxu0 %v3115_v33 }
 0x114   : > { %2883 = vmatmul.mubr.bf16.gmra.mrb[96].mxu1 %v3046_v23 }
 0x115   : > { %985 = vmatmul.mubr.bf16.gmra.mrb[96].mxu0 %v3046_v23  ;;  %2886 = vmatprep.mubr.msk.bf16.mxu1 %vm3114_vm0, %v5165_v32 }
 0x116   : > { %994 = vmatprep.mubr.bf16.mxu0 %v3115_v33 }
 0x11c   : > { %2887 = vmatmul.mubr.bf16.gmra.mrb[100].mxu1 %v3047_v24 }
 0x11d   : > { %995 = vmatmul.mubr.bf16.gmra.mrb[100].mxu0 %v3047_v24  ;;  %2890 = vmatprep.mubr.msk.bf16.mxu1 %vm3114_vm0, %v5165_v32 }
 0x11e   : > { %1004 = vmatprep.mubr.bf16.mxu0 %v3115_v33 }
 0x124   : > { %2891 = vmatmul.mubr.bf16.gmra.mrb[104].mxu1 %v3048_v25 }
 0x125   : > { %1005 = vmatmul.mubr.bf16.gmra.mrb[104].mxu0 %v3048_v25  ;;  %2894 = vmatprep.mubr.msk.bf16.mxu1 %vm3114_vm0, %v5165_v32 }
 0x126   : > { %1014 = vmatprep.mubr.bf16.mxu0 %v3115_v33 }
 0x127   : > { %v3475_v26 = vpop.f32.mrb[0].mxu1 }
 0x128   : > { %5223 = vst [vmem:[#allocation3_spill] sm:$0xff] %v3475_v26  ;;  %v3477_v27 = vpop.f32.mrb[0].mxu0  ;;  %v2788_v28 = vpop.f32.mrb[1].mxu1 }
 0x129   : > { %5224 = vst [vmem:[#allocation4_spill] sm:$0xff] %v3477_v27  ;;  %v3482_v30 = vpop.f32.mrb[1].mxu0  ;;  %v3484_v31 = vpop.f32.mrb[2].mxu1 }
 0x12a   : > { %5225 = vst [vmem:[#allocation5_spill] sm:$0xff] %v3482_v30  ;;  %5226 = vst [vmem:[#allocation6_spill] sm:$0xff] %v3484_v31  ;;  %v3486_v34 = vpop.f32.mrb[2].mxu0  ;;  %v2789_v35 = vpop.f32.mrb[3].mxu1 }
 0x12b   : > { %5227 = vst [vmem:[#allocation7_spill] sm:$0xff] %v3486_v34  ;;  %v3488_v36 = vpop.f32.mrb[3].mxu0 }
 0x12c   : > { %5228 = vst [vmem:[#allocation8_spill] sm:$0xff] %v3488_v36  ;;  %2895 = vmatmul.mubr.bf16.gmra.mrb[108].mxu1 %v3049_v29 }
 0x12d   : > { %1015 = vmatmul.mubr.bf16.gmra.mrb[108].mxu0 %v3049_v29  ;;  %2898 = vmatprep.mubr.msk.bf16.mxu1 %vm3114_vm0, %v5165_v32 }
 0x12e   : > { %1024 = vmatprep.mubr.bf16.mxu0 %v3115_v33 }
 0x12f   : > { %v3493_v37 = vpop.f32.mrb[4].mxu1 }
 0x130   : > { %v3495_v38 = vpop.f32.mrb[4].mxu0  ;;  %v2792_v39 = vpop.f32.mrb[5].mxu1 }
 0x131   : > { %5229 = vst [vmem:[#allocation9_spill] sm:$0xff] %v3495_v38  ;;  %v3500_v41 = vpop.f32.mrb[5].mxu0  ;;  %v3502_v42 = vpop.f32.mrb[6].mxu1 }
 0x132   : > { %5230 = vst [vmem:[#allocation10_spill] sm:$0xff] %v3500_v41  ;;  %v3504_v43 = vpop.f32.mrb[6].mxu0  ;;  %v2793_v44 = vpop.f32.mrb[7].mxu1 }
 0x133   : > { %5231 = vst [vmem:[#allocation11_spill] sm:$0xff] %v3504_v43  ;;  %v3506_v45 = vpop.f32.mrb[7].mxu0 }
 0x134   : > { %5232 = vst [vmem:[#allocation12_spill] sm:$0xff] %v3506_v45  ;;  %2899 = vmatmul.mubr.bf16.gmra.mrb[112].mxu1 %v3050_v40 }
 0x135   : > { %1025 = vmatmul.mubr.bf16.gmra.mrb[112].mxu0 %v3050_v40  ;;  %2902 = vmatprep.mubr.msk.bf16.mxu1 %vm3114_vm0, %v5165_v32 }
 0x136   : > { %1034 = vmatprep.mubr.bf16.mxu0 %v3115_v33 }
 0x137   : > { %v3511_v46 = vpop.f32.mrb[8].mxu1 }
 0x138   : > { %5233 = vst [vmem:[#allocation13_spill] sm:$0xff] %v3511_v46  ;;  %v3513_v47 = vpop.f32.mrb[8].mxu0  ;;  %v2796_v48 = vpop.f32.mrb[9].mxu1 }
 0x139   : > { %5234 = vst [vmem:[#allocation14_spill] sm:$0xff] %v3513_v47  ;;  %v3518_v50 = vpop.f32.mrb[9].mxu0  ;;  %v1126_v51 = vpop.f32.mrb[10].mxu1 }
 0x13a   : > { %5235 = vst [vmem:[#allocation15_spill] sm:$0xff] %v3518_v50  ;;  %1389 = vrot.lane.b32.xlu0 %v1126_v51, %s3116_s14  ;;  %v770_v52 = vpop.f32.mrb[10].mxu0  ;;  %v2797_v53 = vpop.f32.mrb[11].mxu1 }
 0x13b   : > { %v772_v54 = vpop.f32.mrb[11].mxu0 }
 0x13c   : > { %1379 = vrot.lane.b32.xlu1 %v772_v54, %s3116_s14  ;;  %2903 = vmatmul.mubr.bf16.gmra.mrb[116].mxu1 %v3051_v49 }
 0x13d   : > { %1035 = vmatmul.mubr.bf16.gmra.mrb[116].mxu0 %v3051_v49  ;;  %2906 = vmatprep.mubr.msk.bf16.mxu1 %vm3114_vm0, %v5165_v32 }
 0x13e   : > { %1369 = vrot.lane.b32.xlu0 %v770_v52, %s3116_s14  ;;  %1044 = vmatprep.mubr.bf16.mxu0 %v3115_v33 }
 0x13f   : > { %v1131_v55 = vpop.f32.mrb[12].mxu1 }
 0x140   : > { %v2800_v56 = vpop.f32.mrb[13].mxu1  ;;  %1391 = vrot.lane.b32.xlu1 %v1131_v55, %s3116_s14  ;;  %v776_v57 = vpop.f32.mrb[12].mxu0 }
 0x141   : > { %v778_v59 = vpop.f32.mrb[13].mxu0  ;;  %v1134_v60 = vpop.f32.mrb[14].mxu1 }
 0x142   : > { %v2801_v61 = vpop.f32.mrb[15].mxu1  ;;  %1371 = vrot.lane.b32.xlu0 %v776_v57, %s3116_s14  ;;  %v780_v62 = vpop.f32.mrb[14].mxu0 }
 0x143   : > { %v782_v63 = vpop.f32.mrb[15].mxu0 }
 0x144   : > { %1373 = vrot.lane.b32.xlu1 %v780_v62, %s3116_s14  ;;  %2907 = vmatmul.mubr.bf16.gmra.mrb[120].mxu1 %v3052_v58 }
 0x145   : > { %1045 = vmatmul.mubr.bf16.gmra.mrb[120].mxu0 %v3052_v58  ;;  %2910 = vmatprep.mubr.msk.bf16.mxu1 %vm3114_vm0, %v5165_v32 }
 0x146   : > { %1381 = vrot.lane.b32.xlu0 %v778_v59, %s3116_s14  ;;  %1054 = vmatprep.mubr.bf16.mxu0 %v3115_v33 }
 0x147   : > { %v1139_v0 = vpop.f32.mrb[16].mxu1 }
 0x148   : > { %1383 = vrot.lane.b32.xlu1 %v782_v63, %s3116_s14  ;;  %v2804_v1 = vpop.f32.mrb[17].mxu1  ;;  %v786_v2 = vpop.f32.mrb[16].mxu0 }
 0x149   : > { %v1142_v4 = vpop.f32.mrb[18].mxu1  ;;  %v788_v5 = vpop.f32.mrb[17].mxu0 }
 0x14a   : > { %1393 = vrot.lane.b32.xlu0 %v1134_v60, %s3116_s14  ;;  %v2805_v6 = vpop.f32.mrb[19].mxu1  ;;  %v790_v7 = vpop.f32.mrb[18].mxu0 }
 0x14b   : > { %v792_v8 = vpop.f32.mrb[19].mxu0 }
 0x14c   : > { %1395 = vrot.lane.b32.xlu1 %v1139_v0, %s3116_s14  ;;  %2911 = vmatmul.mubr.bf16.gmra.mrb[124].mxu1 %v3053_v3 }
 0x14d   : > { %1055 = vmatmul.mubr.bf16.gmra.mrb[124].mxu0 %v3053_v3  ;;  %2914 = vmatprep.mubr.msk.bf16.mxu1 %vm3114_vm0, %v5165_v32 }
 0x14e   : > { %1385 = vrot.lane.b32.xlu0 %v788_v5, %s3116_s14  ;;  %1064 = vmatprep.mubr.bf16.mxu0 %v3115_v33 }
 0x14f   : > { %v1147_v9 = vpop.f32.mrb[20].mxu1 }
 0x150   : > { %1375 = vrot.lane.b32.xlu1 %v786_v2, %s3116_s14  ;;  %v2808_v10 = vpop.f32.mrb[21].mxu1  ;;  %v796_v11 = vpop.f32.mrb[20].mxu0 }
 0x151   : > { %v1150_v13 = vpop.f32.mrb[22].mxu1  ;;  %v798_v14 = vpop.f32.mrb[21].mxu0 }
 0x152   : > { %1397 = vrot.lane.b32.xlu0 %v1142_v4, %s3116_s14  ;;  %v2809_v15 = vpop.f32.mrb[23].mxu1  ;;  %v800_v16 = vpop.f32.mrb[22].mxu0 }
 0x153   : > { %v802_v17 = vpop.f32.mrb[23].mxu0 }
 0x154   : > { %1387 = vrot.lane.b32.xlu1 %v792_v8, %s3116_s14  ;;  %2915 = vmatmul.mubr.bf16.gmra.mrb[128].mxu1 %v3054_v12 }
 0x155   : > { %1065 = vmatmul.mubr.bf16.gmra.mrb[128].mxu0 %v3054_v12  ;;  %2934 = vmatprep.mubr.msk.bf16.mxu1 %vm3114_vm0, %v5165_v32 }
 0x156   : > { %1377 = vrot.lane.b32.xlu0 %v790_v7, %s3116_s14 }
 0x157   : > { %v1155_v33 = vpop.f32.mrb[24].mxu1 }
 0x158   : > { %1437 = vrot.lane.b32.xlu1 %v1147_v9, %s3117_s26  ;;  %v2812_v18 = vpop.f32.mrb[25].mxu1  ;;  %v806_v19 = vpop.f32.mrb[24].mxu0 }
 0x159   : > { %v1158_v20 = vpop.f32.mrb[26].mxu1  ;;  %v808_v21 = vpop.f32.mrb[25].mxu0  ;;  %v3056_v18 = vld [vmem:[%s5163_s3] sm:$0xff]  }
 0x15a   : > { %1427 = vrot.lane.b32.xlu0 %v798_v14, %s3117_s26  ;;  %v2813_v22 = vpop.f32.mrb[27].mxu1  ;;  %v810_v23 = vpop.f32.mrb[26].mxu0 }
 0x15b   : > { %v812_v24 = vpop.f32.mrb[27].mxu0  ;;  %v3057_v22 = vld [vmem:[%s5163_s3 + $0x80] sm:$0xff]  }
 0x15c   : > { %1417 = vrot.lane.b32.xlu1 %v796_v11, %s3117_s26  ;;  %2919 = vmatpush3.bf16.msra.mxu1 %v3057_v22 }
 0x15d   : > { %2920 = vmatprep.subr.bf16.mxu1 %v5165_v32 }
 0x15e   : > { %1439 = vrot.lane.b32.xlu0 %v1150_v13, %s3117_s26 }
 0x15f   : > { %v1163_v25 = vpop.f32.mrb[28].mxu1 }
 0x160   : > { %1429 = vrot.lane.b32.xlu1 %v802_v17, %s3117_s26  ;;  %v816_v28 = vpop.f32.mrb[28].mxu0  ;;  %v2816_v29 = vpop.f32.mrb[29].mxu1 }
 0x161   : > { %v818_v35 = vpop.f32.mrb[29].mxu0  ;;  %v1166_v39 = vpop.f32.mrb[30].mxu1 }
 0x162   : > { %1419 = vrot.lane.b32.xlu0 %v800_v16, %s3117_s26  ;;  %v820_v40 = vpop.f32.mrb[30].mxu0  ;;  %v2817_v44 = vpop.f32.mrb[31].mxu1 }
 0x163   : > { %v822_v48 = vpop.f32.mrb[31].mxu0 }
 0x164   : > { %1441 = vrot.lane.b32.xlu1 %v1155_v33, %s3117_s26  ;;  %v3055_v33 = vld [vmem:[%s5163_s3 + $0x40] sm:$0xff]  }
 0x165   : > { %2725 = vmatprep.subr.bf16.mxu0 %v3055_v33 }
 0x166   : > { %1431 = vrot.lane.b32.xlu0 %v808_v21, %s3117_s26  ;;  %2726 = vmatpush3.bf16.msra.mxu0 %v3056_v18 }
 0x167   : > { %v1171_v49 = vpop.f32.mrb[32].mxu1 }
 0x168   : > { %1421 = vrot.lane.b32.xlu1 %v806_v19, %s3117_s26  ;;  %v2820_v51 = vpop.f32.mrb[33].mxu1  ;;  %v826_v52 = vpop.f32.mrb[32].mxu0 }
 0x169   : > { %v1174_v53 = vpop.f32.mrb[34].mxu1  ;;  %v828_v54 = vpop.f32.mrb[33].mxu0 }
 0x16a   : > { %1443 = vrot.lane.b32.xlu0 %v1158_v20, %s3117_s26  ;;  %v2821_v55 = vpop.f32.mrb[35].mxu1  ;;  %v830_v56 = vpop.f32.mrb[34].mxu0 }
 0x16b   : > { %v832_v57 = vpop.f32.mrb[35].mxu0 }
 0x16c   : > { %1433 = vrot.lane.b32.xlu1 %v812_v24, %s3117_s26 }
 0x16e   : > { %1423 = vrot.lane.b32.xlu0 %v810_v23, %s3117_s26 }
 0x16f   : > { %v1179_v58 = vpop.f32.mrb[36].mxu1 }
 0x170   : > { %1425 = vrot.lane.b32.xlu1 %v816_v28, %s3117_s26  ;;  %v2824_v59 = vpop.f32.mrb[37].mxu1  ;;  %v836_v60 = vpop.f32.mrb[36].mxu0 }
 0x171   : > { %v1182_v61 = vpop.f32.mrb[38].mxu1  ;;  %v838_v62 = vpop.f32.mrb[37].mxu0 }
 0x172   : > { %1445 = vrot.lane.b32.xlu0 %v1163_v25, %s3117_s26  ;;  %v2825_v63 = vpop.f32.mrb[39].mxu1  ;;  %v840_v0 = vpop.f32.mrb[38].mxu0 }
 0x173   : > { %v842_v1 = vpop.f32.mrb[39].mxu0  ;;  %v3649_v63 = vpop.permute.xlu0 %2115 }
 0x174   : > { %1498 = vrot.lane.b32.xlu1 %v1166_v39, %s3118_s27  ;;  %5238 = vst [vmem:[#allocation18_spill] sm:$0xff] %v3649_v63 }
 0x176   : > { %1435 = vrot.lane.b32.xlu0 %v818_v35, %s3117_s26 }
 0x177   : > { %v1187_v2 = vpop.f32.mrb[40].mxu1 }
 0x178   : > { %1478 = vrot.lane.b32.xlu1 %v820_v40, %s3118_s27  ;;  %v2828_v3 = vpop.f32.mrb[41].mxu1  ;;  %v846_v4 = vpop.f32.mrb[40].mxu0 }
 0x179   : > { %v1190_v5 = vpop.f32.mrb[42].mxu1  ;;  %v848_v6 = vpop.f32.mrb[41].mxu0 }
 0x17a   : > { %1500 = vrot.lane.b32.xlu0 %v1171_v49, %s3118_s27  ;;  %v2829_v7 = vpop.f32.mrb[43].mxu1  ;;  %v850_v8 = vpop.f32.mrb[42].mxu0 }
 0x17b   : > { %v852_v9 = vpop.f32.mrb[43].mxu0 }
 0x17c   : > { %1488 = vrot.lane.b32.xlu1 %v822_v48, %s3118_s27 }
 0x17e   : > { %1480 = vrot.lane.b32.xlu0 %v826_v52, %s3118_s27 }
 0x17f   : > { %v3575_v10 = vpop.f32.mrb[44].mxu1 }
 0x180   : > { %1504 = vrot.lane.b32.xlu1 %v1179_v58, %s3118_s27  ;;  %v2832_v11 = vpop.f32.mrb[45].mxu1  ;;  %v3578_v12 = vpop.f32.mrb[44].mxu0 }
 0x181   : > { %v1198_v13 = vpop.f32.mrb[46].mxu1  ;;  %v3580_v14 = vpop.f32.mrb[45].mxu0 }
 0x182   : > { %1490 = vrot.lane.b32.xlu0 %v828_v54, %s3118_s27  ;;  %v2833_v15 = vpop.f32.mrb[47].mxu1  ;;  %v860_v16 = vpop.f32.mrb[46].mxu0 }
 0x183   : > { %v3583_v17 = vpop.f32.mrb[47].mxu0  ;;  %v3674_v11 = vpop.permute.xlu0 %2125 }
 0x184   : > { %1484 = vrot.lane.b32.xlu1 %v836_v60, %s3118_s27  ;;  %5240 = vst [vmem:[#allocation20_spill] sm:$0xff] %v3674_v11 }
 0x186   : > { %1502 = vrot.lane.b32.xlu0 %v1174_v53, %s3118_s27  ;;  %v3629_v53 = vpop.permute.xlu1 %2110 }
 0x187   : > { %v3593_v19 = vpop.f32.mrb[48].mxu1  ;;  %5236 = vst [vmem:[#allocation16_spill] sm:$0xff] %v3629_v53 }
 0x188   : > { %1494 = vrot.lane.b32.xlu1 %v838_v62, %s3118_s27  ;;  %v2836_v20 = vpop.f32.mrb[49].mxu1  ;;  %v3596_v21 = vpop.f32.mrb[48].mxu0 }
 0x189   : > { %v3601_v23 = vpop.f32.mrb[50].mxu1  ;;  %v3603_v24 = vpop.f32.mrb[49].mxu0 }
 0x18a   : > { %1482 = vrot.lane.b32.xlu0 %v830_v56, %s3118_s27  ;;  %v2837_v25 = vpop.f32.mrb[51].mxu1  ;;  %v3606_v28 = vpop.f32.mrb[50].mxu0 }
 0x18b   : > { %v3608_v29 = vpop.f32.mrb[51].mxu0  ;;  %v3646_v62 = vpop.permute.xlu1 %2120 }
 0x18c   : > { %1486 = vrot.lane.b32.xlu1 %v840_v0, %s3118_s27  ;;  %5237 = vst [vmem:[#allocation17_spill] sm:$0xff] %v3646_v62 }
 0x18e   : > { %1492 = vrot.lane.b32.xlu0 %v832_v57, %s3118_s27 }
 0x18f   : > { %v3613_v35 = vpop.f32.mrb[52].mxu1 }
 0x190   : > { %1496 = vrot.lane.b32.xlu1 %v842_v1, %s3118_s27  ;;  %v2840_v39 = vpop.f32.mrb[53].mxu1  ;;  %v3616_v40 = vpop.f32.mrb[52].mxu0 }
 0x191   : > { %v3618_v44 = vpop.f32.mrb[54].mxu1  ;;  %v3620_v48 = vpop.f32.mrb[53].mxu0 }
 0x192   : > { %1506 = vrot.lane.b32.xlu0 %v1182_v61, %s3118_s27  ;;  %v2841_v49 = vpop.f32.mrb[55].mxu1  ;;  %v3623_v51 = vpop.f32.mrb[54].mxu0  ;;  %s3121_s27 = smov 122  }
 0x193   : > { %v3625_v52 = vpop.f32.mrb[55].mxu0 }
 0x194   : > { %1559 = vrot.lane.b32.xlu1 %v1187_v2, %s3119_s8 }
 0x196   : > { %1561 = vrot.lane.b32.xlu0 %v1190_v5, %s3119_s8 }
 0x197   : > { %v3631_v54 = vpop.f32.mrb[56].mxu1 }
 0x198   : > { %1539 = vrot.lane.b32.xlu1 %v846_v4, %s3119_s8  ;;  %v2844_v55 = vpop.f32.mrb[57].mxu1  ;;  %v3634_v56 = vpop.f32.mrb[56].mxu0 }
 0x199   : > { %v3636_v57 = vpop.f32.mrb[58].mxu1  ;;  %v3638_v58 = vpop.f32.mrb[57].mxu0 }
 0x19a   : > { %1541 = vrot.lane.b32.xlu0 %v850_v8, %s3119_s8  ;;  %v2845_v59 = vpop.f32.mrb[59].mxu1  ;;  %v3641_v60 = vpop.f32.mrb[58].mxu0 }
 0x19b   : > { %v3643_v61 = vpop.f32.mrb[59].mxu0  ;;  %v3667_v8 = vpop.permute.xlu1 %2130 }
 0x19c   : > { %1549 = vrot.lane.b32.xlu1 %v848_v6, %s3119_s8  ;;  %5239 = vst [vmem:[#allocation19_spill] sm:$0xff] %v3667_v8 }
 0x19e   : > { %1551 = vrot.lane.b32.xlu0 %v852_v9, %s3119_s8  ;;  %v3058_v9 = vld [vmem:[%s5163_s3 + $0x48] sm:$0xff]  }
 0x19f   : > { %v3651_v0 = vpop.f32.mrb[60].mxu1  ;;  %2727 = vmatprep.subr.bf16.mxu0 %v3058_v9 }
 0x1a0   : > { %1565 = vrot.lane.b32.xlu1 %v1198_v13, %s3119_s8  ;;  %v2848_v1 = vpop.f32.mrb[61].mxu1  ;;  %v3654_v2 = vpop.f32.mrb[60].mxu0 }
 0x1a1   : > { %v3656_v3 = vpop.f32.mrb[62].mxu1  ;;  %v3658_v4 = vpop.f32.mrb[61].mxu0 }
 0x1a2   : > { %1563 = vrot.lane.b32.xlu0 %v3575_v10, %s3119_s8  ;;  %v2849_v5 = vpop.f32.mrb[63].mxu1  ;;  %v3662_v6 = vpop.f32.mrb[62].mxu0 }
 0x1a3   : > { %v3664_v7 = vpop.f32.mrb[63].mxu0 }
 0x1a4   : > { %1545 = vrot.lane.b32.xlu1 %v860_v16, %s3119_s8  ;;  %v3059_v16 = vld [vmem:[%s5163_s3 + $0x8] sm:$0xff]  }
 0x1a5   : > { %2728 = vmatpush3.bf16.msra.mxu0 %v3059_v16 }
 0x1a6   : > { %1543 = vrot.lane.b32.xlu0 %v3578_v12, %s3119_s8  ;;  %v3060_v12 = vld [vmem:[%s5163_s3 + $0x88] sm:$0xff]  }
 0x1a7   : > { %v3676_v13 = vpop.f32.mrb[64].mxu1  ;;  %2921 = vmatpush3.bf16.msra.mxu1 %v3060_v12 }
 0x1a8   : > { %1555 = vrot.lane.b32.xlu1 %v3583_v17, %s3119_s8  ;;  %v2852_v10 = vpop.f32.mrb[65].mxu1  ;;  %v3680_v15 = vpop.f32.mrb[64].mxu0  ;;  %2922 = vmatprep.subr.bf16.mxu1 %v5165_v32 }
 0x1a9   : > { %v3688_v33 = vpop.f32.mrb[66].mxu1  ;;  %v3690_v18 = vpop.f32.mrb[65].mxu0 }
 0x1aa   : > { %1553 = vrot.lane.b32.xlu0 %v3580_v14, %s3119_s8  ;;  %v2853_v17 = vpop.f32.mrb[67].mxu1  ;;  %v3694_v20 = vpop.f32.mrb[66].mxu0 }
 0x1ab   : > { %v3696_v22 = vpop.f32.mrb[67].mxu0 }
 0x1ac   : > { %v3698_v25 = vpop.permute.xlu0 %1389  ;;  %1620 = vrot.lane.b32.xlu1 %v3601_v23, %s3120_s15 }
 0x1ad   : > { %5241 = vst [vmem:[#allocation21_spill] sm:$0xff] %v3698_v25 }
 0x1ae   : > { %v3703_v39 = vpop.permute.xlu1 %1379  ;;  %1567 = vrot.lane.b32.xlu0 %v3593_v19, %s3119_s8 }
 0x1af   : > { %5242 = vst [vmem:[#allocation22_spill] sm:$0xff] %v3703_v39  ;;  %v3707_v14 = vpop.f32.mrb[68].mxu1 }
 0x1b0   : > { %v3709_v49 = vpop.permute.xlu0 %1369  ;;  %1557 = vrot.lane.b32.xlu1 %v3603_v24, %s3119_s8  ;;  %v2856_v55 = vpop.f32.mrb[69].mxu1 }
 0x1b1   : > { %5243 = vst [vmem:[#allocation23_spill] sm:$0xff] %v3709_v49  ;;  %v3713_v59 = vpop.f32.mrb[70].mxu1  ;;  %v3715_v1 = vpop.f32.mrb[68].mxu0 }
 0x1b2   : > { %v3717_v23 = vpop.permute.xlu1 %1391  ;;  %1547 = vrot.lane.b32.xlu0 %v3596_v21, %s3119_s8  ;;  %v2857_v5 = vpop.f32.mrb[71].mxu1 }
 0x1b3   : > { %5244 = vst [vmem:[#allocation24_spill] sm:$0xff] %v3717_v23  ;;  %v3721_v9 = vpop.f32.mrb[69].mxu0 }
 0x1b4   : > { %v3723_v19 = vpop.permute.xlu0 %1371  ;;  %1600 = vrot.lane.b32.xlu1 %v3606_v28, %s3120_s15  ;;  %v3727_v10 = vpop.f32.mrb[70].mxu0 }
 0x1b5   : > { %5245 = vst [vmem:[#allocation25_spill] sm:$0xff] %v3723_v19  ;;  %v3729_v24 = vpop.f32.mrb[71].mxu0 }
 0x1b6   : > { %v3731_v16 = vpop.permute.xlu1 %1373  ;;  %1622 = vrot.lane.b32.xlu0 %v3613_v35, %s3120_s15 }
 0x1b7   : > { %5246 = vst [vmem:[#allocation26_spill] sm:$0xff] %v3731_v16  ;;  %v3735_v12 = vpop.f32.mrb[72].mxu1 }
 0x1b8   : > { %v3737_v21 = vpop.permute.xlu0 %1381  ;;  %1610 = vrot.lane.b32.xlu1 %v3608_v29, %s3120_s15  ;;  %v2860_v17 = vpop.f32.mrb[73].mxu1 }
 0x1b9   : > { %5247 = vst [vmem:[#allocation27_spill] sm:$0xff] %v3737_v21  ;;  %v3741_v55 = vpop.f32.mrb[74].mxu1  ;;  %v3743_v28 = vpop.f32.mrb[72].mxu0  ;;  %v3063_v21 = vld [vmem:[%s5163_s3 + $0x90] sm:$0xff]  }
 0x1ba   : > { %v3745_v5 = vpop.permute.xlu1 %1383  ;;  %1602 = vrot.lane.b32.xlu0 %v3616_v40, %s3120_s15  ;;  %v2861_v32 = vpop.f32.mrb[75].mxu1  ;;  %2923 = vmatpush3.bf16.msra.mxu1 %v3063_v21 }
 0x1bb   : > { %5248 = vst [vmem:[#allocation28_spill] sm:$0xff] %v3745_v5  ;;  %v3749_v8 = vpop.f32.mrb[73].mxu0 }
 0x1bc   : > { %v3751_v35 = vpop.permute.xlu0 %1393  ;;  %1626 = vrot.lane.b32.xlu1 %v3631_v54, %s3120_s15  ;;  %v3755_v62 = vpop.f32.mrb[74].mxu0 }
 0x1bd   : > { %5249 = vst [vmem:[#allocation29_spill] sm:$0xff] %v3751_v35  ;;  %v3757_v29 = vpop.f32.mrb[75].mxu0 }
 0x1be   : > { %v3759_v17 = vpop.permute.xlu1 %1395  ;;  %1612 = vrot.lane.b32.xlu0 %v3620_v48, %s3120_s15 }
 0x1bf   : > { %5250 = vst [vmem:[#allocation30_spill] sm:$0xff] %v3759_v17  ;;  %v3763_v11 = vpop.f32.mrb[76].mxu1 }
 0x1c0   : > { %v3765_v40 = vpop.permute.xlu0 %1385  ;;  %1606 = vrot.lane.b32.xlu1 %v3634_v56, %s3120_s15  ;;  %v2864_v32 = vpop.f32.mrb[77].mxu1 }
 0x1c1   : > { %5251 = vst [vmem:[#allocation31_spill] sm:$0xff] %v3765_v40  ;;  %v3769_v63 = vpop.f32.mrb[78].mxu1  ;;  %v3771_v54 = vpop.f32.mrb[76].mxu0 }
 0x1c2   : > { %v3773_v53 = vpop.permute.xlu1 %1375  ;;  %1624 = vrot.lane.b32.xlu0 %v3618_v44, %s3120_s15  ;;  %v2865_v17 = vpop.f32.mrb[79].mxu1 }
 0x1c3   : > { %5252 = vst [vmem:[#allocation32_spill] sm:$0xff] %v3773_v53  ;;  %v3777_v35 = vpop.f32.mrb[77].mxu0 }
 0x1c4   : > { %v3779_v48 = vpop.permute.xlu0 %1397  ;;  %1616 = vrot.lane.b32.xlu1 %v3638_v58, %s3120_s15  ;;  %v3783_v40 = vpop.f32.mrb[78].mxu0  ;;  %v3061_v58 = vld [vmem:[%s5163_s3 + $0x50] sm:$0xff]  }
 0x1c5   : > { %5253 = vst [vmem:[#allocation33_spill] sm:$0xff] %v3779_v48  ;;  %v3785_v56 = vpop.f32.mrb[79].mxu0  ;;  %v3062_v48 = vld [vmem:[%s5163_s3 + $0x10] sm:$0xff]   ;;  %2729 = vmatprep.subr.bf16.mxu0 %v3061_v58 }
 0x1c6   : > { %v3787_v32 = vpop.permute.xlu1 %1387  ;;  %1604 = vrot.lane.b32.xlu0 %v3623_v51, %s3120_s15  ;;  %2730 = vmatpush3.bf16.msra.mxu0 %v3062_v48  ;;  %v5259_v48 = vmov 0.0  }
 0x1c7   : > { %5254 = vst [vmem:[#allocation34_spill] sm:$0xff] %v3787_v32  ;;  %v3791_v53 = vpop.f32.mrb[80].mxu1  ;;  %2924 = vmatprep.subr.bf16.mxu1 %v5259_v48 }
 0x1c8   : > { %v3793_v44 = vpop.permute.xlu0 %1377  ;;  %1608 = vrot.lane.b32.xlu1 %v3641_v60, %s3120_s15  ;;  %v2868_v17 = vpop.f32.mrb[81].mxu1 }
 0x1c9   : > { %5255 = vst [vmem:[#allocation35_spill] sm:$0xff] %v3793_v44  ;;  %v3803_v32 = vpop.f32.mrb[82].mxu1  ;;  %v3805_v16 = vpop.f32.mrb[80].mxu0 }
 0x1ca   : > { %v3807_v51 = vpop.permute.xlu1 %1437  ;;  %1614 = vrot.lane.b32.xlu0 %v3625_v52, %s3120_s15  ;;  %v2869_v44 = vpop.f32.mrb[83].mxu1 }
 0x1cb   : > { %5256 = vst [vmem:[#allocation36_spill] sm:$0xff] %v3807_v51  ;;  %v3811_v60 = vpop.f32.mrb[81].mxu0 }
 0x1cc   : > { %v3813_v17 = vpop.permute.xlu0 %1427  ;;  %1618 = vrot.lane.b32.xlu1 %v3643_v61, %s3120_s15  ;;  %v3817_v5 = vpop.f32.mrb[82].mxu0 }
 0x1cd   : > { %5257 = vst [vmem:[#allocation37_spill] sm:$0xff] %v3813_v17  ;;  %v3822_v23 = vpop.f32.mrb[83].mxu0 }
 0x1ce   : > { %v3824_v19 = vpop.permute.xlu1 %1417  ;;  %1628 = vrot.lane.b32.xlu0 %v3636_v57, %s3120_s15 }
 0x1cf   : > { %5258 = vst [vmem:[#allocation38_spill] sm:$0xff] %v3824_v19  ;;  %v3828_v52 = vpop.f32.mrb[84].mxu1 }
 0x1d0   : > { %v3831_v44 = vpop.permute.xlu0 %1439  ;;  %1681 = vrot.lane.b32.xlu1 %v3651_v0, %s3121_s27  ;;  %v2872_v61 = vpop.f32.mrb[85].mxu1 }
 0x1d1   : > { %5260 = vst [vmem:[#allocation39_spill] sm:$0xff] %v3831_v44  ;;  %v3835_v58 = vpop.f32.mrb[86].mxu1  ;;  %v3837_v49 = vpop.f32.mrb[84].mxu0 }
 0x1d2   : > { %v3839_v39 = vpop.permute.xlu1 %1429  ;;  %1683 = vrot.lane.b32.xlu0 %v3656_v3, %s3121_s27  ;;  %v2873_v57 = vpop.f32.mrb[87].mxu1 }
 0x1d3   : > { %5261 = vst [vmem:[#allocation40_spill] sm:$0xff] %v3839_v39  ;;  %v3843_v21 = vpop.f32.mrb[85].mxu0 }
 0x1d4   : > { %v3845_v25 = vpop.permute.xlu0 %1419  ;;  %1661 = vrot.lane.b32.xlu1 %v3654_v2, %s3121_s27  ;;  %v3849_v34 = vpop.f32.mrb[86].mxu0 }
 0x1d5   : > { %5262 = vst [vmem:[#allocation41_spill] sm:$0xff] %v3845_v25  ;;  %v3851_v0 = vpop.f32.mrb[87].mxu0 }
 0x1d6   : > { %v3853_v61 = vpop.permute.xlu1 %1441  ;;  %1663 = vrot.lane.b32.xlu0 %v3662_v6, %s3121_s27 }
 0x1d7   : > { %v3857_v36 = vpop.f32.mrb[88].mxu1 }
 0x1d8   : > { %v3859_v3 = vpop.permute.xlu0 %1431  ;;  %1671 = vrot.lane.b32.xlu1 %v3658_v4, %s3121_s27  ;;  %v2876_v57 = vpop.f32.mrb[89].mxu1 }
 0x1d9   : > { %v3863_v31 = vpop.f32.mrb[90].mxu1  ;;  %v3865_v2 = vpop.f32.mrb[88].mxu0 }
 0x1da   : > { %v3867_v27 = vpop.permute.xlu1 %1421  ;;  %1673 = vrot.lane.b32.xlu0 %v3664_v7, %s3121_s27  ;;  %v2877_v30 = vpop.f32.mrb[91].mxu1 }
 0x1db   : > { %v3871_v39 = vpop.f32.mrb[89].mxu0 }
 0x1dc   : > { %v3873_v6 = vpop.permute.xlu0 %1443  ;;  %1687 = vrot.lane.b32.xlu1 %v3688_v33, %s3121_s27  ;;  %v3877_v26 = vpop.f32.mrb[90].mxu0 }
 0x1dd   : > { %v3879_v4 = vpop.f32.mrb[91].mxu0 }
 0x1de   : > { %v3881_v57 = vpop.permute.xlu1 %1433  ;;  %1685 = vrot.lane.b32.xlu0 %v3676_v13, %s3121_s27 }
 0x1df   : > { %v3885_v44 = vpop.f32.mrb[92].mxu1 }
 0x1e0   : > { %v3887_v7 = vpop.permute.xlu0 %1423  ;;  %1667 = vrot.lane.b32.xlu1 %v3694_v20, %s3121_s27  ;;  %v2880_v30 = vpop.f32.mrb[93].mxu1 }
 0x1e1   : > { %v3891_v25 = vpop.f32.mrb[94].mxu1  ;;  %v3893_v33 = vpop.f32.mrb[92].mxu0 }
 0x1e2   : > { %v3895_v17 = vpop.permute.xlu1 %1425  ;;  %1665 = vrot.lane.b32.xlu0 %v3680_v15, %s3121_s27  ;;  %v2881_v51 = vpop.f32.mrb[95].mxu1 }
 0x1e3   : > { %5263 = vst [vmem:[#allocation42_spill] sm:$0xff] %v3895_v17  ;;  %v3899_v19 = vpop.f32.mrb[93].mxu0 }
 0x1e4   : > { %v3901_v13 = vpop.permute.xlu0 %1445  ;;  %1677 = vrot.lane.b32.xlu1 %v3696_v22, %s3121_s27  ;;  %v3905_v47 = vpop.f32.mrb[94].mxu0  ;;  %v3064_v22 = vld [vmem:[%s5163_s3 + $0x58] sm:$0xff]  }
 0x1e5   : > { %5264 = vst [vmem:[#allocation43_spill] sm:$0xff] %v3901_v13  ;;  %v3907_v20 = vpop.f32.mrb[95].mxu0  ;;  %2731 = vmatprep.subr.bf16.mxu0 %v3064_v22 }
 0x1e6   : > { %v3909_v30 = vpop.permute.xlu1 %1498  ;;  %1675 = vrot.lane.b32.xlu0 %v3690_v18, %s3121_s27 }
 0x1e7   : > { %5265 = vst [vmem:[#allocation44_spill] sm:$0xff] %v3909_v30  ;;  %v3913_v46 = vpop.f32.mrb[96].mxu1 }
 0x1e8   : > { %v3915_v15 = vpop.permute.xlu0 %1435  ;;  %1742 = vrot.lane.b32.xlu1 %v3713_v59, %s3122_s28  ;;  %v2884_v51 = vpop.f32.mrb[97].mxu1  ;;  %v3065_v59 = vld [vmem:[%s5163_s3 + $0x18] sm:$0xff]  }
 0x1e9   : > { %5266 = vst [vmem:[#allocation45_spill] sm:$0xff] %v3915_v15  ;;  %v3922_v50 = vpop.f32.mrb[98].mxu1  ;;  %v3924_v17 = vpop.f32.mrb[96].mxu0  ;;  %v3066_v51 = vld [vmem:[%s5163_s3 + $0x98] sm:$0xff]   ;;  %2732 = vmatpush3.bf16.msra.mxu0 %v3065_v59 }
 0x1ea   : > { %v3926_v30 = vpop.permute.xlu1 %1478  ;;  %1689 = vrot.lane.b32.xlu0 %v3707_v14, %s3121_s27  ;;  %v2885_v18 = vpop.f32.mrb[99].mxu1  ;;  %2925 = vmatpush3.bf16.msra.mxu1 %v3066_v51 }
 0x1eb   : > { %5267 = vst [vmem:[#allocation46_spill] sm:$0xff] %v3926_v30  ;;  %v3936_v15 = vpop.f32.mrb[97].mxu0  ;;  %2926 = vmatprep.subr.bf16.mxu1 %v5259_v48 }
 0x1ec   : > { %v3938_v13 = vpop.permute.xlu0 %1500  ;;  %1679 = vrot.lane.b32.xlu1 %v3721_v9, %s3121_s27  ;;  %v3942_v30 = vpop.f32.mrb[98].mxu0 }
 0x1ed   : > { %5268 = vst [vmem:[#allocation47_spill] sm:$0xff] %v3938_v13  ;;  %v3944_v14 = vpop.f32.mrb[99].mxu0 }
 0x1ee   : > { %v3946_v22 = vpop.permute.xlu1 %1488  ;;  %1669 = vrot.lane.b32.xlu0 %v3715_v1, %s3121_s27 }
 0x1ef   : > { %5269 = vst [vmem:[#allocation48_spill] sm:$0xff] %v3946_v22  ;;  %v3951_v18 = vpop.f32.mrb[100].mxu1 }
 0x1f0   : > { %v3953_v38 = vpop.permute.xlu0 %1480  ;;  %1722 = vrot.lane.b32.xlu1 %v3727_v10, %s3122_s28  ;;  %v2888_v9 = vpop.f32.mrb[101].mxu1 }
 0x1f1   : > { %5270 = vst [vmem:[#allocation49_spill] sm:$0xff] %v3953_v38  ;;  %v3957_v13 = vpop.f32.mrb[102].mxu1  ;;  %v3959_v59 = vpop.f32.mrb[100].mxu0 }
 0x1f2   : > { %v3961_v51 = vpop.permute.xlu1 %1504  ;;  %1744 = vrot.lane.b32.xlu0 %v3735_v12, %s3122_s28  ;;  %v2889_v1 = vpop.f32.mrb[103].mxu1 }
 0x1f3   : > { %5271 = vst [vmem:[#allocation50_spill] sm:$0xff] %v3961_v51  ;;  %v3965_v22 = vpop.f32.mrb[101].mxu0 }
 0x1f4   : > { %v3967_v41 = vpop.permute.xlu0 %1490  ;;  %1732 = vrot.lane.b32.xlu1 %v3729_v24, %s3122_s28  ;;  %v3971_v38 = vpop.f32.mrb[102].mxu0 }
 0x1f5   : > { %5272 = vst [vmem:[#allocation51_spill] sm:$0xff] %v3967_v41  ;;  %v3973_v10 = vpop.f32.mrb[103].mxu0 }
 0x1f6   : > { %v3975_v9 = vpop.permute.xlu1 %1484  ;;  %1724 = vrot.lane.b32.xlu0 %v3743_v28, %s3122_s28 }
 0x1f7   : > { %5273 = vst [vmem:[#allocation52_spill] sm:$0xff] %v3975_v9  ;;  %v3979_v51 = vpop.f32.mrb[104].mxu1 }
 0x1f8   : > { %v3981_v12 = vpop.permute.xlu0 %1502  ;;  %1748 = vrot.lane.b32.xlu1 %v3763_v11, %s3122_s28  ;;  %v2892_v1 = vpop.f32.mrb[105].mxu1 }
 0x1f9   : > { %5274 = vst [vmem:[#allocation53_spill] sm:$0xff] %v3981_v12  ;;  %v3985_v41 = vpop.f32.mrb[106].mxu1  ;;  %v3987_v24 = vpop.f32.mrb[104].mxu0 }
 0x1fa   : > { %v3989_v43 = vpop.permute.xlu1 %1494  ;;  %1734 = vrot.lane.b32.xlu0 %v3749_v8, %s3122_s28  ;;  %v2893_v9 = vpop.f32.mrb[107].mxu1 }
 0x1fb   : > { %5275 = vst [vmem:[#allocation54_spill] sm:$0xff] %v3989_v43  ;;  %v3993_v45 = vpop.f32.mrb[105].mxu0 }
 0x1fc   : > { %5276 = vst [vmem:[#allocation55_spill] sm:$0xff] %v3993_v45  ;;  %v3995_v28 = vpop.permute.xlu0 %1482  ;;  %1728 = vrot.lane.b32.xlu1 %v3771_v54, %s3122_s28  ;;  %v3999_v12 = vpop.f32.mrb[106].mxu0 }
 0x1fd   : > { %5277 = vst [vmem:[#allocation56_spill] sm:$0xff] %v3995_v28  ;;  %v4001_v11 = vpop.f32.mrb[107].mxu0 }
 0x1fe   : > { %5278 = vst [vmem:[#allocation57_spill] sm:$0xff] %v4001_v11  ;;  %v4003_v1 = vpop.permute.xlu1 %1486  ;;  %1746 = vrot.lane.b32.xlu0 %v3741_v55, %s3122_s28 }
 0x1ff   : > { %5279 = vst [vmem:[#allocation58_spill] sm:$0xff] %v4003_v1  ;;  %v4007_v43 = vpop.f32.mrb[108].mxu1 }
 0x200   : > { %5280 = vst [vmem:[#allocation59_spill] sm:$0xff] %v4007_v43  ;;  %v4009_v8 = vpop.permute.xlu0 %1492  ;;  %1738 = vrot.lane.b32.xlu1 %v3777_v35, %s3122_s28  ;;  %v4013_v9 = vpop.f32.mrb[108].mxu0 }
 0x201   : > { %5281 = vst [vmem:[#allocation60_spill] sm:$0xff] %v4009_v8  ;;  %v4015_v28 = vpop.f32.mrb[109].mxu0  ;;  %v2896_v54 = vpop.f32.mrb[109].mxu1 }
 0x202   : > { %v4017_v45 = vpop.permute.xlu1 %1496  ;;  %1726 = vrot.lane.b32.xlu0 %v3755_v62, %s3122_s28  ;;  %v4021_v1 = vpop.f32.mrb[110].mxu1 }
 0x203   : > { %5282 = vst [vmem:[#allocation61_spill] sm:$0xff] %v4017_v45  ;;  %v4023_v55 = vpop.f32.mrb[110].mxu0  ;;  %v2897_v43 = vpop.f32.mrb[111].mxu1 }
 0x204   : > { %v4025_v11 = vpop.permute.xlu0 %1506  ;;  %1730 = vrot.lane.b32.xlu1 %v3783_v40, %s3122_s28  ;;  %v4029_v35 = vpop.f32.mrb[111].mxu0 }
 0x205   : > { %5283 = vst [vmem:[#allocation62_spill] sm:$0xff] %v4025_v11 }
 0x206   : > { %v4031_v8 = vpop.permute.xlu1 %1559  ;;  %1736 = vrot.lane.b32.xlu0 %v3757_v29, %s3122_s28  ;;  %v3067_v29 = vld [vmem:[%s5163_s3 + $0x60] sm:$0xff]  }
 0x207   : > { %5284 = vst [vmem:[#allocation63_spill] sm:$0xff] %v4031_v8  ;;  %v4035_v54 = vpop.f32.mrb[112].mxu1  ;;  %2733 = vmatprep.subr.bf16.mxu0 %v3067_v29 }
 0x208   : > { %v4037_v62 = vpop.permute.xlu0 %1561  ;;  %1740 = vrot.lane.b32.xlu1 %v3785_v56, %s3122_s28  ;;  %v2900_v43 = vpop.f32.mrb[113].mxu1 }
 0x209   : > { %5285 = vst [vmem:[#allocation64_spill] sm:$0xff] %v4037_v62  ;;  %v4041_v45 = vpop.f32.mrb[114].mxu1  ;;  %v4043_v11 = vpop.f32.mrb[112].mxu0  ;;  %v3068_v62 = vld [vmem:[%s5163_s3 + $0x20] sm:$0xff]  }
 0x20a   : > { %5286 = vst [vmem:[#allocation65_spill] sm:$0xff] %v4041_v45  ;;  %v4045_v40 = vpop.permute.xlu1 %1539  ;;  %1750 = vrot.lane.b32.xlu0 %v3769_v63, %s3122_s28  ;;  %v2901_v8 = vpop.f32.mrb[115].mxu1  ;;  %v3069_v63 = vld [vmem:[%s5163_s3 + $0xa0] sm:$0xff]   ;;  %2734 = vmatpush3.bf16.msra.mxu0 %v3068_v62  ;;  %s3125_s28 = smov 118  }
 0x20b   : > { %5287 = vst [vmem:[#allocation66_spill] sm:$0xff] %v4045_v40  ;;  %v4055_v56 = vpop.f32.mrb[113].mxu0  ;;  %2927 = vmatpush3.bf16.msra.mxu1 %v3069_v63 }
 0x20c   : > { %v4057_v43 = vpop.permute.xlu0 %1541  ;;  %1803 = vrot.lane.b32.xlu1 %v3791_v53, %s3123_s13  ;;  %v4061_v40 = vpop.f32.mrb[114].mxu0  ;;  %2928 = vmatprep.subr.bf16.mxu1 %v5259_v48 }
 0x20d   : > { %5288 = vst [vmem:[#allocation67_spill] sm:$0xff] %v4057_v43  ;;  %5289 = vst [vmem:[#allocation68_spill] sm:$0xff] %v4061_v40  ;;  %v4066_v8 = vpop.f32.mrb[115].mxu0 }
 0x20e   : > { %5290 = vst [vmem:[#allocation69_spill] sm:$0xff] %v4066_v8  ;;  %v4068_v45 = vpop.permute.xlu1 %1549  ;;  %1805 = vrot.lane.b32.xlu0 %v3803_v32, %s3123_s13 }
 0x20f   : > { %5291 = vst [vmem:[#allocation70_spill] sm:$0xff] %v4068_v45  ;;  %v4072_v43 = vpop.f32.mrb[116].mxu1 }
 0x210   : > { %v4075_v53 = vpop.permute.xlu0 %1551  ;;  %1783 = vrot.lane.b32.xlu1 %v3805_v16, %s3123_s13  ;;  %v2904_v29 = vpop.f32.mrb[117].mxu1 }
 0x211   : > { %5292 = vst [vmem:[#allocation71_spill] sm:$0xff] %v4075_v53  ;;  %v4079_v40 = vpop.f32.mrb[118].mxu1  ;;  %v4081_v8 = vpop.f32.mrb[116].mxu0 }
 0x212   : > { %5293 = vst [vmem:[#allocation72_spill] sm:$0xff] %v4079_v40  ;;  %5294 = vst [vmem:[#allocation73_spill] sm:$0xff] %v4081_v8  ;;  %v4083_v62 = vpop.permute.xlu1 %1565  ;;  %1785 = vrot.lane.b32.xlu0 %v3817_v5, %s3123_s13  ;;  %v2905_v32 = vpop.f32.mrb[119].mxu1 }
 0x213   : > { %v4087_v63 = vpop.f32.mrb[117].mxu0 }
 0x214   : > { %5295 = vst [vmem:[#allocation74_spill] sm:$0xff] %v4087_v63  ;;  %v4089_v45 = vpop.permute.xlu0 %1563  ;;  %1793 = vrot.lane.b32.xlu1 %v3811_v60, %s3123_s13  ;;  %v4093_v53 = vpop.f32.mrb[118].mxu0 }
 0x215   : > { %5296 = vst [vmem:[#allocation75_spill] sm:$0xff] %v4093_v53  ;;  %v4095_v16 = vpop.f32.mrb[119].mxu0 }
 0x216   : > { %5297 = vst [vmem:[#allocation76_spill] sm:$0xff] %v4095_v16  ;;  %v4097_v29 = vpop.permute.xlu1 %1545  ;;  %1795 = vrot.lane.b32.xlu0 %v3822_v23, %s3123_s13 }
 0x217   : > { %v4101_v40 = vpop.f32.mrb[120].mxu1 }
 0x218   : > { %5298 = vst [vmem:[#allocation77_spill] sm:$0xff] %v4101_v40  ;;  %v4103_v5 = vpop.permute.xlu0 %1543  ;;  %1809 = vrot.lane.b32.xlu1 %v3835_v58, %s3123_s13  ;;  %v2908_v32 = vpop.f32.mrb[121].mxu1 }
 0x219   : > { %v4107_v63 = vpop.f32.mrb[122].mxu1  ;;  %v4109_v60 = vpop.f32.mrb[120].mxu0 }
 0x21a   : > { %5299 = vst [vmem:[#allocation78_spill] sm:$0xff] %v4109_v60  ;;  %v4111_v53 = vpop.permute.xlu1 %1555  ;;  %1807 = vrot.lane.b32.xlu0 %v3828_v52, %s3123_s13  ;;  %v2909_v16 = vpop.f32.mrb[123].mxu1 }
 0x21b   : > { %v4115_v8 = vpop.f32.mrb[121].mxu0 }
 0x21c   : > { %5300 = vst [vmem:[#allocation79_spill] sm:$0xff] %v4115_v8  ;;  %v4117_v23 = vpop.permute.xlu0 %1553  ;;  %1789 = vrot.lane.b32.xlu1 %v3849_v34, %s3123_s13  ;;  %v4121_v40 = vpop.f32.mrb[122].mxu0 }
 0x21d   : > { %5301 = vst [vmem:[#allocation80_spill] sm:$0xff] %v4121_v40  ;;  %v4123_v58 = vpop.f32.mrb[123].mxu0 }
 0x21e   : > { %5302 = vst [vmem:[#allocation81_spill] sm:$0xff] %v4123_v58  ;;  %v4125_v32 = vpop.permute.xlu1 %1620  ;;  %1787 = vrot.lane.b32.xlu0 %v3837_v49, %s3123_s13 }
 0x21f   : > { %5303 = vst [vmem:[#allocation82_spill] sm:$0xff] %v4125_v32  ;;  %v4129_v60 = vpop.f32.mrb[124].mxu1 }
 0x220   : > { %5304 = vst [vmem:[#allocation83_spill] sm:$0xff] %v4129_v60  ;;  %v4131_v52 = vpop.permute.xlu0 %1567  ;;  %1799 = vrot.lane.b32.xlu1 %v3851_v0, %s3123_s13  ;;  %v2912_v16 = vpop.f32.mrb[125].mxu1 }
 0x221   : > { %v4135_v8 = vpop.f32.mrb[126].mxu1  ;;  %v4137_v34 = vpop.f32.mrb[124].mxu0 }
 0x222   : > { %5305 = vst [vmem:[#allocation84_spill] sm:$0xff] %v4137_v34  ;;  %v4139_v40 = vpop.permute.xlu1 %1557  ;;  %1797 = vrot.lane.b32.xlu0 %v3843_v21, %s3123_s13  ;;  %v2913_v32 = vpop.f32.mrb[127].mxu1 }
 0x223   : > { %v4143_v58 = vpop.f32.mrb[125].mxu0 }
 0x224   : > { %5306 = vst [vmem:[#allocation85_spill] sm:$0xff] %v4143_v58  ;;  %v4145_v49 = vpop.permute.xlu0 %1547  ;;  %1864 = vrot.lane.b32.xlu1 %v3863_v31, %s3124_s20  ;;  %v4149_v0 = vpop.f32.mrb[126].mxu0  ;;  %v3070_v31 = vld [vmem:[%s5163_s3 + $0x68] sm:$0xff]  }
 0x225   : > { %v4151_v16 = vpop.f32.mrb[127].mxu0  ;;  %2735 = vmatprep.subr.bf16.mxu0 %v3070_v31 }
 0x226   : > { %5307 = vst [vmem:[#allocation86_spill] sm:$0xff] %v4151_v16  ;;  %v4153_v60 = vpop.permute.xlu1 %1600  ;;  %1811 = vrot.lane.b32.xlu0 %v3857_v36, %s3123_s13 }
 0x227   : > { %5308 = vst [vmem:[#allocation87_spill] sm:$0xff] %v4153_v60  ;;  %v4157_v34 = vpop.f32.mrb[128].mxu1 }
 0x228   : > { %5309 = vst [vmem:[#allocation88_spill] sm:$0xff] %v4157_v34  ;;  %v4159_v21 = vpop.permute.xlu0 %1622  ;;  %1801 = vrot.lane.b32.xlu1 %v3871_v39, %s3123_s13  ;;  %v4163_v32 = vpop.f32.mrb[128].mxu0  ;;  %v3071_v39 = vld [vmem:[%s5163_s3 + $0x28] sm:$0xff]  }
 0x229   : > { %5310 = vst [vmem:[#allocation89_spill] sm:$0xff] %v4159_v21  ;;  %5311 = vst [vmem:[#allocation90_spill] sm:$0xff] %v4163_v32  ;;  %v4168_v58 = vpop.f32.mrb[129].mxu0  ;;  %v2916_v16 = vpop.f32.mrb[129].mxu1  ;;  %2736 = vmatpush3.bf16.msra.mxu0 %v3071_v39 }
 0x22a   : > { %5312 = vst [vmem:[#allocation91_spill] sm:$0xff] %v4168_v58  ;;  %v4170_v60 = vpop.permute.xlu1 %1610  ;;  %1791 = vrot.lane.b32.xlu0 %v3865_v2, %s3123_s13  ;;  %v1070_v36 = vpop.f32.mrb[130].mxu0  ;;  %v3072_v2 = vld [vmem:[%s5163_s3 + $0xa8] sm:$0xff]  }
 0x22b   : > { %v1366_v21 = vpop.f32.mrb[130].mxu1  ;;  %v1071_v32 = vpop.f32.mrb[131].mxu0  ;;  %2929 = vmatpush3.bf16.msra.mxu1 %v3072_v2 }
 0x22c   : > { %v4177_v34 = vpop.permute.xlu0 %1602  ;;  %1844 = vrot.lane.b32.xlu1 %v3877_v26, %s3124_s20  ;;  %v2917_v58 = vpop.f32.mrb[131].mxu1  ;;  %2930 = vmatprep.subr.bf16.mxu1 %v5259_v48 }
 0x22e   : > { %v4181_v16 = vpop.permute.xlu1 %1626  ;;  %1866 = vrot.lane.b32.xlu0 %v3885_v44, %s3124_s20 }
 0x230   : > { %v4188_v31 = vpop.permute.xlu0 %1612  ;;  %1854 = vrot.lane.b32.xlu1 %v3879_v4, %s3124_s20 }
 0x232   : > { %v4193_v26 = vpop.permute.xlu1 %1606  ;;  %1856 = vrot.lane.b32.xlu0 %v3899_v19, %s3124_s20 }
 0x234   : > { %v4197_v58 = vpop.permute.xlu0 %1624  ;;  %1846 = vrot.lane.b32.xlu1 %v3893_v33, %s3124_s20 }
 0x236   : > { %v4201_v44 = vpop.permute.xlu1 %1616  ;;  %1870 = vrot.lane.b32.xlu0 %v3913_v46, %s3124_s20 }
 0x238   : > { %v4205_v21 = vpop.permute.xlu0 %1604  ;;  %1868 = vrot.lane.b32.xlu1 %v3891_v25, %s3124_s20 }
 0x23a   : > { %v4209_v4 = vpop.permute.xlu1 %1608  ;;  %1850 = vrot.lane.b32.xlu0 %v3924_v17, %s3124_s20 }
 0x23b   : > { %5313 = vst [vmem:[#allocation92_spill] sm:$0xff] %v4209_v4 }
 0x23c   : > { %v4213_v19 = vpop.permute.xlu0 %1614  ;;  %1848 = vrot.lane.b32.xlu1 %v3905_v47, %s3124_s20  ;;  %v1399_v47 = vlaneseq }
 0x23e   : > { %v4217_v33 = vpop.permute.xlu1 %1618  ;;  %1860 = vrot.lane.b32.xlu0 %v3936_v15, %s3124_s20 }
 0x23f   : > { %5314 = vst [vmem:[#allocation93_spill] sm:$0xff] %v4217_v33 }
 0x240   : > { %v4221_v46 = vpop.permute.xlu0 %1628  ;;  %1858 = vrot.lane.b32.xlu1 %v3907_v20, %s3124_s20  ;;  %v4241_v20 = vand.u32 127, %v1399_v47 }
 0x242   : > { %v4225_v25 = vpop.permute.xlu1 %1681  ;;  %1872 = vrot.lane.b32.xlu0 %v3922_v50, %s3124_s20  ;;  %vm1447_vm1 = vcmp.lt.s32.totalorder %v4241_v20, 126  ;;  %vm1569_vm2 = vcmp.lt.s32.totalorder %v4241_v20, 124  ;;  %vm1691_vm3 = vcmp.lt.s32.totalorder %v4241_v20, 122  ;;  %vm1752_vm4 = vcmp.lt.s32.totalorder %v4241_v20, 121 }
 0x243   : > { %v1583_v39 = vsel %vm1569_vm2, %v4083_v62, %v4097_v29  ;;  %vm1813_vm5 = vcmp.lt.s32.totalorder %v4241_v20, 120  ;;  %vm1508_vm6 = vcmp.lt.s32.totalorder %v4241_v20, 125  ;;  %vm1401_vm7 = vcmp.lt.s32.totalorder %v4241_v20, 127 }
 0x244   : > { %v4229_v17 = vpop.permute.xlu0 %1683  ;;  %1862 = vrot.lane.b32.xlu1 %v3944_v14, %s3124_s20  ;;  %vm1630_vm8 = vcmp.lt.s32.totalorder %v4241_v20, 123  ;;  %vm1874_vm9 = vcmp.lt.s32.totalorder %v4241_v20, 119  ;;  %vm1935_vm10 = vcmp.lt.s32.totalorder %v4241_v20, 118  ;;  %vm1996_vm11 = vcmp.lt.s32.totalorder %v4241_v20, 117 }
 0x245   : > { %vm2057_vm12 = vcmp.lt.s32.totalorder %v4241_v20, 116 }
 0x246   : > { %v4233_v32 = vpop.permute.xlu1 %1661  ;;  %1852 = vrot.lane.b32.xlu0 %v3942_v30, %s3124_s20  ;;  %v3073_v30 = vld [vmem:[%s5163_s3 + $0x70] sm:$0xff]   ;;  %s3127_s20 = smov 116  }
 0x247   : > { %2737 = vmatprep.subr.bf16.mxu0 %v3073_v30  ;;  %v1451_v30 = vsel %vm1447_vm1, %v3881_v57, %v3873_v6 }
 0x248   : > { %v4237_v15 = vpop.permute.xlu0 %1663  ;;  %1925 = vrot.lane.b32.xlu1 %v3951_v18, %s3125_s28  ;;  %v3074_v18 = vld [vmem:[%s5163_s3 + $0x30] sm:$0xff]  }
 0x249   : > { %2738 = vmatpush3.bf16.msra.mxu0 %v3074_v18  ;;  %v1456_v18 = vsel %vm1447_vm1, %v3887_v7, %v3881_v57  ;;  %v1455_v57 = vsel %vm1447_vm1, %v3867_v27, %v3859_v3 }
 0x24a   : > { %v4243_v50 = vpop.permute.xlu1 %1671  ;;  %1905 = vrot.lane.b32.xlu0 %v3959_v59, %s3125_s28  ;;  %v1461_v59 = vsel %vm1447_vm1, %v3873_v6, %v3887_v7 }
 0x24b   : > { %v1474_v2 = vadd.f32 %v1461_v59, %v3502_v42  ;;  %v1582_v42 = vsel %vm1569_vm2, %v4089_v45, %v4103_v5 }
 0x24c   : > { %v4248_v14 = vpop.permute.xlu0 %1673  ;;  %1915 = vrot.lane.b32.xlu1 %v3965_v22, %s3125_s28  ;;  %v1460_v22 = vsel %vm1447_vm1, %v3853_v61, %v3867_v27 }
 0x24d   : > { %v1471_v59 = vadd.f32 %v1460_v22, %v3493_v37  ;;  %v1596_v4 = vadd.f32 %v1583_v39, %v1474_v2  ;;  %v1578_v37 = vsel %vm1569_vm2, %v4097_v29, %v4111_v53  ;;  %v5316_v39 = vld [vmem:[#allocation11_spill] sm:$0xff]  ;;  %v1577_v29 = vsel %vm1569_vm2, %v4103_v5, %v4117_v23 }
 0x24e   : > { %v1688_v36 = vpop.permute.xlu1 %1687  ;;  %1927 = vrot.lane.b32.xlu0 %v3957_v13, %s3125_s28  ;;  %v3075_v13 = vld [vmem:[%s5163_s3 + $0xb0] sm:$0xff]   ;;  %v1472_v2 = vadd.f32 %v1456_v18, %v5316_v39 }
 0x24f   : > { %2931 = vmatpush3.bf16.msra.mxu1 %v3075_v13  ;;  %v1593_v27 = vadd.f32 %v1582_v42, %v1471_v59 }
 0x250   : > { %v1686_v47 = vpop.permute.xlu0 %1685  ;;  %1907 = vrot.lane.b32.xlu1 %v3971_v38, %s3125_s28  ;;  %v1450_v38 = vsel %vm1447_vm1, %v3859_v3, %v3853_v61  ;;  %v1573_v61 = vsel %vm1569_vm2, %v4111_v53, %v4083_v62  ;;  %2932 = vmatprep.subr.bf16.mxu1 %v5259_v48  ;;  %v5317_v62 = vld [vmem:[#allocation10_spill] sm:$0xff]  ;;  %v1572_v53 = vsel %vm1569_vm2, %v4117_v23, %v4089_v45 }
 0x251   : > { %v1470_v33 = vadd.f32 %v1450_v38, %v5317_v62  ;;  %v1594_v42 = vadd.f32 %v1578_v37, %v1472_v2  ;;  %v5320_v37 = vld [vmem:[#allocation45_spill] sm:$0xff]  ;;  %v5322_v62 = vld [vmem:[#allocation15_spill] sm:$0xff] }
 0x252   : > { %v1668_v6 = vpop.permute.xlu1 %1667  ;;  %1917 = vrot.lane.b32.xlu0 %v3973_v10, %s3125_s28  ;;  %v5315_v10 = vld [vmem:[#allocation12_spill] sm:$0xff] }
 0x253   : > { %v1705_v7 = vsel %vm1691_vm3, %v1688_v36, %v1668_v6  ;;  %v1473_v22 = vadd.f32 %v1451_v30, %v5315_v10  ;;  %v5318_v30 = vld [vmem:[#allocation9_spill] sm:$0xff]  ;;  %v1592_v23 = vadd.f32 %v1572_v53, %v1470_v33 }
 0x254   : > { %v4316_v3 = vadd.f32 %v1705_v7, %v1596_v4  ;;  %v1666_v13 = vpop.permute.xlu0 %1665  ;;  %1929 = vrot.lane.b32.xlu1 %v3979_v51, %s3125_s28  ;;  %v1469_v18 = vadd.f32 %v1455_v57, %v5318_v30  ;;  %v1584_v30 = vsel %vm1569_vm2, %v4131_v52, %v4145_v49 }
 0x255   : > { %v1704_v4 = vsel %vm1691_vm3, %v1686_v47, %v1666_v13  ;;  %v1595_v59 = vadd.f32 %v1573_v61, %v1473_v22  ;;  %v5319_v61 = vld [vmem:[#allocation43_spill] sm:$0xff] }
 0x256   : > { %v4332_v51 = vadd.f32 %v1704_v4, %v1593_v27  ;;  %v1678_v38 = vpop.permute.xlu1 %1677  ;;  %1931 = vrot.lane.b32.xlu0 %v3985_v41, %s3125_s28  ;;  %v1591_v5 = vadd.f32 %v1577_v29, %v1469_v18  ;;  %v1452_v41 = vsel %vm1447_vm1, %v5320_v37, %v5319_v61  ;;  %v1579_v4 = vsel %vm1569_vm2, %v4145_v49, %v4139_v40  ;;  %v5324_v18 = vld [vmem:[#allocation13_spill] sm:$0xff] }
 0x257   : > { %v1695_v45 = vsel %vm1691_vm3, %v1678_v38, %v1688_v36  ;;  %v1700_v7 = vsel %vm1691_vm3, %v1668_v6, %v1678_v38  ;;  %v1476_v53 = vadd.f32 %v1452_v41, %v5322_v62 }
 0x258   : > { %v4340_v10 = vadd.f32 %v1700_v7, %v1594_v42  ;;  %v4342_v39 = vadd.f32 %v1695_v45, %v1595_v59  ;;  %v1676_v57 = vpop.permute.xlu0 %1675  ;;  %1909 = vrot.lane.b32.xlu1 %v3987_v24, %s3125_s28  ;;  %v5321_v24 = vld [vmem:[#allocation42_spill] sm:$0xff] }
 0x259   : > { %v1694_v36 = vsel %vm1691_vm3, %v1676_v57, %v1686_v47  ;;  %v1699_v6 = vsel %vm1691_vm3, %v1666_v13, %v1676_v57  ;;  %v1462_v27 = vsel %vm1447_vm1, %v5319_v61, %v5321_v24  ;;  %v1457_v47 = vsel %vm1447_vm1, %v5321_v24, %v5320_v37  ;;  %v5325_v59 = vld [vmem:[#allocation14_spill] sm:$0xff]  ;;  %v5327_v24 = vld [vmem:[#allocation59_spill] sm:$0xff] }
 0x25a   : > { %v4354_v33 = vadd.f32 %v1699_v6, %v1591_v5  ;;  %v4356_v22 = vadd.f32 %v1694_v36, %v1592_v23  ;;  %v1743_v2 = vpop.permute.xlu1 %1742  ;;  %1911 = vrot.lane.b32.xlu0 %v3999_v12, %s3125_s28  ;;  %v1574_v13 = vsel %vm1569_vm2, %v4139_v40, %v4131_v52  ;;  %v5323_v12 = vld [vmem:[#allocation55_spill] sm:$0xff]  ;;  %v1477_v42 = vadd.f32 %v1462_v27, %v5324_v18  ;;  %v5326_v5 = vld [vmem:[#allocation57_spill] sm:$0xff]  ;;  %v3078_v18 = vld [vmem:[%s5163_s3 + $0xb8] sm:$0xff]  }
 0x25b   : > { %v1475_v38 = vadd.f32 %v1457_v47, %v5325_v59  ;;  %v1598_v45 = vadd.f32 %v1574_v13, %v1476_v53  ;;  %2933 = vmatpush3.bf16.msra.mxu1 %v3078_v18  ;;  %v5340_v18 = vld [vmem:[#allocation66_spill] sm:$0xff] }
 0x25c   : > { %v1690_v29 = vpop.permute.xlu0 %1689  ;;  %1919 = vrot.lane.b32.xlu1 %v5323_v12, %s3125_s28  ;;  %v1599_v61 = vadd.f32 %v1584_v30, %v1477_v42 }
 0x25d   : > { %v1597_v57 = vadd.f32 %v1579_v4, %v1475_v38 }
 0x25e   : > { %v1680_v7 = vpop.permute.xlu1 %1679  ;;  %1921 = vrot.lane.b32.xlu0 %v5326_v5, %s3125_s28 }
 0x25f   : > { %v1696_v23 = vsel %vm1691_vm3, %v1680_v7, %v1690_v29 }
 0x260   : > { %v4389_v40 = vadd.f32 %v1696_v23, %v1598_v45  ;;  %v1670_v37 = vpop.permute.xlu0 %1669  ;;  %1913 = vrot.lane.b32.xlu1 %v4013_v9, %s3125_s28  ;;  %v5330_v23 = vld [vmem:[#allocation68_spill] sm:$0xff] }
 0x261   : > { %v1701_v52 = vsel %vm1691_vm3, %v1670_v37, %v1680_v7  ;;  %v1706_v49 = vsel %vm1691_vm3, %v1690_v29, %v1670_v37 }
 0x262   : > { %v4398_v41 = vadd.f32 %v1701_v52, %v1597_v57  ;;  %v4400_v36 = vadd.f32 %v1706_v49, %v1599_v61  ;;  %v1723_v6 = vpop.permute.xlu1 %1722  ;;  %1933 = vrot.lane.b32.xlu0 %v5327_v24, %s3125_s28  ;;  %v5332_v52 = vld [vmem:[#allocation74_spill] sm:$0xff] }
 0x263   : > { %v4406_v27 = vsel %vm1752_vm4, %v1743_v2, %v1723_v6  ;;  %v5333_v49 = vld [vmem:[#allocation38_spill] sm:$0xff] }
 0x264   : > { %v1745_v9 = vpop.permute.xlu0 %1744  ;;  %1923 = vrot.lane.b32.xlu1 %v4015_v28, %s3125_s28 }
 0x266   : > { %v1733_v47 = vpop.permute.xlu1 %1732  ;;  %1986 = vrot.lane.b32.xlu0 %v4021_v1, %s3126_s9 }
 0x267   : > { %v4414_v13 = vsel %vm1752_vm4, %v1733_v47, %v1743_v2  ;;  %v4418_v62 = vsel %vm1752_vm4, %v1723_v6, %v1733_v47  ;;  %v3076_v2 = vld [vmem:[%s5163_s3 + $0x78] sm:$0xff]   ;;  %v5334_v6 = vld [vmem:[#allocation36_spill] sm:$0xff]  ;;  %v5336_v47 = vld [vmem:[#allocation37_spill] sm:$0xff] }
 0x268   : > { %v1725_v53 = vpop.permute.xlu0 %1724  ;;  %1988 = vrot.lane.b32.xlu1 %v4035_v54, %s3126_s9  ;;  %2739 = vmatprep.subr.bf16.mxu0 %v3076_v2  ;;  %v1458_v24 = vsel %vm1447_vm1, %v5334_v6, %v5333_v49  ;;  %v5337_v2 = vld [vmem:[#allocation69_spill] sm:$0xff] }
 0x269   : > { %v4424_v28 = vsel %vm1752_vm4, %v1745_v9, %v1725_v53 }
 0x26a   : > { %v1749_v29 = vpop.permute.xlu1 %1748  ;;  %1966 = vrot.lane.b32.xlu0 %v4023_v55, %s3126_s9 }
 0x26c   : > { %v1735_v1 = vpop.permute.xlu0 %1734  ;;  %1968 = vrot.lane.b32.xlu1 %v4043_v11, %s3126_s9  ;;  %v3077_v11 = vld [vmem:[%s5163_s3 + $0x38] sm:$0xff]  }
 0x26d   : > { %v4435_v12 = vsel %vm1752_vm4, %v1735_v1, %v1745_v9  ;;  %v4439_v54 = vsel %vm1752_vm4, %v1725_v53, %v1735_v1  ;;  %2740 = vmatpush3.bf16.msra.mxu0 %v3077_v11  ;;  %v1448_v53 = vsel %vm1447_vm1, %v5336_v47, %v5334_v6  ;;  %v5339_v11 = vld [vmem:[#allocation39_spill] sm:$0xff] }
 0x26e   : > { %v1729_v4 = vpop.permute.xlu1 %1728  ;;  %1976 = vrot.lane.b32.xlu0 %v4029_v35, %s3126_s9 }
 0x26f   : > { %v4448_v55 = vsel %vm1752_vm4, %v1749_v29, %v1729_v4 }
 0x270   : > { %v1747_v30 = vpop.permute.xlu0 %1746  ;;  %1978 = vrot.lane.b32.xlu1 %v4055_v56, %s3126_s9  ;;  %v5328_v56 = vld [vmem:[#allocation65_spill] sm:$0xff] }
 0x272   : > { %v1739_v42 = vpop.permute.xlu1 %1738  ;;  %1992 = vrot.lane.b32.xlu0 %v4072_v43, %s3126_s9  ;;  %v5329_v43 = vld [vmem:[#allocation73_spill] sm:$0xff] }
 0x273   : > { %v4459_v35 = vsel %vm1752_vm4, %v1739_v42, %v1749_v29  ;;  %v4463_v59 = vsel %vm1752_vm4, %v1729_v4, %v1739_v42  ;;  %v1453_v29 = vsel %vm1447_vm1, %v5333_v49, %v5336_v47  ;;  %v5338_v4 = vld [vmem:[#allocation41_spill] sm:$0xff]  ;;  %v5341_v42 = vld [vmem:[#allocation63_spill] sm:$0xff] }
 0x274   : > { %v1727_v38 = vpop.permute.xlu0 %1726  ;;  %1990 = vrot.lane.b32.xlu1 %v5328_v56, %s3126_s9  ;;  %v5346_v47 = vld [vmem:[#allocation77_spill] sm:$0xff] }
 0x275   : > { %v4469_v45 = vsel %vm1752_vm4, %v1747_v30, %v1727_v38 }
 0x276   : > { %v1731_v7 = vpop.permute.xlu1 %1730  ;;  %1972 = vrot.lane.b32.xlu0 %v5329_v43, %s3126_s9 }
 0x278   : > { %v1737_v5 = vpop.permute.xlu0 %1736  ;;  %1970 = vrot.lane.b32.xlu1 %v5330_v23, %s3126_s9 }
 0x279   : > { %v4477_v57 = vsel %vm1752_vm4, %v1737_v5, %v1747_v30  ;;  %v4481_v61 = vsel %vm1752_vm4, %v1727_v38, %v1737_v5  ;;  %v1459_v30 = vsel %vm1447_vm1, %v5339_v11, %v5338_v4  ;;  %v1580_v38 = vsel %vm1569_vm2, %v5341_v42, %v5340_v18  ;;  %v5344_v5 = vld [vmem:[#allocation3_spill] sm:$0xff] }
 0x27a   : > { %5331 = vst [vmem:[#allocation12_spill] sm:$0xff] %v4477_v57  ;;  %v1741_v37 = vpop.permute.xlu1 %1740  ;;  %1982 = vrot.lane.b32.xlu0 %v5332_v52, %s3126_s9  ;;  %v1465_v23 = vadd.f32 %v1458_v24, %v5344_v5  ;;  %v5345_v52 = vld [vmem:[#allocation40_spill] sm:$0xff] }
 0x27b   : > { %v4491_v9 = vsel %vm1752_vm4, %v1731_v7, %v1741_v37  ;;  %v1449_v49 = vsel %vm1447_vm1, %v5345_v52, %v5339_v11  ;;  %v1702_v11 = vsel %vm1691_vm3, %v4225_v25, %v4233_v32  ;;  %v5350_v5 = vld [vmem:[#allocation4_spill] sm:$0xff] }
 0x27c   : > { %5335 = vst [vmem:[#allocation11_spill] sm:$0xff] %v4491_v9  ;;  %v1751_v1 = vpop.permute.xlu0 %1750  ;;  %1980 = vrot.lane.b32.xlu1 %v5337_v2, %s3126_s9  ;;  %v5347_v2 = vld [vmem:[#allocation5_spill] sm:$0xff] }
 0x27d   : > { %v4513_v56 = vsel %vm1752_vm4, %v1741_v37, %v1751_v1  ;;  %v4517_v43 = vsel %vm1752_vm4, %v1751_v1, %v1731_v7  ;;  %v1464_v48 = vadd.f32 %v1448_v53, %v5347_v2  ;;  %v1454_v7 = vsel %vm1447_vm1, %v5338_v4, %v5345_v52  ;;  %v5348_v37 = vld [vmem:[#allocation67_spill] sm:$0xff]  ;;  %v5349_v1 = vld [vmem:[#allocation64_spill] sm:$0xff] }
 0x27e   : > { %5342 = vst [vmem:[#allocation10_spill] sm:$0xff] %v4513_v56  ;;  %5343 = vst [vmem:[#allocation9_spill] sm:$0xff] %v4517_v43  ;;  %v1804_v6 = vpop.permute.xlu1 %1803  ;;  %2047 = vrot.lane.b32.xlu0 %v5346_v47, %s3127_s20  ;;  %v1581_v24 = vsel %vm1569_vm2, %v5349_v1, %v5348_v37  ;;  %v1463_v43 = vadd.f32 %v1453_v29, %v5350_v5  ;;  %v5351_v47 = vld [vmem:[#allocation6_spill] sm:$0xff]  ;;  %v1587_v53 = vadd.f32 %v1580_v38, %v1465_v23  ;;  %v5352_v4 = vld [vmem:[#allocation8_spill] sm:$0xff] }
 0x27f   : > { %v1468_v9 = vadd.f32 %v1459_v30, %v5351_v47  ;;  %v1467_v52 = vadd.f32 %v1449_v49, %v5352_v4  ;;  %v5353_v56 = vld [vmem:[#allocation70_spill] sm:$0xff]  ;;  %v1703_v30 = vsel %vm1691_vm3, %v4229_v17, %v4237_v15  ;;  %v5355_v5 = vld [vmem:[#allocation71_spill] sm:$0xff] }
 0x280   : > { %v1806_v2 = vpop.permute.xlu0 %1805  ;;  %2049 = vrot.lane.b32.xlu1 %v4107_v63, %s3127_s20  ;;  %v1570_v57 = vsel %vm1569_vm2, %v5353_v56, %v5341_v42  ;;  %v1575_v29 = vsel %vm1569_vm2, %v5340_v18, %v5353_v56  ;;  %v5354_v63 = vld [vmem:[#allocation7_spill] sm:$0xff]  ;;  %v1576_v49 = vsel %vm1569_vm2, %v5348_v37, %v5355_v5  ;;  %v1709_v47 = vadd.f32 %v1702_v11, %v1587_v53  ;;  %v5356_v4 = vld [vmem:[#allocation78_spill] sm:$0xff] }
 0x281   : > { %v1466_v38 = vadd.f32 %v1454_v7, %v5354_v63  ;;  %v1590_v23 = vadd.f32 %v1581_v24, %v1468_v9  ;;  %v1571_v18 = vsel %vm1569_vm2, %v5355_v5, %v5349_v1  ;;  %v1692_v9 = vsel %vm1691_vm3, %v4243_v50, %v4225_v25  ;;  %v5357_v1 = vld [vmem:[#allocation80_spill] sm:$0xff] }
 0x282   : > { %v1784_v42 = vpop.permute.xlu1 %1783  ;;  %2027 = vrot.lane.b32.xlu0 %v5356_v4, %s3127_s20  ;;  %v1697_v56 = vsel %vm1691_vm3, %v4233_v32, %v4243_v50  ;;  %v1585_v37 = vadd.f32 %v1575_v29, %v1463_v43  ;;  %v1586_v24 = vadd.f32 %v1570_v57, %v1464_v48  ;;  %v1693_v25 = vsel %vm1691_vm3, %v4248_v14, %v4229_v17  ;;  %v5359_v4 = vld [vmem:[#allocation81_spill] sm:$0xff] }
 0x283   : > { %v1824_v7 = vsel %vm1813_vm5, %v1804_v6, %v1784_v42  ;;  %v1712_v11 = vadd.f32 %v1703_v30, %v1590_v23  ;;  %v1588_v5 = vadd.f32 %v1576_v49, %v1466_v38  ;;  %v1698_v32 = vsel %vm1691_vm3, %v4237_v15, %v4248_v14  ;;  %v5358_v38 = vld [vmem:[#allocation79_spill] sm:$0xff] }
 0x284   : > { %v4578_v53 = vadd.f32 %v1824_v7, %v1709_v47  ;;  %v1786_v63 = vpop.permute.xlu0 %1785  ;;  %2029 = vrot.lane.b32.xlu1 %v5357_v1, %s3127_s20  ;;  %v1589_v50 = vadd.f32 %v1571_v18, %v1467_v52  ;;  %v1707_v57 = vadd.f32 %v1697_v56, %v1585_v37  ;;  %v1708_v43 = vadd.f32 %v1692_v9, %v1586_v24  ;;  %v5360_v37 = vld [vmem:[#allocation83_spill] sm:$0xff]  ;;  %v5361_v1 = vld [vmem:[#allocation84_spill] sm:$0xff] }
 0x285   : > { %v1825_v48 = vsel %vm1813_vm5, %v1806_v2, %v1786_v63  ;;  %v1710_v49 = vadd.f32 %v1698_v32, %v1588_v5  ;;  %v5362_v32 = vld [vmem:[#allocation86_spill] sm:$0xff] }
 0x286   : > { %v4592_v29 = vadd.f32 %v1825_v48, %v1712_v11  ;;  %v1794_v30 = vpop.permute.xlu1 %1793  ;;  %2037 = vrot.lane.b32.xlu0 %v5358_v38, %s3127_s20  ;;  %v1711_v15 = vadd.f32 %v1693_v25, %v1589_v50 }
 0x287   : > { %v1814_v17 = vsel %vm1813_vm5, %v1794_v30, %v1804_v6  ;;  %v1819_v23 = vsel %vm1813_vm5, %v1784_v42, %v1794_v30 }
 0x288   : > { %v4600_v14 = vadd.f32 %v1819_v23, %v1707_v57  ;;  %v4602_v47 = vadd.f32 %v1814_v17, %v1708_v43  ;;  %v1796_v52 = vpop.permute.xlu0 %1795  ;;  %2039 = vrot.lane.b32.xlu1 %v5359_v4, %s3127_s20  ;;  %v5364_v57 = vld [vmem:[#allocation85_spill] sm:$0xff]  ;;  %v5365_v17 = vld [vmem:[#allocation76_spill] sm:$0xff]  ;;  %v5366_v23 = vld [vmem:[#allocation46_spill] sm:$0xff] }
 0x289   : > { %v1815_v18 = vsel %vm1813_vm5, %v1796_v52, %v1806_v2  ;;  %v1820_v9 = vsel %vm1813_vm5, %v1786_v63, %v1796_v52  ;;  %v5368_v52 = vld [vmem:[#allocation21_spill] sm:$0xff]  ;;  %v5369_v4 = vld [vmem:[#allocation22_spill] sm:$0xff] }
 0x28a   : > { %v4610_v6 = vadd.f32 %v1820_v9, %v1710_v49  ;;  %v4612_v56 = vadd.f32 %v1815_v18, %v1711_v15  ;;  %v1810_v42 = vpop.permute.xlu1 %1809  ;;  %2053 = vrot.lane.b32.xlu0 %v4135_v8, %s3127_s20  ;;  %v5367_v49 = vld [vmem:[#allocation44_spill] sm:$0xff]  ;;  %v1402_v18 = vsel %vm1401_vm7, %v5369_v4, %v5368_v52 }
 0x28b   : > { %v1519_v15 = vsel %vm1508_vm6, %v5367_v49, %v5366_v23 }
 0x28c   : > { %v1808_v7 = vpop.permute.xlu0 %1807  ;;  %2051 = vrot.lane.b32.xlu1 %v5360_v37, %s3127_s20  ;;  %v5372_v37 = vld [vmem:[#allocation23_spill] sm:$0xff] }
 0x28e   : > { %v1790_v24 = vpop.permute.xlu1 %1789  ;;  %2033 = vrot.lane.b32.xlu0 %v4149_v0, %s3127_s20 }
 0x28f   : > { %v1827_v2 = vsel %vm1813_vm5, %v1810_v42, %v1790_v24 }
 0x290   : > { %v4623_v11 = vadd.f32 %v1827_v2, %v4316_v3  ;;  %v1788_v63 = vpop.permute.xlu0 %1787  ;;  %2031 = vrot.lane.b32.xlu1 %v5361_v1, %s3127_s20  ;;  %v1412_v2 = vsel %vm1401_vm7, %v5368_v52, %v5372_v37  ;;  %v5374_v1 = vld [vmem:[#allocation24_spill] sm:$0xff]  ;;  %v5380_v52 = vld [vmem:[#allocation91_spill] sm:$0xff] }
 0x291   : > { %v1826_v8 = vsel %vm1813_vm5, %v1808_v7, %v1788_v63 }
 0x292   : > { %v4630_v5 = vadd.f32 %v1826_v8, %v4332_v51  ;;  %v1800_v25 = vpop.permute.xlu1 %1799  ;;  %2043 = vrot.lane.b32.xlu0 %v5362_v32, %s3127_s20  ;;  %v5376_v32 = vld [vmem:[#allocation82_spill] sm:$0xff] }
 0x293   : > { %v1817_v0 = vsel %vm1813_vm5, %v1800_v25, %v1810_v42  ;;  %v1822_v3 = vsel %vm1813_vm5, %v1790_v24, %v1800_v25  ;;  %v1407_v24 = vsel %vm1401_vm7, %v5372_v37, %v5369_v4  ;;  %v5375_v25 = vld [vmem:[#allocation87_spill] sm:$0xff] }
 0x294   : > { %v4640_v48 = vadd.f32 %v1822_v3, %v4340_v10  ;;  %v4643_v50 = vadd.f32 %v1817_v0, %v4342_v39  ;;  %v1798_v51 = vpop.permute.xlu0 %1797  ;;  %2041 = vrot.lane.b32.xlu1 %v5364_v57, %s3127_s20  ;;  %v1641_v0 = vsel %vm1630_vm8, %v5376_v32, %v5375_v25  ;;  %v5377_v3 = vld [vmem:[#allocation27_spill] sm:$0xff] }
 0x295   : > { %v1816_v43 = vsel %vm1813_vm5, %v1798_v51, %v1808_v7  ;;  %v1821_v30 = vsel %vm1813_vm5, %v1788_v63, %v1798_v51  ;;  %v5371_v7 = vld [vmem:[#allocation72_spill] sm:$0xff]  ;;  %v5373_v63 = vld [vmem:[#allocation25_spill] sm:$0xff]  ;;  %v1403_v51 = vsel %vm1401_vm7, %v5377_v3, %v5374_v1  ;;  %v5382_v37 = vld [vmem:[#allocation47_spill] sm:$0xff] }
 0x296   : > { %5363 = vst [vmem:[#allocation43_spill] sm:$0xff] %v4643_v50  ;;  %v4654_v10 = vadd.f32 %v1821_v30, %v4354_v33  ;;  %v4657_v39 = vadd.f32 %v1816_v43, %v4356_v22  ;;  %v1865_v38 = vpop.permute.xlu1 %1864  ;;  %1984 = vrot.lane.b32.xlu0 %v5365_v17, %s3126_s9  ;;  %v5370_v33 = vld [vmem:[#allocation48_spill] sm:$0xff]  ;;  %v1413_v8 = vsel %vm1401_vm7, %v5374_v1, %v5373_v63  ;;  %v5379_v30 = vld [vmem:[#allocation26_spill] sm:$0xff] }
 0x297   : > { %v1509_v22 = vsel %vm1508_vm6, %v5370_v33, %v5367_v49  ;;  %v1514_v9 = vsel %vm1508_vm6, %v5366_v23, %v5370_v33  ;;  %v1408_v57 = vsel %vm1401_vm7, %v5373_v63, %v5377_v3  ;;  %v5378_v43 = vld [vmem:[#allocation28_spill] sm:$0xff]  ;;  %v1526_v23 = vadd.f32 %v1519_v15, %v1412_v2  ;;  %v5383_v3 = vld [vmem:[#allocation51_spill] sm:$0xff] }
 0x298   : > { %v1812_v42 = vpop.permute.xlu0 %1811  ;;  %1994 = vrot.lane.b32.xlu1 %v5371_v7, %s3126_s9  ;;  %v4707_v17 = vsel %vm1401_vm7, %v5379_v30, %v5378_v43  ;;  %v1524_v4 = vadd.f32 %v1514_v9, %v1407_v24  ;;  %v1525_v33 = vadd.f32 %v1509_v22, %v1402_v18  ;;  %v5381_v7 = vld [vmem:[#allocation49_spill] sm:$0xff]  ;;  %v1510_v50 = vsel %vm1508_vm6, %v5383_v3, %v5382_v37  ;;  %v5384_v18 = vld [vmem:[#allocation88_spill] sm:$0xff] }
 0x299   : > { %v1520_v1 = vsel %vm1508_vm6, %v5382_v37, %v5381_v7  ;;  %v1648_v15 = vadd.f32 %v1641_v0, %v1526_v23  ;;  %v1631_v22 = vsel %vm1630_vm8, %v4170_v60, %v5376_v32  ;;  %v1636_v9 = vsel %vm1630_vm8, %v5375_v25, %v4170_v60  ;;  %v5387_v25 = vld [vmem:[#allocation75_spill] sm:$0xff] }
 0x29a   : > { %v1802_v49 = vpop.permute.xlu1 %1801  ;;  %2045 = vrot.lane.b32.xlu0 %v5380_v52, %s3127_s20  ;;  %v1515_v0 = vsel %vm1508_vm6, %v5381_v7, %v5383_v3  ;;  %v5389_v7 = vld [vmem:[#allocation89_spill] sm:$0xff]  ;;  %v1647_v3 = vadd.f32 %v1631_v22, %v1525_v33  ;;  %v5391_v33 = vld [vmem:[#allocation52_spill] sm:$0xff]  ;;  %v5392_v22 = vld [vmem:[#allocation50_spill] sm:$0xff] }
 0x29b   : > { %v1818_v63 = vsel %vm1813_vm5, %v1802_v49, %v1812_v42  ;;  %v1770_v23 = vadd.f32 %v4406_v27, %v1648_v15  ;;  %v1646_v27 = vadd.f32 %v1636_v9, %v1524_v4  ;;  %v1642_v15 = vsel %vm1630_vm8, %v5389_v7, %v4177_v34 }
 0x29c   : > { %v4722_v2 = vadd.f32 %v1818_v63, %v4389_v40  ;;  %v1792_v52 = vpop.permute.xlu0 %1791  ;;  %2055 = vrot.lane.b32.xlu1 %v5384_v18, %s3127_s20  ;;  %v1528_v63 = vadd.f32 %v1510_v50, %v1403_v51  ;;  %v5390_v50 = vld [vmem:[#allocation90_spill] sm:$0xff]  ;;  %v1529_v18 = vadd.f32 %v1520_v1, %v1413_v8  ;;  %v1637_v4 = vsel %vm1630_vm8, %v4177_v34, %v4188_v31 }
 0x29d   : > { %v1823_v40 = vsel %vm1813_vm5, %v1792_v52, %v1802_v49  ;;  %v1828_v24 = vsel %vm1813_vm5, %v1812_v42, %v1792_v52  ;;  %v5388_v49 = vld [vmem:[#allocation29_spill] sm:$0xff]  ;;  %v1522_v9 = vsel %vm1508_vm6, %v5392_v22, %v5391_v33 }
 0x29e   : > { %v4745_v32 = vadd.f32 %v1823_v40, %v4398_v41  ;;  %v4748_v37 = vadd.f32 %v1828_v24, %v4400_v36  ;;  %v1845_v60 = vpop.permute.xlu1 %1844  ;;  %1974 = vrot.lane.b32.xlu0 %v5387_v25, %s3126_s9  ;;  %v4756_v42 = vsel %vm1401_vm7, %v5378_v43, %v5388_v49  ;;  %v1632_v41 = vsel %vm1630_vm8, %v4188_v31, %v5389_v7 }
 0x29f   : > { %v1885_v36 = vsel %vm1874_vm9, %v1865_v38, %v1845_v60  ;;  %v1414_v51 = vsel %vm1401_vm7, %v5388_v49, %v5379_v30  ;;  %v1527_v40 = vadd.f32 %v1515_v0, %v1408_v57  ;;  %v1650_v24 = vadd.f32 %v1632_v41, %v1528_v63  ;;  %v5394_v30 = vld [vmem:[#allocation30_spill] sm:$0xff]  ;;  %v5395_v63 = vld [vmem:[#allocation31_spill] sm:$0xff] }
 0x2a0   : > { %5385 = vst [vmem:[#allocation45_spill] sm:$0xff] %v4745_v32  ;;  %5386 = vst [vmem:[#allocation42_spill] sm:$0xff] %v4748_v37  ;;  %v4768_v52 = vadd.f32 %v1885_v36, %v1770_v23  ;;  %v1867_v43 = vpop.permute.xlu0 %1866  ;;  %2035 = vrot.lane.b32.xlu1 %v5390_v50, %s3127_s20  ;;  %v1768_v23 = vadd.f32 %v4418_v62, %v1646_v27  ;;  %v1769_v25 = vadd.f32 %v4414_v13, %v1647_v3  ;;  %v5393_v36 = vld [vmem:[#allocation32_spill] sm:$0xff] }
 0x2a1   : > { %v1415_v8 = vsel %vm1401_vm7, %v5394_v30, %v5393_v36  ;;  %v1651_v57 = vadd.f32 %v1642_v15, %v1529_v18  ;;  %v1649_v1 = vadd.f32 %v1637_v4, %v1527_v40  ;;  %v1772_v0 = vadd.f32 %v4435_v12, %v1650_v24  ;;  %v5396_v12 = vld [vmem:[#allocation54_spill] sm:$0xff]  ;;  %v5397_v4 = vld [vmem:[#allocation56_spill] sm:$0xff]  ;;  %v5398_v24 = vld [vmem:[#allocation53_spill] sm:$0xff] }
 0x2a2   : > { %v1855_v7 = vpop.permute.xlu1 %1854  ;;  %v1405_v41 = vsel %vm1401_vm7, %v5395_v63, %v5394_v30  ;;  %v1535_v27 = vadd.f32 %v1522_v9, %v1415_v8  ;;  %v1517_v3 = vsel %vm1508_vm6, %v5391_v33, %v5396_v12  ;;  %v1521_v9 = vsel %vm1508_vm6, %v5398_v24, %v5397_v4 }
 0x2a3   : > { %v1875_v34 = vsel %vm1874_vm9, %v1855_v7, %v1865_v38  ;;  %v1880_v31 = vsel %vm1874_vm9, %v1845_v60, %v1855_v7  ;;  %v1410_v38 = vsel %vm1401_vm7, %v5393_v36, %v5395_v63  ;;  %v1773_v15 = vadd.f32 %v4424_v28, %v1651_v57  ;;  %v5400_v57 = vld [vmem:[#allocation33_spill] sm:$0xff] }
 0x2a4   : > { %v4795_v49 = vadd.f32 %v1880_v31, %v1768_v23  ;;  %v4797_v62 = vadd.f32 %v1875_v34, %v1769_v25  ;;  %v1857_v13 = vpop.permute.xlu0 %1856  ;;  %v1771_v50 = vadd.f32 %v4439_v54, %v1649_v1  ;;  %v1644_v23 = vsel %vm1630_vm8, %v4181_v16, %v4193_v26  ;;  %v5399_v25 = vld [vmem:[#allocation60_spill] sm:$0xff]  ;;  %v5401_v34 = vld [vmem:[#allocation34_spill] sm:$0xff]  ;;  %v5402_v31 = vld [vmem:[#allocation35_spill] sm:$0xff] }
 0x2a5   : > { %v1876_v60 = vsel %vm1874_vm9, %v1857_v13, %v1867_v43  ;;  %v1512_v54 = vsel %vm1508_vm6, %v5396_v12, %v5392_v22  ;;  %v1516_v7 = vsel %vm1508_vm6, %v5397_v4, %v5399_v25  ;;  %v1411_v22 = vsel %vm1401_vm7, %v5402_v31, %v5401_v34 }
 0x2a6   : > { %v4815_v18 = vadd.f32 %v1876_v60, %v1772_v0  ;;  %v1847_v40 = vpop.permute.xlu1 %1846  ;;  %v1416_v1 = vsel %vm1401_vm7, %v5400_v57, %v5402_v31  ;;  %v1643_v0 = vsel %vm1630_vm8, %v4197_v58, %v4205_v21  ;;  %v1532_v63 = vadd.f32 %v1521_v9, %v1414_v51 }
 0x2a7   : > { %v1881_v33 = vsel %vm1874_vm9, %v1847_v40, %v1857_v13  ;;  %v1886_v28 = vsel %vm1874_vm9, %v1867_v43, %v1847_v40  ;;  %v1406_v43 = vsel %vm1401_vm7, %v5401_v34, %v5400_v57  ;;  %v1533_v13 = vadd.f32 %v1517_v3, %v1410_v38  ;;  %v5403_v38 = vld [vmem:[#allocation61_spill] sm:$0xff]  ;;  %v5404_v3 = vld [vmem:[#allocation58_spill] sm:$0xff] }
 0x2a8   : > { %v4837_v36 = vadd.f32 %v1881_v33, %v1771_v50  ;;  %v4839_v30 = vadd.f32 %v1886_v28, %v1773_v15  ;;  %v1871_v8 = vpop.permute.xlu0 %1870  ;;  %v1511_v60 = vsel %vm1508_vm6, %v5399_v25, %v5398_v24  ;;  %v1657_v12 = vadd.f32 %v1644_v23, %v1535_v27  ;;  %v5405_v23 = vld [vmem:[#allocation62_spill] sm:$0xff] }
 0x2a9   : > { %v1534_v50 = vadd.f32 %v1512_v54, %v1405_v41  ;;  %v1530_v40 = vadd.f32 %v1516_v7, %v4707_v17  ;;  %v1634_v4 = vsel %vm1630_vm8, %v4201_v44, %v4181_v16  ;;  %v1639_v51 = vsel %vm1630_vm8, %v4193_v26, %v4201_v44 }
 0x2aa   : > { %v1869_v15 = vpop.permute.xlu1 %1868  ;;  %v1518_v24 = vsel %vm1508_vm6, %v5404_v3, %v5403_v38  ;;  %v1654_v27 = vadd.f32 %v1643_v0, %v1532_v63  ;;  %v1638_v17 = vsel %vm1630_vm8, %v4205_v21, %v4213_v19  ;;  %v1779_v41 = vadd.f32 %v4448_v55, %v1657_v12 }
 0x2ab   : > { %v1531_v16 = vadd.f32 %v1511_v60, %v4756_v42  ;;  %v1513_v26 = vsel %vm1508_vm6, %v5403_v38, %v5405_v23  ;;  %v1633_v44 = vsel %vm1630_vm8, %v4213_v19, %v4197_v58  ;;  %v1655_v28 = vadd.f32 %v1639_v51, %v1533_v13  ;;  %v5408_v51 = vld [vmem:[#allocation92_spill] sm:$0xff] }
 0x2ac   : > { %v1851_v9 = vpop.permute.xlu0 %1850  ;;  %v1656_v21 = vadd.f32 %v1634_v4, %v1534_v50  ;;  %v1776_v55 = vadd.f32 %v4469_v45, %v1654_v27  ;;  %v1536_v25 = vadd.f32 %v1518_v24, %v1411_v22  ;;  %v1523_v7 = vsel %vm1508_vm6, %v5405_v23, %v5404_v3  ;;  %v5406_v22 = vld [vmem:[#allocation93_spill] sm:$0xff] }
 0x2ad   : > { %v1888_v33 = vsel %vm1874_vm9, %v1871_v8, %v1851_v9  ;;  %v1652_v57 = vadd.f32 %v1638_v17, %v1530_v40  ;;  %v1653_v19 = vadd.f32 %v1633_v44, %v1531_v16  ;;  %v1777_v34 = vadd.f32 %v4463_v59, %v1655_v28  ;;  %v5407_v59 = vld [vmem:[#allocation12_spill] sm:$0xff]  ;;  %v5410_v28 = vld [vmem:[#allocation11_spill] sm:$0xff] }
 0x2ae   : > { %v4891_v54 = vadd.f32 %v1888_v33, %v1779_v41  ;;  %v1849_v42 = vpop.permute.xlu1 %1848  ;;  %v1778_v31 = vadd.f32 %v4459_v35, %v1656_v21  ;;  %v1537_v13 = vadd.f32 %v1513_v26, %v1406_v43  ;;  %v1635_v63 = vsel %vm1630_vm8, %v5406_v22, %v4221_v46  ;;  %v5409_v26 = vld [vmem:[#allocation10_spill] sm:$0xff]  ;;  %v5411_v21 = vld [vmem:[#allocation9_spill] sm:$0xff] }
 0x2af   : > { %v1887_v58 = vsel %vm1874_vm9, %v1869_v15, %v1849_v42  ;;  %v1774_v50 = vadd.f32 %v4481_v61, %v1652_v57  ;;  %v1775_v40 = vadd.f32 %v5407_v59, %v1653_v19  ;;  %v1640_v38 = vsel %vm1630_vm8, %v5408_v51, %v5406_v22 }
 0x2b0   : > { %v4901_v0 = vadd.f32 %v1887_v58, %v1776_v55  ;;  %v1861_v45 = vpop.permute.xlu0 %1860  ;;  %v1538_v24 = vadd.f32 %v1523_v7, %v1416_v1  ;;  %v1659_v27 = vadd.f32 %v1635_v63, %v1537_v13  ;;  %v1658_v16 = vadd.f32 %v1640_v38, %v1536_v25 }
 0x2b1   : > { %v1878_v60 = vsel %vm1874_vm9, %v1861_v45, %v1871_v8  ;;  %v1883_v12 = vsel %vm1874_vm9, %v1851_v9, %v1861_v45  ;;  %v1645_v8 = vsel %vm1630_vm8, %v4221_v46, %v5408_v51 }
 0x2b2   : > { %v4913_v35 = vadd.f32 %v1883_v12, %v1777_v34  ;;  %v4915_v4 = vadd.f32 %v1878_v60, %v1778_v31  ;;  %v1859_v43 = vpop.permute.xlu1 %1858  ;;  %v1660_v23 = vadd.f32 %v1645_v8, %v1538_v24  ;;  %v1781_v44 = vadd.f32 %v5409_v26, %v1659_v27 }
 0x2b3   : > { %v1877_v61 = vsel %vm1874_vm9, %v1859_v43, %v1869_v15  ;;  %v1882_v3 = vsel %vm1874_vm9, %v1849_v42, %v1859_v43  ;;  %v1780_v15 = vadd.f32 %v5410_v28, %v1658_v16 }
 0x2b4   : > { %v4929_v17 = vadd.f32 %v1882_v3, %v1774_v50  ;;  %v4931_v41 = vadd.f32 %v1877_v61, %v1775_v40  ;;  %v1873_v9 = vpop.permute.xlu0 %1872  ;;  %v1782_v55 = vadd.f32 %v5411_v21, %v1660_v23 }
 0x2b6   : > { %v1863_v33 = vpop.permute.xlu1 %1862 }
 0x2b7   : > { %v1879_v46 = vsel %vm1874_vm9, %v1863_v33, %v1873_v9 }
 0x2b8   : > { %v4938_v42 = vadd.f32 %v1879_v46, %v1781_v44  ;;  %v1853_v1 = vpop.permute.xlu0 %1852 }
 0x2b9   : > { %v1884_v7 = vsel %vm1874_vm9, %v1853_v1, %v1863_v33  ;;  %v1889_v25 = vsel %vm1874_vm9, %v1873_v9, %v1853_v1 }
 0x2ba   : > { %v4944_v57 = vadd.f32 %v1884_v7, %v1780_v15  ;;  %v4946_v58 = vadd.f32 %v1889_v25, %v1782_v55  ;;  %v1926_v19 = vpop.permute.xlu1 %1925 }
 0x2bc   : > { %5412 = vst [vmem:[#allocation15_spill] sm:$0xff] %v4944_v57  ;;  %5413 = vst [vmem:[#allocation55_spill] sm:$0xff] %v4946_v58  ;;  %v1906_v34 = vpop.permute.xlu0 %1905 }
 0x2bd   : > { %v1946_v28 = vsel %vm1935_vm10, %v1926_v19, %v1906_v34 }
 0x2be   : > { %v1916_v31 = vpop.permute.xlu1 %1915  ;;  %v1953_v58 = vadd.f32 %v1946_v28, %v4578_v53 }
 0x2bf   : > { %v1941_v15 = vsel %vm1935_vm10, %v1906_v34, %v1916_v31  ;;  %v1936_v21 = vsel %vm1935_vm10, %v1916_v31, %v1926_v19 }
 0x2c0   : > { %v1928_v45 = vpop.permute.xlu0 %1927  ;;  %v1951_v34 = vadd.f32 %v1941_v15, %v4600_v14  ;;  %v1952_v32 = vadd.f32 %v1936_v21, %v4602_v47 }
 0x2c2   : > { %v1908_v13 = vpop.permute.xlu1 %1907 }
 0x2c3   : > { %v1947_v55 = vsel %vm1935_vm10, %v1928_v45, %v1908_v13 }
 0x2c4   : > { %v1918_v22 = vpop.permute.xlu0 %1917 }
 0x2c5   : > { %v1937_v7 = vsel %vm1935_vm10, %v1918_v22, %v1928_v45  ;;  %v1942_v25 = vsel %vm1935_vm10, %v1908_v13, %v1918_v22  ;;  %v1956_v45 = vadd.f32 %v1947_v55, %v4592_v29 }
 0x2c6   : > { %v1930_v63 = vpop.permute.xlu1 %1929  ;;  %v1954_v14 = vadd.f32 %v1942_v25, %v4610_v6  ;;  %v1955_v22 = vadd.f32 %v1937_v7, %v4612_v56 }
 0x2c8   : > { %v1932_v60 = vpop.permute.xlu0 %1931 }
 0x2ca   : > { %v1910_v12 = vpop.permute.xlu1 %1909 }
 0x2cb   : > { %v1948_v19 = vsel %vm1935_vm10, %v1930_v63, %v1910_v12 }
 0x2cc   : > { %v4948_v50 = vpop.permute.xlu0 %1911  ;;  %v5005_v47 = vadd.f32 %v1948_v19, %v4630_v5  ;;  %v5414_v19 = vld [vmem:[#allocation16_spill] sm:$0xff] }
 0x2cd   : > { %v1949_v31 = vsel %vm1935_vm10, %v1932_v60, %v4948_v50 }
 0x2ce   : > { %v1920_v59 = vpop.permute.xlu1 %1919  ;;  %v1962_v29 = vadd.f32 %v1949_v31, %v4623_v11 }
 0x2cf   : > { %v1943_v13 = vsel %vm1935_vm10, %v1910_v12, %v1920_v59  ;;  %v1938_v28 = vsel %vm1935_vm10, %v1920_v59, %v1930_v63 }
 0x2d0   : > { %v4950_v40 = vpop.permute.xlu0 %1921  ;;  %v5013_v56 = vadd.f32 %v1943_v13, %v4654_v10  ;;  %v5019_v5 = vadd.f32 %v1938_v28, %v4657_v39 }
 0x2d1   : > { %v1939_v11 = vsel %vm1935_vm10, %v4950_v40, %v1932_v60 }
 0x2d2   : > { %v4952_v43 = vpop.permute.xlu1 %1913 }
 0x2d4   : > { %v4954_v51 = vpop.permute.xlu0 %1933 }
 0x2d6   : > { %v4956_v38 = vpop.permute.xlu1 %1923 }
 0x2d8   : > { %v1987_v8 = vpop.permute.xlu0 %1986 }
 0x2da   : > { %v1989_v61 = vpop.permute.xlu1 %1988 }
 0x2dc   : > { %v1967_v3 = vpop.permute.xlu0 %1966 }
 0x2dd   : > { %v2007_v53 = vsel %vm1996_vm11, %v1987_v8, %v1967_v3 }
 0x2de   : > { %v1969_v24 = vpop.permute.xlu1 %1968  ;;  %v2014_v63 = vadd.f32 %v2007_v53, %v4768_v52 }
 0x2df   : > { %v2008_v15 = vsel %vm1996_vm11, %v1989_v61, %v1969_v24 }
 0x2e0   : > { %v1977_v27 = vpop.permute.xlu0 %1976 }
 0x2e1   : > { %v2002_v12 = vsel %vm1996_vm11, %v1967_v3, %v1977_v27  ;;  %v1997_v59 = vsel %vm1996_vm11, %v1977_v27, %v1987_v8  ;;  %v2017_v3 = vadd.f32 %v2008_v15, %v4839_v30 }
 0x2e2   : > { %v1979_v9 = vpop.permute.xlu1 %1978  ;;  %v2012_v7 = vadd.f32 %v2002_v12, %v4795_v49  ;;  %v2013_v39 = vadd.f32 %v1997_v59, %v4797_v62  ;;  %v1944_v62 = vsel %vm1935_vm10, %v4948_v50, %v4950_v40 }
 0x2e3   : > { %v2003_v52 = vsel %vm1996_vm11, %v1969_v24, %v1979_v9  ;;  %v1998_v25 = vsel %vm1996_vm11, %v1979_v9, %v1989_v61  ;;  %v1960_v12 = vadd.f32 %v1944_v62, %v4640_v48 }
 0x2e4   : > { %v4958_v16 = vpop.permute.xlu0 %1992 }
 0x2e6   : > { %v4960_v23 = vpop.permute.xlu1 %1990 }
 0x2e8   : > { %v4962_v26 = vpop.permute.xlu0 %1972 }
 0x2e9   : > { %v2010_v50 = vsel %vm1996_vm11, %v4958_v16, %v4962_v26 }
 0x2ea   : > { %v4964_v44 = vpop.permute.xlu1 %1970 }
 0x2ec   : > { %v4967_v33 = vpop.permute.xlu0 %1982 }
 0x2ee   : > { %v4969_v46 = vpop.permute.xlu1 %1980 }
 0x2f0   : > { %v2048_v1 = vpop.permute.xlu0 %2047 }
 0x2f2   : > { %v2050_v57 = vpop.permute.xlu1 %2049 }
 0x2f4   : > { %v2028_v37 = vpop.permute.xlu0 %2027 }
 0x2f5   : > { %v2068_v6 = vsel %vm2057_vm12, %v2048_v1, %v2028_v37 }
 0x2f6   : > { %v2075_v21 = vadd.f32 %v2068_v6, %v1953_v58  ;;  %v2030_v55 = vpop.permute.xlu1 %2029 }
 0x2f7   : > { %v2069_v10 = vsel %vm2057_vm12, %v2050_v57, %v2030_v55 }
 0x2f8   : > { %v2090_v8 = vadd.f32 %v2075_v21, %v2014_v63  ;;  %v2078_v58 = vadd.f32 %v2069_v10, %v1956_v45  ;;  %v2038_v27 = vpop.permute.xlu0 %2037  ;;  %v2015_v45 = vadd.f32 %v2003_v52, %v4837_v36  ;;  %v2009_v36 = vsel %vm1996_vm11, %v4960_v23, %v4964_v44 }
 0x2f9   : > { %v2058_v60 = vsel %vm2057_vm12, %v2038_v27, %v2048_v1  ;;  %v2063_v30 = vsel %vm2057_vm12, %v2028_v37, %v2038_v27  ;;  %v2016_v37 = vadd.f32 %v1998_v25, %v4815_v18  ;;  %v5415_v1 = vld [vmem:[#allocation18_spill] sm:$0xff]  ;;  %v2005_v21 = vsel %vm1996_vm11, %v4962_v26, %v4967_v33 }
 0x2fa   : > { %v2135_v31 = vadd.f32 %v5414_v19, %v2090_v8  ;;  %v2093_v49 = vadd.f32 %v2078_v58, %v2017_v3  ;;  %v2073_v13 = vadd.f32 %v2063_v30, %v1951_v34  ;;  %v2074_v53 = vadd.f32 %v2058_v60, %v1952_v32  ;;  %v2040_v24 = vpop.permute.xlu1 %2039 }
 0x2fb   : > { %v2059_v61 = vsel %vm2057_vm12, %v2040_v24, %v2050_v57  ;;  %v2064_v9 = vsel %vm2057_vm12, %v2030_v55, %v2040_v24  ;;  %v2020_v48 = vadd.f32 %v2009_v36, %v4901_v0  ;;  %v2000_v58 = vsel %vm1996_vm11, %v4967_v33, %v4958_v16 }
 0x2fc   : > { %v2138_v28 = vadd.f32 %v5415_v1, %v2093_v49  ;;  %v2088_v34 = vadd.f32 %v2073_v13, %v2012_v7  ;;  %v2089_v32 = vadd.f32 %v2074_v53, %v2013_v39  ;;  %v2054_v15 = vpop.permute.xlu0 %2053  ;;  %v2076_v57 = vadd.f32 %v2064_v9, %v1954_v14  ;;  %v5416_v7 = vld [vmem:[#allocation43_spill] sm:$0xff] }
 0x2fd   : > { %v2077_v40 = vadd.f32 %v2059_v61, %v1955_v22  ;;  %v2150_v18 = vmul.f32 %v2135_v31, %v2135_v31  ;;  %v1961_v52 = vadd.f32 %v1939_v11, %v5416_v7  ;;  %v2023_v14 = vadd.f32 %v2010_v50, %v4891_v54 }
 0x2fe   : > { %v2153_v6 = vmul.f32 %v2138_v28, %v2138_v28  ;;  %v2133_v63 = vadd.f32 %v5414_v19, %v2088_v34  ;;  %v2052_v59 = vpop.permute.xlu1 %2051  ;;  %v2091_v55 = vadd.f32 %v2076_v57, %v2015_v45  ;;  %v2134_v10 = vadd.f32 %v5414_v19, %v2089_v32  ;;  %v5418_v28 = vld [vmem:[#allocation20_spill] sm:$0xff]  ;;  %v5419_v57 = vld [vmem:[#allocation17_spill] sm:$0xff] }
 0x2ff   : > { %v2092_v3 = vadd.f32 %v2077_v40, %v2016_v37  ;;  %v2021_v11 = vadd.f32 %v2005_v21, %v4913_v35  ;;  %v2004_v54 = vsel %vm1996_vm11, %v4964_v44, %v4969_v46  ;;  %v5417_v31 = vmov 0.0  }
 0x300   : > { %v2165_v22 = vpack.c.bf16 %v2153_v6, %v2150_v18  ;;  %v2034_v8 = vpop.permute.xlu0 %2033  ;;  %v2136_v27 = vadd.f32 %v5415_v1, %v2091_v55  ;;  %v2148_v0 = vmul.f32 %v2133_v63, %v2133_v63  ;;  %v2149_v33 = vmul.f32 %v2134_v10, %v2134_v10 }
 0x301   : > { %v2071_v26 = vsel %vm2057_vm12, %v2054_v15, %v2034_v8  ;;  %v2137_v39 = vadd.f32 %v5415_v1, %v2092_v3  ;;  %v2022_v35 = vadd.f32 %v2000_v58, %v4915_v4  ;;  %v1999_v44 = vsel %vm1996_vm11, %v4969_v46, %v4960_v23 }
 0x302   : > { %v2084_v25 = vadd.f32 %v2071_v26, %v1962_v29  ;;  %2935 = vmatmul.mubr.bf16.vlgmr.msra.gmra.mrb[132].mxu1 %v2165_v22  ;;  %v2032_v60 = vpop.permute.xlu1 %2031  ;;  %v2151_v30 = vmul.f32 %v2136_v27, %v2136_v27  ;;  %v2018_v61 = vadd.f32 %v2004_v54, %v4929_v17  ;;  %v2019_v23 = vadd.f32 %v1999_v44, %v4931_v41 }
 0x303   : > { %v2070_v16 = vsel %vm2057_vm12, %v2052_v59, %v2032_v60  ;;  %v2152_v19 = vmul.f32 %v2137_v39, %v2137_v39  ;;  %2938 = vmatprep.mubr.msk.bf16.mxu1 %vm3114_vm0, %v5417_v31  ;;  %v1940_v41 = vsel %vm1935_vm10, %v4956_v38, %v4954_v51  ;;  %v1950_v27 = vsel %vm1935_vm10, %v4954_v51, %v4952_v43 }
 0x304   : > { %v2099_v49 = vadd.f32 %v2084_v25, %v2023_v14  ;;  %v2081_v29 = vadd.f32 %v2070_v16, %v5005_v47  ;;  %v2044_v13 = vpop.permute.xlu0 %2043  ;;  %v2163_v53 = vpack.c.bf16 %v2151_v30, %v2148_v0  ;;  %v1964_v10 = vadd.f32 %v1940_v41, %v4722_v2  ;;  %v5421_v30 = vld [vmem:[#allocation45_spill] sm:$0xff] }
 0x305   : > { %v2061_v24 = vsel %vm2057_vm12, %v2044_v13, %v2054_v15  ;;  %v2066_v62 = vsel %vm2057_vm12, %v2034_v8, %v2044_v13  ;;  %v2164_v45 = vpack.c.bf16 %v2152_v19, %v2149_v33  ;;  %v1945_v26 = vsel %vm1935_vm10, %v4952_v43, %v4956_v38  ;;  %v5420_v43 = vld [vmem:[#allocation42_spill] sm:$0xff]  ;;  %v5422_v19 = vld [vmem:[#allocation15_spill] sm:$0xff] }
 0x306   : > { %v2096_v4 = vadd.f32 %v2081_v29, %v2020_v48  ;;  %v2082_v9 = vadd.f32 %v2066_v62, %v1960_v12  ;;  %v2083_v37 = vadd.f32 %v2061_v24, %v1961_v52  ;;  %v2042_v1 = vpop.permute.xlu1 %2041  ;;  %v2144_v34 = vadd.f32 %v5418_v28, %v2099_v49  ;;  %v5423_v49 = vld [vmem:[#allocation55_spill] sm:$0xff] }
 0x307   : > { %2396 = vmatprep.mubr.bf16.mxu0 %v2164_v45  ;;  %v2060_v46 = vsel %vm2057_vm12, %v2042_v1, %v2052_v59  ;;  %v2065_v47 = vsel %vm2057_vm12, %v2032_v60, %v2042_v1  ;;  %v1965_v38 = vadd.f32 %v1950_v27, %v5420_v43  ;;  %v1963_v16 = vadd.f32 %v1945_v26, %v5421_v30  ;;  %v5424_v24 = vld [vmem:[#allocation19_spill] sm:$0xff] }
 0x308   : > { %v2097_v32 = vadd.f32 %v2082_v9, %v2021_v11  ;;  %v2098_v15 = vadd.f32 %v2083_v37, %v2022_v35  ;;  %v2079_v50 = vadd.f32 %v2065_v47, %v5013_v56  ;;  %v2080_v17 = vadd.f32 %v2060_v46, %v5019_v5  ;;  %2397 = vmatmul.mubr.bf16.vlgmr.msra.gmra.mrb[132].mxu0 %v2163_v53  ;;  %v1985_v36 = vpop.permute.xlu0 %1984 }
 0x309   : > { %v2141_v40 = vadd.f32 %v5419_v57, %v2096_v4  ;;  %v2159_v56 = vmul.f32 %v2144_v34, %v2144_v34 }
 0x30a   : > { %v2094_v12 = vadd.f32 %v2079_v50, %v2018_v61  ;;  %v2095_v18 = vadd.f32 %v2080_v17, %v2019_v23  ;;  %v1995_v6 = vpop.permute.xlu1 %1994  ;;  %v2143_v63 = vadd.f32 %v5418_v28, %v2098_v15  ;;  %v2142_v59 = vadd.f32 %v5418_v28, %v2097_v32 }
 0x30b   : > { %v2156_v21 = vmul.f32 %v2141_v40, %v2141_v40  ;;  %v2001_v7 = vsel %vm1996_vm11, %v1985_v36, %v1995_v6 }
 0x30c   : > { %v2046_v55 = vpop.permute.xlu0 %2045  ;;  %v2140_v5 = vadd.f32 %v5419_v57, %v2095_v18  ;;  %v2139_v3 = vadd.f32 %v5419_v57, %v2094_v12  ;;  %v2158_v22 = vmul.f32 %v2143_v63, %v2143_v63  ;;  %v2157_v58 = vmul.f32 %v2142_v59, %v2142_v59 }
 0x30d   : > { %v2168_v52 = vpack.c.bf16 %v2159_v56, %v2156_v21  ;;  %v2025_v39 = vadd.f32 %v2001_v7, %v4938_v42 }
 0x30e   : > { %v2056_v14 = vpop.permute.xlu1 %2055  ;;  %v2155_v48 = vmul.f32 %v2140_v5, %v2140_v5  ;;  %v2154_v8 = vmul.f32 %v2139_v3, %v2139_v3 }
 0x30f   : > { %v2062_v2 = vsel %vm2057_vm12, %v2046_v55, %v2056_v14  ;;  %2939 = vmatmul.mubr.bf16.gmra.mrb[136].mxu1 %v2168_v52 }
 0x310   : > { %v2086_v11 = vadd.f32 %v2062_v2, %v1964_v10  ;;  %v1975_v54 = vpop.permute.xlu0 %1974  ;;  %v2167_v0 = vpack.c.bf16 %v2158_v22, %v2155_v48  ;;  %v2166_v25 = vpack.c.bf16 %v2157_v58, %v2154_v8  ;;  %2942 = vmatprep.mubr.msk.bf16.mxu1 %vm3114_vm0, %v5417_v31 }
 0x311   : > { %v2006_v51 = vsel %vm1996_vm11, %v1975_v54, %v1985_v36  ;;  %v2011_v60 = vsel %vm1996_vm11, %v1995_v6, %v1975_v54 }
 0x312   : > { %v2101_v33 = vadd.f32 %v2086_v11, %v2025_v39  ;;  %2404 = vmatprep.mubr.bf16.mxu0 %v2167_v0  ;;  %v2036_v42 = vpop.permute.xlu1 %2035  ;;  %v2024_v35 = vadd.f32 %v2006_v51, %v5422_v19  ;;  %v2026_v29 = vadd.f32 %v2011_v60, %v5423_v49 }
 0x313   : > { %v2067_v44 = vsel %vm2057_vm12, %v2036_v42, %v2046_v55  ;;  %v2072_v31 = vsel %vm2057_vm12, %v2056_v14, %v2036_v42  ;;  %2405 = vmatmul.mubr.bf16.gmra.mrb[136].mxu0 %v2166_v25 }
 0x314   : > { %v2085_v13 = vadd.f32 %v2067_v44, %v1963_v16  ;;  %v2087_v53 = vadd.f32 %v2072_v31, %v1965_v38  ;;  %v2146_v62 = vadd.f32 %v5424_v24, %v2101_v33 }
 0x316   : > { %v2100_v45 = vadd.f32 %v2085_v13, %v2024_v35  ;;  %v2102_v61 = vadd.f32 %v2087_v53, %v2026_v29  ;;  %v2161_v4 = vmul.f32 %v2146_v62, %v2146_v62 }
 0x318   : > { %v2170_v9 = vpack.c.bf16 %v2161_v4, %v2161_v4  ;;  %v2145_v37 = vadd.f32 %v5424_v24, %v2100_v45  ;;  %v2147_v1 = vadd.f32 %v5424_v24, %v2102_v61 }
 0x31a   : > { %2412 = vmatprep.mubr.bf16.mxu0 %v2170_v9  ;;  %v2160_v23 = vmul.f32 %v2145_v37, %v2145_v37  ;;  %v2162_v46 = vmul.f32 %v2147_v1, %v2147_v1 }
 0x31c   : > { %v2169_v20 = vpack.c.bf16 %v2160_v23, %v2160_v23  ;;  %v2171_v47 = vpack.c.bf16 %v2162_v46, %v2162_v46 }
 0x31e   : > { %2413 = vmatmul.mubr.bf16.gmra.mrb[140].mxu0 %v2169_v20  ;;  %2943 = vmatmul.mubr.bf16.gmra.mrb[140].mxu1 %v2171_v47 }
 0x3d5   : > { %v2454_v28 = vpop.f32.mrb[132].mxu1 }
 0x3d6   : > { %v2936_v34 = vpop.f32.mrb[133].mxu1 }
 0x3d7   : > { %v2457_v32 = vpop.f32.mrb[134].mxu1 }
 0x3d8   : > { %v2937_v15 = vpop.f32.mrb[135].mxu1 }
 0x3db   : > { %v2741_v50 = vpop.f32.mrb[132].mxu0 }
 0x3dc   : > { %v2742_v17 = vpop.f32.mrb[133].mxu0 }
 0x3dd   : > { %v2743_v36 = vadd.f32 %v2742_v17, %v2741_v50  ;;  %v2744_v41 = vpop.f32.mrb[134].mxu0 }
 0x3de   : > { %v2745_v57 = vpop.f32.mrb[135].mxu0 }
 0x3df   : > { %v2455_v40 = vadd.f32 %v2743_v36, %v2454_v28  ;;  %v2746_v12 = vadd.f32 %v2745_v57, %v2744_v41 }
 0x3e1   : > { %v2476_v18 = vmax.f32 %v2455_v40, 1e-06  ;;  %v2458_v6 = vadd.f32 %v2746_v12, %v2457_v32 }
 0x3e2   : > { %v2462_v63 = vpop.f32.mrb[136].mxu1 }
 0x3e3   : > { %3079 = vlog2.f32 %v2476_v18  ;;  %v2477_v59 = vmax.f32 %v2458_v6, 1e-06  ;;  %v2940_v21 = vpop.f32.mrb[137].mxu1 }
 0x3e4   : > { %v2465_v56 = vpop.f32.mrb[138].mxu1 }
 0x3e5   : > { %3081 = vlog2.f32 %v2477_v59  ;;  %v2941_v55 = vpop.f32.mrb[139].mxu1 }
 0x3e6   : > { %v2747_v5 = vpop.f32.mrb[136].mxu0 }
 0x3e7   : > { %v2748_v3 = vpop.f32.mrb[137].mxu0 }
 0x3e8   : > { %v2749_v10 = vadd.f32 %v2748_v3, %v2747_v5  ;;  %v2750_v7 = vpop.f32.mrb[138].mxu0 }
 0x3e9   : > { %v2751_v52 = vpop.f32.mrb[139].mxu0 }
 0x3ea   : > { %v2463_v14 = vadd.f32 %v2749_v10, %v2462_v63  ;;  %v2752_v48 = vadd.f32 %v2751_v52, %v2750_v7 }
 0x3ec   : > { %v2478_v22 = vmax.f32 %v2463_v14, 1e-06  ;;  %v2466_v8 = vadd.f32 %v2752_v48, %v2465_v56 }
 0x3ed   : > { %v3080_v58 = vpop.eup %3079 }
 0x3ee   : > { %v2482_v27 = vmul.f32 0.6931472, %v3080_v58  ;;  %3083 = vlog2.f32 %v2478_v22  ;;  %v2479_v26 = vmax.f32 %v2466_v8, 1e-06 }
 0x3ef   : > { %v3082_v2 = vpop.eup %3081 }
 0x3f0   : > { %2491 = vst [vmem:[%s289_s25] sm:$0xff] %v2482_v27  ;;  %v2484_v39 = vmul.f32 0.6931472, %v3082_v2  ;;  %3085 = vlog2.f32 %v2479_v26 }
 0x3f1   : > { %v2753_v11 = vpop.f32.mrb[140].mxu0  ;;  %v2470_v54 = vpop.f32.mrb[140].mxu1 }
 0x3f2   : > { %2492 = vst [vmem:[%s289_s25 + $0x8] sm:$0xff] %v2484_v39  ;;  %v2754_v0 = vpop.f32.mrb[141].mxu0  ;;  %v2944_v25 = vpop.f32.mrb[141].mxu1 }
 0x3f3   : > { %v2755_v51 = vadd.f32 %v2754_v0, %v2753_v11  ;;  %v2756_v60 = vpop.f32.mrb[142].mxu0  ;;  %v2473_v43 = vpop.f32.mrb[142].mxu1 }
 0x3f4   : > { %v2757_v38 = vpop.f32.mrb[143].mxu0  ;;  %v2945_v30 = vpop.f32.mrb[143].mxu1 }
 0x3f5   : > { %v2471_v16 = vadd.f32 %v2755_v51, %v2470_v54 }
 0x3f7   : > { %v2480_v33 = vmax.f32 %v2471_v16, 1e-06 }
 0x3f8   : > { %v3084_v42 = vpop.eup %3083 }
 0x3f9   : > { %v2486_v19 = vmul.f32 0.6931472, %v3084_v42  ;;  %3087 = vlog2.f32 %v2480_v33 }
 0x3fa   : > { %v3086_v35 = vpop.eup %3085 }
 0x3fb   : > { %2493 = vst [vmem:[%s289_s25 + $0x10] sm:$0xff] %v2486_v19  ;;  %v2488_v44 = vmul.f32 0.6931472, %v3086_v35 }
 0x3fd   : > { %2494 = vst [vmem:[%s289_s25 + $0x18] sm:$0xff] %v2488_v44 }
 0x403   : > { %v3088_v31 = vpop.eup %3087 }
 0x404   : > { %v2490_v49 = vmul.f32 0.6931472, %v3088_v31 }
 0x406   : > { %2495 = vst [vmem:[%s289_s25 + $0x20] sm:$0xff] %v2490_v49 }
 0x407 PF: > { %p11_p9 = scmp.ge.s32.totalorder %s3170_s19, 4   ;;  %s5425_s15 = smov %s3107_s16 }
 0x408   : > { %s5426_s16 = smov %s3179_s22  ;;  %s5427_s17 = smov %s3170_s19 }
 0x409   :  { %13 = sbr.rel (!%p11_p9) target bundleno = 2 (0x2), region = 103 }

// kernel: eeg_shallow_convnet_forward.3
= control target key start
LH: loop header
LB: loop body
LE: loop exit
PB: predicated region body
PF: predicated region fallthrough
CT: control target
= control target key end

     0   :  { %v263_v27 = vlaneseq  ;;  %v2015_v35 = vmov 1966171168   ;;  %vm1028_vm0 = vcmask 785408   ;;  %s2528_s0 = inlined_call_operand.vmem [shape: bf16[2,1760], index: 0, kind: input, shape index: {}]   ;;  %s2529_s1 = inlined_call_operand.vmem [shape: bf16[1760,128], index: 1, kind: input, shape index: {}]   ;;  %s2530_s2 = inlined_call_operand.vmem [shape: f32[1,128], index: 2, kind: input, shape index: {}]   ;;  %s2531_s3 = inlined_call_operand.vmem [shape: f32[128,64], index: 3, kind: input, shape index: {}]   ;;  %s2532_s4 = inlined_call_operand.vmem [shape: f32[1,64], index: 4, kind: input, shape index: {}]   ;;  %s2533_s5 = inlined_call_operand.vmem [shape: f32[64,2], index: 5, kind: input, shape index: {}]   ;;  %s2534_s6 = inlined_call_operand.vmem [shape: f32[1,2], index: 6, kind: input, shape index: {}]   ;;  %s2535_s7 = inlined_call_operand.hbm [shape: f32[2,2], index: 7, kind: output, shape index: {}]  }
   0x1   :  { %v1879_v0 = vld [vmem:[%s2529_s1 + $0x40] sm:$0xff]   ;;  %v1883_v4 = vld [vmem:[%s2529_s1 + $0x48] sm:$0xff]   ;;  %v1887_v8 = vld [vmem:[%s2529_s1 + $0x50] sm:$0xff]   ;;  %v261_v36 = vunpack.c.l.s4 %v2015_v35 }
   0x2   :  { %v1880_v1 = vld [vmem:[%s2529_s1] sm:$0xff]   ;;  %1625 = vmatprep.subr.bf16.mxu0 %v1879_v0  ;;  %v1884_v5 = vld [vmem:[%s2529_s1 + $0x8] sm:$0xff]   ;;  %v1888_v9 = vld [vmem:[%s2529_s1 + $0x10] sm:$0xff]   ;;  %v264_v32 = vshrl.u32 %v263_v27, 7 }
   0x3   :  { %v1881_v2 = vld [vmem:[%s2529_s1 + $0xc0] sm:$0xff]   ;;  %1626 = vmatpush3.bf16.msra.mxu0 %v1880_v1  ;;  %v1885_v6 = vld [vmem:[%s2529_s1 + $0xc8] sm:$0xff]   ;;  %v1889_v10 = vld [vmem:[%s2529_s1 + $0xd0] sm:$0xff]   ;;  %v262_v39 = vunpack.c.0.s8 %v261_v36 }
   0x4   :  { %v1882_v3 = vld [vmem:[%s2529_s1 + $0x80] sm:$0xff]   ;;  %1647 = vmatprep.subr.bf16.mxu1 %v1881_v2  ;;  %1627 = vmatprep.subr.bf16.mxu0 %v1883_v4  ;;  %v1886_v7 = vld [vmem:[%s2529_s1 + $0x88] sm:$0xff]   ;;  %v1890_v11 = vld [vmem:[%s2529_s1 + $0x90] sm:$0xff]  }
   0x5   :  { %1648 = vmatpush3.bf16.msra.mxu1 %v1882_v3  ;;  %v1891_v12 = vld [vmem:[%s2529_s1 + $0x58] sm:$0xff]   ;;  %v1895_v16 = vld [vmem:[%s2529_s1 + $0x60] sm:$0xff]   ;;  %v1899_v20 = vld [vmem:[%s2529_s1 + $0x68] sm:$0xff]   ;;  %v2166_v41 = vsub.s32 %v262_v39, %v264_v32 }
   0x6   :  { %1649 = vmatprep.subr.bf16.mxu1 %v1885_v6  ;;  %v1892_v13 = vld [vmem:[%s2529_s1 + $0x18] sm:$0xff]   ;;  %v1896_v17 = vld [vmem:[%s2529_s1 + $0x20] sm:$0xff]   ;;  %v1900_v21 = vld [vmem:[%s2529_s1 + $0x28] sm:$0xff]  }
   0x7   :  { %1628 = vmatpush3.bf16.msra.mxu0 %v1884_v5  ;;  %v1893_v14 = vld [vmem:[%s2529_s1 + $0xd8] sm:$0xff]   ;;  %v1897_v18 = vld [vmem:[%s2529_s1 + $0xe0] sm:$0xff]   ;;  %v1901_v22 = vld [vmem:[%s2529_s1 + $0xe8] sm:$0xff]  }
   0x8   :  { %1629 = vmatprep.subr.bf16.mxu0 %v1887_v8  ;;  %v1894_v15 = vld [vmem:[%s2529_s1 + $0x98] sm:$0xff]   ;;  %v1898_v19 = vld [vmem:[%s2529_s1 + $0xa0] sm:$0xff]   ;;  %v1902_v23 = vld [vmem:[%s2529_s1 + $0xa8] sm:$0xff]  }
   0x9   :  { %1650 = vmatpush3.bf16.msra.mxu1 %v1886_v7  ;;  %v1903_v24 = vld [vmem:[%s2529_s1 + $0x70] sm:$0xff]   ;;  %v1907_v29 = vld [vmem:[%s2529_s1 + $0x78] sm:$0xff]   ;;  %v28_v33 = vld [vmem:[%s2528_s0] sm:$0xff] }
   0xa   :  { %1651 = vmatprep.subr.bf16.mxu1 %v1889_v10  ;;  %v1904_v25 = vld [vmem:[%s2529_s1 + $0x30] sm:$0xff]   ;;  %v1908_v30 = vld [vmem:[%s2529_s1 + $0x38] sm:$0xff]   ;;  %v1912_v37 = vld [vmem:[%s2529_s1 + $0x140] sm:$0xff]   ;;  %v259_v38 = vcombine.high %v28_v33, %v28_v33  ;;  %v266_v42 = vrot.slane %v28_v33, %v2166_v41 }
   0xb   :  { %1630 = vmatpush3.bf16.msra.mxu0 %v1888_v9  ;;  %v1905_v26 = vld [vmem:[%s2529_s1 + $0xf0] sm:$0xff]   ;;  %v1909_v31 = vld [vmem:[%s2529_s1 + $0xf8] sm:$0xff]   ;;  %v1914_v40 = vld [vmem:[%s2529_s1 + $0x1c0] sm:$0xff]  }
   0xc   :  { %1631 = vmatprep.subr.bf16.mxu0 %v1891_v12  ;;  %v1906_v28 = vld [vmem:[%s2529_s1 + $0xb0] sm:$0xff]   ;;  %v1911_v34 = vld [vmem:[%s2529_s1 + $0xb8] sm:$0xff]   ;;  %v2170_v43 = vrot.slane %v259_v38, %v2166_v41  ;;  %v274_v44 = vcombine.high %v266_v42, %v266_v42  ;;  %v282_v45 = vrot.slane %v266_v42, %v2166_v41  ;;  %v1913_v48 = vld [vmem:[%s2529_s1 + $0x100] sm:$0xff]  }
   0xd   :  { %1652 = vmatpush3.bf16.msra.mxu1 %v1890_v11  ;;  %v1916_v51 = vld [vmem:[%s2529_s1 + $0x148] sm:$0xff]   ;;  %v1915_v53 = vld [vmem:[%s2529_s1 + $0x180] sm:$0xff]   ;;  %v1920_v57 = vld [vmem:[%s2529_s1 + $0x150] sm:$0xff]  }
   0xe   :  { %1653 = vmatprep.subr.bf16.mxu1 %v1893_v14  ;;  %v275_v46 = vcombine.high %v2170_v43, %v2170_v43  ;;  %v296_v47 = vrot.slane %v274_v44, %v2166_v41  ;;  %v304_v50 = vcombine.high %v282_v45, %v282_v45  ;;  %v1918_v54 = vld [vmem:[%s2529_s1 + $0x1c8] sm:$0xff]   ;;  %v1922_v59 = vld [vmem:[%s2529_s1 + $0x1d0] sm:$0xff]   ;;  %v1924_v61 = vld [vmem:[%s2529_s1 + $0x158] sm:$0xff]  }
   0xf   :  { %1632 = vmatpush3.bf16.msra.mxu0 %v1892_v13  ;;  %v1917_v56 = vld [vmem:[%s2529_s1 + $0x108] sm:$0xff]   ;;  %v1921_v60 = vld [vmem:[%s2529_s1 + $0x110] sm:$0xff]   ;;  %v1926_v63 = vld [vmem:[%s2529_s1 + $0x1d8] sm:$0xff]  }
  0x10   :  { %1633 = vmatprep.subr.bf16.mxu0 %v1895_v16  ;;  %v303_v49 = vrot.slane %v275_v46, %v2166_v41  ;;  %1064 = vmatprep.mubr.bf16.mxu0 %v296_v47  ;;  %v306_v52 = vcombine.high %v296_v47, %v296_v47  ;;  %v1919_v58 = vld [vmem:[%s2529_s1 + $0x188] sm:$0xff]   ;;  %v1923_v62 = vld [vmem:[%s2529_s1 + $0x190] sm:$0xff]   ;;  %v1925_v0 = vld [vmem:[%s2529_s1 + $0x118] sm:$0xff]  }
  0x11   :  { %1654 = vmatpush3.bf16.msra.mxu1 %v1894_v15  ;;  %v1928_v1 = vld [vmem:[%s2529_s1 + $0x160] sm:$0xff]   ;;  %v1927_v2 = vld [vmem:[%s2529_s1 + $0x198] sm:$0xff]   ;;  %v1932_v5 = vld [vmem:[%s2529_s1 + $0x168] sm:$0xff]  }
  0x12   :  { %1655 = vmatprep.subr.bf16.mxu1 %v1897_v18  ;;  %v307_v55 = vcombine.high %v303_v49, %v303_v49  ;;  %1104 = vmatprep.mubr.bf16.mxu1 %v306_v52  ;;  %v1930_v3 = vld [vmem:[%s2529_s1 + $0x1e0] sm:$0xff]   ;;  %v1934_v7 = vld [vmem:[%s2529_s1 + $0x1e8] sm:$0xff]   ;;  %v1936_v9 = vld [vmem:[%s2529_s1 + $0x170] sm:$0xff]  }
  0x13   :  { %1634 = vmatpush3.bf16.msra.mxu0 %v1896_v17  ;;  %v1929_v4 = vld [vmem:[%s2529_s1 + $0x120] sm:$0xff]   ;;  %v1933_v8 = vld [vmem:[%s2529_s1 + $0x128] sm:$0xff]   ;;  %v1938_v11 = vld [vmem:[%s2529_s1 + $0x1f0] sm:$0xff]   ;;  %v289_v17 = vrot.slane %v2170_v43, %v2166_v41 }
  0x14   :  { %1635 = vmatprep.subr.bf16.mxu0 %v1899_v20  ;;  %v1931_v6 = vld [vmem:[%s2529_s1 + $0x1a0] sm:$0xff]   ;;  %v1935_v10 = vld [vmem:[%s2529_s1 + $0x1a8] sm:$0xff]   ;;  %v1937_v12 = vld [vmem:[%s2529_s1 + $0x130] sm:$0xff]  }
  0x15   :  { %1656 = vmatpush3.bf16.msra.mxu1 %v1898_v19  ;;  %v1940_v13 = vld [vmem:[%s2529_s1 + $0x178] sm:$0xff]   ;;  %v1939_v14 = vld [vmem:[%s2529_s1 + $0x1b0] sm:$0xff]   ;;  %v1944_v18 = vld [vmem:[%s2529_s1 + $0x240] sm:$0xff]  }
  0x16   :  { %1657 = vmatprep.subr.bf16.mxu1 %v1901_v22  ;;  %v1942_v15 = vld [vmem:[%s2529_s1 + $0x1f8] sm:$0xff]   ;;  %v1946_v20 = vld [vmem:[%s2529_s1 + $0x2c0] sm:$0xff]   ;;  %v305_v22 = vcombine.high %v289_v17, %v289_v17  ;;  %v1952_v27 = vld [vmem:[%s2529_s1 + $0x250] sm:$0xff]  }
  0x17   :  { %1636 = vmatpush3.bf16.msra.mxu0 %v1900_v21  ;;  %v1941_v16 = vld [vmem:[%s2529_s1 + $0x138] sm:$0xff]   ;;  %v1945_v21 = vld [vmem:[%s2529_s1 + $0x200] sm:$0xff]   ;;  %v1955_v32 = vld [vmem:[%s2529_s1 + $0x290] sm:$0xff]  }
  0x18   :  { %1637 = vmatprep.subr.bf16.mxu0 %v1903_v24  ;;  %v1943_v19 = vld [vmem:[%s2529_s1 + $0x1b8] sm:$0xff]   ;;  %v1947_v24 = vld [vmem:[%s2529_s1 + $0x280] sm:$0xff]   ;;  %v1964_v39 = vld [vmem:[%s2529_s1 + $0x268] sm:$0xff]  }
  0x19   :  { %1658 = vmatpush3.bf16.msra.mxu1 %v1902_v23  ;;  %v1948_v23 = vld [vmem:[%s2529_s1 + $0x248] sm:$0xff]   ;;  %v1958_v33 = vld [vmem:[%s2529_s1 + $0x2d8] sm:$0xff]   ;;  %v1960_v35 = vld [vmem:[%s2529_s1 + $0x260] sm:$0xff]  }
  0x1a   :  { %1659 = vmatprep.subr.bf16.mxu1 %v1905_v26  ;;  %v1949_v26 = vld [vmem:[%s2529_s1 + $0x208] sm:$0xff]   ;;  %v1959_v36 = vld [vmem:[%s2529_s1 + $0x298] sm:$0xff]   ;;  %v1961_v38 = vld [vmem:[%s2529_s1 + $0x220] sm:$0xff]  }
  0x1b   :  { %1638 = vmatpush3.bf16.msra.mxu0 %v1904_v25  ;;  %v1950_v25 = vld [vmem:[%s2529_s1 + $0x2c8] sm:$0xff]   ;;  %v1968_v44 = vld [vmem:[%s2529_s1 + $0x270] sm:$0xff]  }
  0x1c   :  { %1639 = vmatprep.subr.bf16.mxu0 %v1907_v29  ;;  %v1954_v29 = vld [vmem:[%s2529_s1 + $0x2d0] sm:$0xff]   ;;  %v1966_v42 = vld [vmem:[%s2529_s1 + $0x2e8] sm:$0xff]  }
  0x1d   :  { %1660 = vmatpush3.bf16.msra.mxu1 %v1906_v28  ;;  %v1951_v28 = vld [vmem:[%s2529_s1 + $0x288] sm:$0xff]  }
  0x1e   :  { %1661 = vmatprep.subr.bf16.mxu1 %v1909_v31  ;;  %v1956_v31 = vld [vmem:[%s2529_s1 + $0x258] sm:$0xff]   ;;  %v1965_v43 = vld [vmem:[%s2529_s1 + $0x228] sm:$0xff]  }
  0x1f   :  { %1640 = vmatpush3.bf16.msra.mxu0 %v1908_v30  ;;  %v1953_v30 = vld [vmem:[%s2529_s1 + $0x210] sm:$0xff]   ;;  %v1967_v46 = vld [vmem:[%s2529_s1 + $0x2a8] sm:$0xff]  }
  0x20   :  { %1669 = vmatprep.subr.bf16.mxu0 %v1912_v37  ;;  %v1962_v37 = vld [vmem:[%s2529_s1 + $0x2e0] sm:$0xff]  }
  0x21   :  { %1662 = vmatpush3.bf16.msra.mxu1 %v1911_v34  ;;  %v1957_v34 = vld [vmem:[%s2529_s1 + $0x218] sm:$0xff]  }
  0x22   :  { %1691 = vmatprep.subr.bf16.mxu1 %v1914_v40  ;;  %1065 = vmatmul.mubr.bf16.vlgmr.msra.gmra.mrb[0].mxu0 %v282_v45  ;;  %v1963_v40 = vld [vmem:[%s2529_s1 + $0x2a0] sm:$0xff]   ;;  %v29_v45 = vld [vmem:[%s2528_s0 + $0x8] sm:$0x3f] }
  0x23   :  { %1670 = vmatpush3.bf16.msra.mxu0 %v1913_v48  ;;  %1144 = vmatprep.mubr.bf16.mxu0 %v303_v49  ;;  %v308_v47 = vcombine.high %v29_v45, %v29_v45  ;;  %v315_v48 = vrot.slane %v29_v45, %v2166_v41  ;;  %v1970_v49 = vld [vmem:[%s2529_s1 + $0x2f0] sm:$0xff]  }
  0x24   :  { %1105 = vmatmul.mubr.bf16.vlgmr.msra.gmra.mrb[0].mxu1 %v304_v50  ;;  %1671 = vmatprep.subr.bf16.mxu0 %v1916_v51  ;;  %v1969_v50 = vld [vmem:[%s2529_s1 + $0x230] sm:$0xff]  }
  0x25   :  { %1692 = vmatpush3.bf16.msra.mxu1 %v1915_v53  ;;  %1184 = vmatprep.mubr.bf16.mxu1 %v307_v55  ;;  %v323_v51 = vcombine.high %v315_v48, %v315_v48  ;;  %v2355_v52 = vrot.slane %v308_v47, %v2166_v41  ;;  %v1972_v53 = vld [vmem:[%s2529_s1 + $0x278] sm:$0xff]  }
  0x26   :  { %1693 = vmatprep.subr.bf16.mxu1 %v1918_v54  ;;  %v1971_v54 = vld [vmem:[%s2529_s1 + $0x2b0] sm:$0xff]  }
  0x27   :  { %1672 = vmatpush3.bf16.msra.mxu0 %v1917_v56  ;;  %v345_v55 = vrot.slane %v323_v51, %v2166_v41  ;;  %v1974_v56 = vld [vmem:[%s2529_s1 + $0x2f8] sm:$0xff]  }
  0x28   :  { %1673 = vmatprep.subr.bf16.mxu0 %v1920_v57  ;;  %v1973_v57 = vld [vmem:[%s2529_s1 + $0x238] sm:$0xff]  }
  0x29   :  { %1694 = vmatpush3.bf16.msra.mxu1 %v1919_v58  ;;  %v354_v58 = vcombine.high %v345_v55, %v345_v55 }
  0x2a   :  { %1695 = vmatprep.subr.bf16.mxu1 %v1922_v59  ;;  %v324_v59 = vcombine.high %v2355_v52, %v2355_v52 }
  0x2b   :  { %1674 = vmatpush3.bf16.msra.mxu0 %v1921_v60  ;;  %v331_v60 = vrot.slane %v315_v48, %v2166_v41 }
  0x2c   :  { %1675 = vmatprep.subr.bf16.mxu0 %v1924_v61  ;;  %v1976_v61 = vld [vmem:[%s2529_s1 + $0x2b8] sm:$0xff]  }
  0x2d   :  { %1696 = vmatpush3.bf16.msra.mxu1 %v1923_v62  ;;  %v1977_v62 = vld [vmem:[%s2529_s1 + $0x300] sm:$0xff]  }
  0x2e   :  { %1697 = vmatprep.subr.bf16.mxu1 %v1926_v63  ;;  %v352_v63 = vrot.slane %v324_v59, %v2166_v41 }
  0x2f   :  { %1676 = vmatpush3.bf16.msra.mxu0 %v1925_v0  ;;  %v2016_v0 = vmov 0  }
  0x30   :  { %1677 = vmatprep.subr.bf16.mxu0 %v1928_v1  ;;  %v353_v1 = vcombine.high %v331_v60, %v331_v60 }
  0x31   :  { %1698 = vmatpush3.bf16.msra.mxu1 %v1927_v2  ;;  %v1978_v2 = vld [vmem:[%s2529_s1 + $0x308] sm:$0xff]  }
  0x32   :  { %1699 = vmatprep.subr.bf16.mxu1 %v1930_v3 }
  0x33   :  { %1678 = vmatpush3.bf16.msra.mxu0 %v1929_v4 }
  0x34   :  { %1679 = vmatprep.subr.bf16.mxu0 %v1932_v5 }
  0x35   :  { %1700 = vmatpush3.bf16.msra.mxu1 %v1931_v6 }
  0x36   :  { %1701 = vmatprep.subr.bf16.mxu1 %v1934_v7 }
  0x37   :  { %1680 = vmatpush3.bf16.msra.mxu0 %v1933_v8 }
  0x38   :  { %1681 = vmatprep.subr.bf16.mxu0 %v1936_v9 }
  0x39   :  { %1702 = vmatpush3.bf16.msra.mxu1 %v1935_v10 }
  0x3a   :  { %1703 = vmatprep.subr.bf16.mxu1 %v1938_v11 }
  0x3b   :  { %1682 = vmatpush3.bf16.msra.mxu0 %v1937_v12 }
  0x3c   :  { %1683 = vmatprep.subr.bf16.mxu0 %v1940_v13 }
  0x3d   :  { %1704 = vmatpush3.bf16.msra.mxu1 %v1939_v14 }
  0x3e   :  { %1705 = vmatprep.subr.bf16.mxu1 %v1942_v15 }
  0x3f   :  { %1684 = vmatpush3.bf16.msra.mxu0 %v1941_v16 }
  0x40   :  { %1713 = vmatprep.subr.bf16.mxu0 %v1944_v18 }
  0x41   :  { %1706 = vmatpush3.bf16.msra.mxu1 %v1943_v19 }
  0x42   :  { %1145 = vmatmul.mubr.bf16.vlgmr.msra.gmra.mrb[4].mxu0 %v289_v17  ;;  %1735 = vmatprep.subr.bf16.mxu1 %v1946_v20 }
  0x43   :  { %1714 = vmatpush3.bf16.msra.mxu0 %v1945_v21  ;;  %1224 = vmatprep.mubr.bf16.mxu0 %v345_v55 }
  0x44   :  { %1185 = vmatmul.mubr.bf16.vlgmr.msra.gmra.mrb[4].mxu1 %v305_v22  ;;  %1715 = vmatprep.subr.bf16.mxu0 %v1948_v23 }
  0x45   :  { %1736 = vmatpush3.bf16.msra.mxu1 %v1947_v24  ;;  %1264 = vmatprep.mubr.bf16.mxu1 %v354_v58 }
  0x46   :  { %1737 = vmatprep.subr.bf16.mxu1 %v1950_v25 }
  0x47   :  { %1716 = vmatpush3.bf16.msra.mxu0 %v1949_v26 }
  0x48   :  { %1717 = vmatprep.subr.bf16.mxu0 %v1952_v27 }
  0x49   :  { %1738 = vmatpush3.bf16.msra.mxu1 %v1951_v28 }
  0x4a   :  { %1739 = vmatprep.subr.bf16.mxu1 %v1954_v29 }
  0x4b   :  { %1718 = vmatpush3.bf16.msra.mxu0 %v1953_v30 }
  0x4c   :  { %1719 = vmatprep.subr.bf16.mxu0 %v1956_v31 }
  0x4d   :  { %1740 = vmatpush3.bf16.msra.mxu1 %v1955_v32 }
  0x4e   :  { %1741 = vmatprep.subr.bf16.mxu1 %v1958_v33 }
  0x4f   :  { %1720 = vmatpush3.bf16.msra.mxu0 %v1957_v34 }
  0x50   :  { %1721 = vmatprep.subr.bf16.mxu0 %v1960_v35 }
  0x51   :  { %1742 = vmatpush3.bf16.msra.mxu1 %v1959_v36 }
  0x52   :  { %1743 = vmatprep.subr.bf16.mxu1 %v1962_v37 }
  0x53   :  { %1722 = vmatpush3.bf16.msra.mxu0 %v1961_v38 }
  0x54   :  { %1723 = vmatprep.subr.bf16.mxu0 %v1964_v39 }
  0x55   :  { %1744 = vmatpush3.bf16.msra.mxu1 %v1963_v40 }
  0x56   :  { %1745 = vmatprep.subr.bf16.mxu1 %v1966_v42 }
  0x57   :  { %1724 = vmatpush3.bf16.msra.mxu0 %v1965_v43 }
  0x58   :  { %1725 = vmatprep.subr.bf16.mxu0 %v1968_v44 }
  0x59   :  { %1746 = vmatpush3.bf16.msra.mxu1 %v1967_v46 }
  0x5a   :  { %1747 = vmatprep.subr.bf16.mxu1 %v1970_v49 }
  0x5b   :  { %1726 = vmatpush3.bf16.msra.mxu0 %v1969_v50 }
  0x5c   :  { %1727 = vmatprep.subr.bf16.mxu0 %v1972_v53 }
  0x5d   :  { %1748 = vmatpush3.bf16.msra.mxu1 %v1971_v54 }
  0x5e   :  { %1749 = vmatprep.subr.bf16.mxu1 %v1974_v56 }
  0x5f   :  { %1728 = vmatpush3.bf16.msra.mxu0 %v1973_v57 }
  0x60   :  { %1272 = vmatprep.subr.bf16.mxu0 %v2016_v0 }
  0x61   :  { %1750 = vmatpush3.bf16.msra.mxu1 %v1976_v61 }
  0x62   :  { %1225 = vmatmul.mubr.bf16.vlgmr.msra.gmra.mrb[8].mxu0 %v331_v60 }
  0x63   :  { %1273 = vmatpush1.bf16.msra.mxu0 %v1977_v62  ;;  %1621 = vmatprep.mubr.msk.bf16.mxu0 %vm1028_vm0, %v352_v63 }
  0x64   :  { %12 = vsyncpa [#allocation3], 0  ;;  %1265 = vmatmul.mubr.bf16.vlgmr.msra.gmra.mrb[8].mxu1 %v353_v1  ;;  %1274 = vmatprep.subr.bf16.mxu0 %v2016_v0  ;;  %v1979_v3 = vld [vmem:[%s2529_s1 + $0x310] sm:$0xff]   ;;  %v1980_v4 = vld [vmem:[%s2529_s1 + $0x318] sm:$0xff]   ;;  %v338_v15 = vrot.slane %v2355_v52, %v2166_v41  ;;  %v2017_v19 = vmov 0.0|0.0   ;;  %vm2018_vm1 = vmmov 0  }
  0x65   :  { %v1981_v5 = vld [vmem:[%s2529_s1 + $0x320] sm:$0xff]   ;;  %v1982_v6 = vld [vmem:[%s2529_s1 + $0x328] sm:$0xff]   ;;  %v1983_v7 = vld [vmem:[%s2529_s1 + $0x330] sm:$0xff]   ;;  %1837 = vmatprep.subr.bf16.mxu1 %v2017_v19  ;;  %v2019_v40 = vmov 0.0   ;;  %vm1420_vm2 = vcmask 523264   ;;  %s2020_s18 = smov [#allocation2]  }
  0x66   :  { %v1984_v8 = vld [vmem:[%s2529_s1 + $0x338] sm:$0xff]   ;;  %v1985_v9 = vld [vmem:[%s2529_s1 + $0x340] sm:$0xff]   ;;  %v1986_v10 = vld [vmem:[%s2529_s1 + $0x348] sm:$0xff]   ;;  %1815 = vmatprep.mubr.msk.f32.mxu1 %vm2018_vm1, %v2019_v40  ;;  %s1502_s19 = sshll.u32 %s2020_s18, 4  ;;  %vm1494_vm3 = vcmask 9216   ;;  %s1503_s19 = int_to_ptr.vmem [resolvable:$true] %s1502_s19 }
  0x67   :  { %1275 = vmatpush1.bf16.msra.mxu0 %v1978_v2  ;;  %v1987_v11 = vld [vmem:[%s2529_s1 + $0x350] sm:$0xff]   ;;  %v1988_v12 = vld [vmem:[%s2529_s1 + $0x358] sm:$0xff]   ;;  %v1989_v13 = vld [vmem:[%s2529_s1 + $0x360] sm:$0xff]   ;;  %p1996_p1 = scmp.lt.s32.totalorder %s1503_s19, %s1503_s19 }
  0x68   :  { %1276 = vmatprep.subr.bf16.mxu0 %v2016_v0  ;;  %v1990_v14 = vld [vmem:[%s2529_s1 + $0x368] sm:$0xff]   ;;  %v1312_v16 = vld [vmem:[%s2531_s3] sm:$0xff]  ;;  %v1314_v18 = vld [vmem:[%s2531_s3 + $0x10] sm:$0xff] }
  0x69   :  { %v1313_v17 = vld [vmem:[%s2531_s3 + $0x8] sm:$0xff]  ;;  %v1315_v41 = vld [vmem:[%s2531_s3 + $0x18] sm:$0xff]  ;;  %v1316_v22 = vld [vmem:[%s2531_s3 + $0x20] sm:$0xff] }
  0x6a   :  { %v1838_v20 = vpack.c.bf16 %v1313_v17, %v1312_v16  ;;  %v1841_v21 = vpack.c.bf16 %v1315_v41, %v1314_v18  ;;  %v1317_v23 = vld [vmem:[%s2531_s3 + $0x28] sm:$0xff]  ;;  %v1318_v25 = vld [vmem:[%s2531_s3 + $0x30] sm:$0xff]  ;;  %v1319_v26 = vld [vmem:[%s2531_s3 + $0x38] sm:$0xff] }
  0x6b   :  { %1277 = vmatpush1.bf16.msra.mxu0 %v1979_v3  ;;  %v1844_v24 = vpack.c.bf16 %v1317_v23, %v1316_v22  ;;  %v1847_v27 = vpack.c.bf16 %v1319_v26, %v1318_v25  ;;  %v1320_v28 = vld [vmem:[%s2531_s3 + $0x40] sm:$0xff]  ;;  %v1321_v29 = vld [vmem:[%s2531_s3 + $0x48] sm:$0xff]  ;;  %v1322_v31 = vld [vmem:[%s2531_s3 + $0x50] sm:$0xff] }
  0x6c   :  { %1278 = vmatprep.subr.bf16.mxu0 %v2016_v0  ;;  %1839 = vmatpush3.bf16.msra.mxu1 %v1838_v20  ;;  %v1850_v30 = vpack.c.bf16 %v1321_v29, %v1320_v28  ;;  %v1323_v32 = vld [vmem:[%s2531_s3 + $0x58] sm:$0xff]  ;;  %v1324_v34 = vld [vmem:[%s2531_s3 + $0x60] sm:$0xff]  ;;  %v1325_v35 = vld [vmem:[%s2531_s3 + $0x68] sm:$0xff] }
  0x6d   :  { %1840 = vmatprep.subr.bf16.mxu1 %v2017_v19  ;;  %v1853_v33 = vpack.c.bf16 %v1323_v32, %v1322_v31  ;;  %v1856_v36 = vpack.c.bf16 %v1325_v35, %v1324_v34  ;;  %v1326_v37 = vld [vmem:[%s2531_s3 + $0x70] sm:$0xff]  ;;  %v1327_v38 = vld [vmem:[%s2531_s3 + $0x78] sm:$0xff]  ;;  %v1510_v43 = vld [vmem:[%s2530_s2] ss:$0 sm:$0xff] }
  0x6e   :  { %v1859_v39 = vpack.c.bf16 %v1327_v38, %v1326_v37  ;;  %v1406_v16 = vld [vmem:[%s2533_s5 + $0x8] sm:$0xff]  ;;  %v1408_v22 = vld [vmem:[%s2533_s5 + $0x18] sm:$0xff]  ;;  %v1409_v26 = vld [vmem:[%s2533_s5 + $0x20] sm:$0xff] }
  0x6f   :  { %1279 = vmatpush1.bf16.msra.mxu0 %v1980_v4  ;;  %v1411_v29 = vld [vmem:[%s2533_s5 + $0x30] sm:$0xff]  ;;  %v1622_v32 = vld [vmem:[%s2532_s4] ss:$0 sm:$0xff] }
  0x70   :  { %1280 = vmatprep.subr.bf16.mxu0 %v2016_v0  ;;  %1842 = vmatpush3.bf16.msra.mxu1 %v1841_v21  ;;  %v1407_v21 = vld [vmem:[%s2533_s5 + $0x10] sm:$0xff] }
  0x71   :  { %1843 = vmatprep.subr.bf16.mxu1 %v2017_v19  ;;  %v1865_v25 = vpack.c.bf16 %v1408_v22, %v1407_v21 }
  0x73   :  { %1281 = vmatpush1.bf16.msra.mxu0 %v1981_v5 }
  0x74   :  { %1282 = vmatprep.subr.bf16.mxu0 %v2016_v0  ;;  %1845 = vmatpush3.bf16.msra.mxu1 %v1844_v24 }
  0x75   :  { %1846 = vmatprep.subr.bf16.mxu1 %v2017_v19 }
  0x77   :  { %1283 = vmatpush1.bf16.msra.mxu0 %v1982_v6 }
  0x78   :  { %1284 = vmatprep.subr.bf16.mxu0 %v2016_v0  ;;  %1848 = vmatpush3.bf16.msra.mxu1 %v1847_v27  ;;  %v1410_v27 = vld [vmem:[%s2533_s5 + $0x28] sm:$0xff] }
  0x79   :  { %1849 = vmatprep.subr.bf16.mxu1 %v2017_v19  ;;  %v1868_v28 = vpack.c.bf16 %v1410_v27, %v1409_v26 }
  0x7b   :  { %1285 = vmatpush1.bf16.msra.mxu0 %v1983_v7 }
  0x7c   :  { %1286 = vmatprep.subr.bf16.mxu0 %v2016_v0  ;;  %1851 = vmatpush3.bf16.msra.mxu1 %v1850_v30  ;;  %v1412_v30 = vld [vmem:[%s2533_s5 + $0x38] sm:$0xff] }
  0x7d   :  { %1852 = vmatprep.subr.bf16.mxu1 %v2017_v19  ;;  %v1871_v31 = vpack.c.bf16 %v1412_v30, %v1411_v29 }
  0x7f   :  { %1287 = vmatpush1.bf16.msra.mxu0 %v1984_v8 }
  0x80   :  { %1288 = vmatprep.subr.bf16.mxu0 %v2016_v0  ;;  %1854 = vmatpush3.bf16.msra.mxu1 %v1853_v33 }
  0x81   :  { %1855 = vmatprep.subr.bf16.mxu1 %v2017_v19 }
  0x83   :  { %1289 = vmatpush1.bf16.msra.mxu0 %v1985_v9 }
  0x84   :  { %1290 = vmatprep.subr.bf16.mxu0 %v2016_v0  ;;  %1857 = vmatpush3.bf16.msra.mxu1 %v1856_v36 }
  0x85   :  { %1858 = vmatprep.subr.bf16.mxu1 %v2017_v19 }
  0x87   :  { %1291 = vmatpush1.bf16.msra.mxu0 %v1986_v10 }
  0x88   :  { %1292 = vmatprep.subr.bf16.mxu0 %v2016_v0  ;;  %1860 = vmatpush3.bf16.msra.mxu1 %v1859_v39 }
  0x89   :  { %1861 = vmatprep.subr.bf16.mxu1 %v2017_v19 }
  0x8b   :  { %1293 = vmatpush1.bf16.msra.mxu0 %v1987_v11 }
  0x8c   :  { %1294 = vmatprep.subr.bf16.mxu0 %v2016_v0 }
  0x8f   :  { %1295 = vmatpush1.bf16.msra.mxu0 %v1988_v12 }
  0x90   :  { %1296 = vmatprep.subr.bf16.mxu0 %v2016_v0 }
  0x93   :  { %1297 = vmatpush1.bf16.msra.mxu0 %v1989_v13 }
  0x94   :  { %1298 = vmatprep.subr.bf16.mxu0 %v2016_v0 }
  0x97   :  { %1299 = vmatpush1.bf16.msra.mxu0 %v1990_v14 }
  0x9a   :  { %1305 = vmatmul.mubr.bf16.vlgmr.msra.gmra.mrb[12].mxu0 %v338_v15  ;;  %v1405_v15 = vld [vmem:[%s2533_s5] sm:$0xff]  ;;  %s1991_s5 = scalar_lea.vmem %s1503_s19, 32 }
  0x9b   :  { %v1862_v18 = vpack.c.bf16 %v1406_v16, %v1405_v15  ;;  %p1992_p0 = scmp.ne.s32.totalorder %s1503_s19, %s1991_s5  ;;  %p1997_p2 = scmp.lt.s32.totalorder %s1991_s5, %s1991_s5 }
  0x9d   :  { %p1998_p3 = por %p1997_p2, %p1996_p1 }
  0x9f   :  { %p1999_p4 = pnand %p1998_p3, %p1992_p0 }
  0xf5   :  { %v1641_v42 = vpop.f32.mrb[0].mxu0 }
  0xf6   :  { %v1642_v44 = vpop.f32.mrb[1].mxu0 }
  0xf7   :  { %v1643_v45 = vadd.f32 %v1642_v44, %v1641_v42  ;;  %v1644_v46 = vpop.f32.mrb[2].mxu0  ;;  %v1663_v47 = vpop.f32.mrb[0].mxu1 }
  0xf8   :  { %v1645_v48 = vpop.f32.mrb[3].mxu0  ;;  %v1664_v49 = vpop.f32.mrb[1].mxu1 }
  0xf9   :  { %v1067_v50 = vadd.f32 %v1643_v45, %v1510_v43  ;;  %v1665_v51 = vadd.f32 %v1664_v49, %v1663_v47  ;;  %v1666_v52 = vpop.f32.mrb[2].mxu1 }
  0xfa   :  { %v1667_v53 = vpop.f32.mrb[3].mxu1 }
  0xfb   :  { %v1107_v54 = vadd.f32 %v1665_v51, %v1067_v50 }
 0x115   :  { %v1685_v55 = vpop.f32.mrb[4].mxu0 }
 0x116   :  { %v1686_v56 = vpop.f32.mrb[5].mxu0 }
 0x117   :  { %v1687_v57 = vadd.f32 %v1686_v56, %v1685_v55  ;;  %v1688_v58 = vpop.f32.mrb[6].mxu0  ;;  %v1707_v59 = vpop.f32.mrb[4].mxu1 }
 0x118   :  { %v1689_v60 = vpop.f32.mrb[7].mxu0  ;;  %v1708_v61 = vpop.f32.mrb[5].mxu1 }
 0x119   :  { %v1147_v62 = vadd.f32 %v1687_v57, %v1107_v54  ;;  %v1709_v63 = vadd.f32 %v1708_v61, %v1707_v59  ;;  %v1710_v0 = vpop.f32.mrb[6].mxu1 }
 0x11a   :  { %v1711_v1 = vpop.f32.mrb[7].mxu1 }
 0x11b   :  { %v1187_v2 = vadd.f32 %v1709_v63, %v1147_v62 }
 0x135   :  { %v1729_v3 = vpop.f32.mrb[8].mxu0 }
 0x136   :  { %v1730_v4 = vpop.f32.mrb[9].mxu0 }
 0x137   :  { %v1731_v5 = vadd.f32 %v1730_v4, %v1729_v3  ;;  %v1732_v6 = vpop.f32.mrb[10].mxu0  ;;  %v1751_v7 = vpop.f32.mrb[8].mxu1 }
 0x138   :  { %v1733_v8 = vpop.f32.mrb[11].mxu0  ;;  %v1752_v9 = vpop.f32.mrb[9].mxu1 }
 0x139   :  { %v1227_v10 = vadd.f32 %v1731_v5, %v1187_v2  ;;  %v1753_v11 = vadd.f32 %v1752_v9, %v1751_v7  ;;  %v1754_v12 = vpop.f32.mrb[10].mxu1 }
 0x13a   :  { %v1755_v13 = vpop.f32.mrb[11].mxu1 }
 0x13b   :  { %v1267_v14 = vadd.f32 %v1753_v11, %v1227_v10 }
 0x16d   :  { %v1306_v17 = vpop.f32.mrb[12].mxu0 }
 0x16e   :  { %v1307_v20 = vadd.f32 %v1306_v17, %v1267_v14  ;;  %v1308_v41 = vpop.f32.mrb[13].mxu0 }
 0x16f   :  { %v1309_v23 = vpop.f32.mrb[14].mxu0 }
 0x170   :  { %v1310_v24 = vpop.f32.mrb[15].mxu0  ;;  %1816 = vmatmul.mubr.f32.vlgmr.msra.gmra.mrb[12].mxu1 %v1307_v20 }
 0x171   :  { %1863 = vmatpush3.bf16.msra.mxu1 %v1862_v18  ;;  %1834 = vmatprep.mubr.msk.f32.mxu1 %vm2018_vm1, %v2019_v40 }
 0x172   :  { %1864 = vmatprep.subr.bf16.mxu1 %v2017_v19 }
 0x175   :  { %1866 = vmatpush3.bf16.msra.mxu1 %v1865_v25 }
 0x176   :  { %1867 = vmatprep.subr.bf16.mxu1 %v2017_v19 }
 0x179   :  { %1869 = vmatpush3.bf16.msra.mxu1 %v1868_v28 }
 0x17a   :  { %1870 = vmatprep.subr.bf16.mxu1 %v2017_v19  ;;  %v1623_v19 = vld [vmem:[%s2534_s6] ss:$0 sm:$0xff] }
 0x17d   :  { %1872 = vmatpush3.bf16.msra.mxu1 %v1871_v31 }
 0x243   :  { %v1401_v33 = vpop.f32.mrb[12].mxu1 }
 0x244   :  { %v1402_v34 = vadd.f32 %v1622_v32, %v1401_v33  ;;  %v1817_v35 = vpop.f32.mrb[13].mxu1 }
 0x246   :  { %1835 = vmatmul.mubr.msk.f32.vlgmr.msra.gmra.mrb[14].mxu1 %vm1420_vm2, %v1402_v34 }
 0x319   :  { %v1490_v36 = vpop.f32.mrb[14].mxu1 }
 0x31a   :  { %v1491_v37 = vadd.f32 %v1623_v19, %v1490_v36  ;;  %v1836_v38 = vpop.f32.mrb[15].mxu1 }
 0x31c   :  { %1495 = vst.msk [vmem:[#allocation2] sm:$0x3] %vm1494_vm3, %v1491_v37 }
 0x31d   :  { %2002 = shalt.err (!%p1999_p4)
}
 0x31e   :  { %s2003_s21 = scalar_lea.hbm %s2535_s7, 32 }
 0x31f   :  { %p2004_p5 = scmp.ne.s32.totalorder %s2535_s7, %s2003_s21  ;;  %p2007_p6 = scmp.lt.u32.totalorder %s2003_s21, %s2535_s7 }
 0x321   :  { %p2009_p7 = pnand %p2007_p6, %p2004_p5 }
 0x323   :  { %2012 = shalt.err (!%p2009_p7)
}
 0x324   :  { %1505 = dma.vmem_to_hbm [thread:$0]  %s1503_s19, 32, %s2535_s7, [#allocation3]  }
 0x325   :  { %2013 = dma.done.wait [#allocation3], 32  }
 0x326   :  { %2014 = vsyncadd [#allocation3], 4294967264 }
 0x327   :  { %1509 = vsyncpa [#allocation3], 1 }

</bundles_post_ra>
